<compile_context>
chip_gen: v5e
topology: v5e:2x2
jax: 0.10.0
libtpu: 0.0.40
codegen_flags: <defaults>
</compile_context>

<pallas_src>
import functools

import numpy as np
import jax
import jax.numpy as jnp
from jax.experimental import pallas as pl
from jax.experimental.pallas import tpu as pltpu

TEMPERATURE = 0.07          # kept for API parity; cancels in the second F.normalize
COEFFICIENT = 1.0
MAX_PIXELS = 10500
_EPS = 1e-12                # F.normalize eps
_VMEM_BUDGET = 40 * 1024 * 1024   # conservative: fits v7x (64 MiB) with headroom


# ----------------------------- Pallas kernel --------------------------------
def _supcon_kernel(lhs_ref, rhs_t_ref, code_col_ref, code_row_ref, out_ref):
    """One (TILE_M, Np) row-strip of the Gram / exp matrices per grid step."""
    a = lhs_ref[...]                       # (TM, Cp) bf16 -- L2-normalized pixel rows
    b = rhs_t_ref[...]                     # (Cp, Np) bf16 -- same matrix, transposed, resident
    code_c = code_col_ref[...]             # (TM, 1)  f32: +1 positive / 0 negative / -1 padded
    code_r = code_row_ref[...]             # (1, Np)  f32

    vcol = (code_c >= 0.0).astype(jnp.float32)                      # (TM, 1) valid rows
    vrow = (code_r >= 0.0).astype(jnp.float32)                      # (1, Np) valid cols
    same = jnp.logical_and(code_c == code_r, code_c >= 0.0)         # valid & same-class pairs
    same = same.astype(jnp.float32)                                 # (TM, Np)

    # Gram strip on the MXU (f32 accumulate).  torch's dot/temperature is dropped:
    # a uniform per-row scale cancels in the row-L2 normalize below.
    dot = jnp.dot(a, b, preferred_element_type=jnp.float32)         # (TM, Np)

    # Second F.normalize (per Gram row).  Padded columns contribute exactly 0.
    sumsq = jnp.sum(dot * dot, axis=1, keepdims=True)               # (TM, 1)
    inv = jax.lax.rsqrt(jnp.maximum(sumsq, _EPS * _EPS))            # 1 / max(||row||, eps)

    # log(positive_mask) == dotn where class_mask holds, 0 elsewhere, so the whole
    # exp -> where(==0,1) -> log pass collapses to a masked sum of dotn.  The diagonal
    # (same-class but excluded by torch) is removed analytically: dot[i,i] = 1 for
    # valid rows, hence dotn[i,i] = inv[i]  (inv <= 1 for valid rows).
    masked_rowsum = jnp.sum(dot * same, axis=1, keepdims=True)      # (TM, 1)
    inv_diag = jnp.minimum(inv, 1.0)                                # == inv on valid rows
    pos_partial = jnp.sum(inv * masked_rowsum - vcol * inv_diag)

    # denominator[i] = sum_{valid j} exp(dotn[i, j]) - exp(dotn[i, i])
    e = jnp.exp(dot * inv)                                          # (TM, Np)
    row_e = jnp.sum(e * vrow, axis=1, keepdims=True)                # (TM, 1)
    denom = row_e - jnp.exp(inv_diag)
    denom_safe = jnp.where(vcol > 0.0, denom, 1.0)                  # padded rows -> log(1)=0
    den_partial = jnp.sum(jnp.log(denom_safe) * vcol)

    # Pack the two scalar partials into a lane-dense (8, 128) output block.
    sub = jax.lax.broadcasted_iota(jnp.int32, (8, 128), 0)
    lane = jax.lax.broadcasted_iota(jnp.int32, (8, 128), 1)
    blk = (jnp.where(jnp.logical_and(sub == 0, lane == 0), pos_partial, 0.0)
           + jnp.where(jnp.logical_and(sub == 0, lane == 1), den_partial, 0.0))
    out_ref[...] = blk.astype(jnp.float32)


def _make_compiler_params():
    cls = getattr(pltpu, "CompilerParams", None)
    if cls is None:  # older jax spelling
        cls = getattr(pltpu, "TPUCompilerParams")
    return cls(dimension_semantics=("parallel",),
               vmem_limit_bytes=64 * 1024 * 1024)


@functools.partial(jax.jit, static_argnames=("tile_m", "coefficient"))
def _supcon_from_padded(pixels_padded, code_col, code_row, n_valid, *, tile_m, coefficient):
    """pixels_padded: (Np, Cp) f32 zero-padded; code_*: +1/0/-1 class codes."""
    n_pad, c_pad = pixels_padded.shape

    # pixels = F.normalize(pixels)  (per-row L2, eps = 1e-12), done once; the normalized
    # matrix is both the per-tile LHS and the resident pre-transposed bf16 RHS.
    sumsq = jnp.sum(pixels_padded * pixels_padded, axis=1, keepdims=True)
    pn = pixels_padded / jnp.maximum(jnp.sqrt(sumsq), _EPS)
    lhs = pn.astype(jnp.bfloat16)                     # (Np, Cp)
    rhs_t = pn.T.astype(jnp.bfloat16)                 # (Cp, Np), resident across the grid

    num_blocks = n_pad // tile_m
    partials = pl.pallas_call(
        _supcon_kernel,
        out_shape=jax.ShapeDtypeStruct((num_blocks * 8, 128), jnp.float32),
        grid=(num_blocks,),
        in_specs=[
            pl.BlockSpec((tile_m, c_pad), lambda i: (i, 0)),   # LHS row strip
            pl.BlockSpec((c_pad, n_pad), lambda i: (0, 0)),    # resident transposed RHS
            pl.BlockSpec((tile_m, 1), lambda i: (i, 0)),       # class codes (strip rows)
            pl.BlockSpec((1, n_pad), lambda i: (0, 0)),        # class codes (all cols)
        ],
        out_specs=pl.BlockSpec((8, 128), lambda i: (i, 0)),
        compiler_params=_make_compiler_params(),
    )(lhs, rhs_t, code_col, code_row)

    sums = jnp.sum(partials, axis=0)                  # (128,)
    pos_total = sums[0]                               # sum log(positive_mask)
    den_total = sums[1]                               # sum_j log(denominator_j)
    total = pos_total - n_valid * den_total
    return -(total / n_valid) * coefficient


# --------------------------- host-side sizing --------------------------------
def _bucket_rows(n):
    """Fixed padding buckets so distinct images don't each trigger a recompile."""
    n = max(int(n), 1)
    if n <= 256:
        return 256
    if n <= 2048:
        return 1 << int(np.ceil(np.log2(n)))
    return int(np.ceil(n / 2048.0)) * 2048


def _choose_tile_m(n_pad, c_pad, budget_bytes=_VMEM_BUDGET):
    """Largest row-strip that keeps ~3 live f32 strips + resident bf16 RHS in budget."""
    resident = 2 * (c_pad * n_pad * 2)      # double-buffered bf16 RHS^T
    resident += 2 * (n_pad * 4)             # (1, Np) code row, double-buffered
    avail = budget_bytes - resident
    for cand in (512, 256, 128):
        if n_pad % cand:
            continue
        live = 3 * cand * n_pad * 4 + 2 * (cand * c_pad * 2)
        if live <= avail:
            return cand
    return 128


# --------------------------- host-side glue ----------------------------------
def _build_pixels_labels(Zs, pixel_mask, brain_mask, subtracted_mask=None):
    """Replicates the torch gather / reshape / truncation logic (numpy, host side)."""
    # TODO(synk): the data-dependent boolean-mask gather has no clean static Pallas
    # equivalent, so it stays on the host; only the O(N^2) math runs in the kernel.
    Zs = np.asarray(Zs)
    pixel_mask = np.asarray(pixel_mask)
    C = Zs.shape[1]

    positive_mask = pixel_mask == 1                                   # (1, H, W)
    if subtracted_mask is not None:
        negative_mask = np.squeeze(np.asarray(subtracted_mask) == 1, axis=(0, 1))
    elif brain_mask is not None:
        negative_mask = np.squeeze(
            np.logical_and(np.asarray(brain_mask) == 1, pixel_mask == 0), axis=0)
    else:
        negative_mask = pixel_mask == 0

    Zp = np.transpose(Zs, (1, 0, 2, 3))                               # (C, 1, H, W)
    pos_pixels = Zp[:, positive_mask].reshape(-1, C)                  # exact torch reshape quirk
    neg_pixels = Zp[:, negative_mask].reshape(-1, C)

    # torch uses randperm; the loss is permutation-invariant within a class block,
    # so identity ordering gives an identical loss.
    if pos_pixels.shape[0] > MAX_PIXELS:
        pos_pixels = pos_pixels[:MAX_PIXELS]
    if pos_pixels.shape[0] < neg_pixels.shape[0]:
        neg_pixels = neg_pixels[:pos_pixels.shape[0]]
    elif neg_pixels.shape[0] > MAX_PIXELS:
        neg_pixels = neg_pixels[:MAX_PIXELS]

    pixels = np.concatenate([pos_pixels, neg_pixels], axis=0).astype(np.float32)
    labels = np.concatenate([np.ones(pos_pixels.shape[0], np.float32),
                             np.zeros(neg_pixels.shape[0], np.float32)])
    return pixels, labels


def voxelwise_supcon_loss(Zs, pixel_mask, brain_mask, subtracted_mask=None,
                          coefficient=COEFFICIENT):
    pixels, labels = _build_pixels_labels(Zs, pixel_mask, brain_mask, subtracted_mask)
    N, C = pixels.shape
    c_pad = int(np.ceil(max(C, 1) / 128.0)) * 128
    n_pad = _bucket_rows(N)
    tile_m = _choose_tile_m(n_pad, c_pad)

    pixels_padded = np.zeros((n_pad, c_pad), np.float32)
    pixels_padded[:N, :C] = pixels
    code = np.full((n_pad,), -1.0, np.float32)      # -1 = padded row
    code[:N] = labels                               # +1 positive / 0 negative

    return _supcon_from_padded(
        jnp.asarray(pixels_padded),
        jnp.asarray(code.reshape(n_pad, 1)),
        jnp.asarray(code.reshape(1, n_pad)),
        jnp.float32(N),
        tile_m=tile_m,
        coefficient=float(coefficient))


# ---------------------------- numpy reference --------------------------------
def _reference_loss(pixels, labels, temperature=TEMPERATURE, coefficient=COEFFICIENT):
    pixels = pixels.astype(np.float64)
    norms = np.sqrt(np.sum(pixels * pixels, axis=1, keepdims=True))
    pn = pixels / np.maximum(norms, _EPS)
    dot = pn @ pn.T / temperature
    dnorm = np.sqrt(np.sum(dot * dot, axis=1, keepdims=True))
    dot = dot / np.maximum(dnorm, _EPS)
    e = np.exp(dot)
    N = len(labels)
    class_mask = labels[None, :] == labels[:, None]
    np.fill_diagonal(class_mask, False)
    pos = e * class_mask
    pos[pos == 0] = 1.0
    denom = e.sum(axis=1) - np.diag(e)
    full = np.log(pos) - np.log(denom)[None, :]
    return -(1.0 / N) * full.sum() * coefficient


if __name__ == "__main__":
    def run_case(C, H, W, density, key):
        k1, k2, k3 = jax.random.split(key, 3)
        B = 1
        Zs = jax.random.normal(k1, (B, C, H, W), dtype=jnp.float32)
        pixel_mask = (jax.random.uniform(k2, (B, H, W)) < density).astype(jnp.int32)
        pixel_mask = pixel_mask.at[0, :2, :4].set(1)          # guarantee some positives
        brain_mask = (jax.random.uniform(k3, (B, 1, H, W)) < 0.9).astype(jnp.int32)

        loss = voxelwise_supcon_loss(Zs, pixel_mask, brain_mask)
        loss = jax.block_until_ready(loss)

        pixels_ref, labels_ref = _build_pixels_labels(Zs, pixel_mask, brain_mask)
        ref = _reference_loss(pixels_ref, labels_ref)
        assert np.isfinite(float(loss)), float(loss)
        assert np.allclose(float(loss), ref, rtol=2e-2, atol=5e-2), (float(loss), ref)

    key = jax.random.PRNGKey(0)
    k_a, k_b = jax.random.split(key)
    run_case(C=8, H=16, W=16, density=0.12, key=k_a)   # single-strip path (n_pad = 256)
    run_case(C=8, H=48, W=48, density=0.12, key=k_b)   # multi-strip path (grid > 1)
    print("KERNEL_OK")
</pallas_src>

<mosaic_0001>
module attributes {stable_mosaic.version = 11 : i64} {
  func.func @_supcon_kernel(%arg0: i32, %arg1: memref<256x128xbf16, #tpu.memory_space<vmem>>, %arg2: memref<128x256xbf16, #tpu.memory_space<vmem>>, %arg3: memref<256x1xf32, #tpu.memory_space<vmem>>, %arg4: memref<1x256xf32, #tpu.memory_space<vmem>>, %arg5: memref<8x128xf32, #tpu.memory_space<vmem>>) attributes {dimension_semantics = [#tpu.dimension_semantics<parallel>], iteration_bounds = array<i64: 1>, scalar_prefetch = 0 : i64, scratch_operands = 0 : i64, tpu.core_type = #tpu.core_type<tc>, window_params = [{transform_indices = @transform_0, window_bounds = array<i64: 256, 128>}, {pipeline_mode = #tpu.pipeline_mode<synchronous>, transform_indices = @transform_1, window_bounds = array<i64: 128, 256>}, {transform_indices = @transform_2, window_bounds = array<i64: 256, 1>}, {pipeline_mode = #tpu.pipeline_mode<synchronous>, transform_indices = @transform_3, window_bounds = array<i64: 1, 256>}, {transform_indices = @transform_4, window_bounds = array<i64: 8, 128>}]} {
    %c0 = arith.constant 0 : index
    %c0_0 = arith.constant 0 : index
    %0 = vector.load %arg1[%c0, %c0_0] : memref<256x128xbf16, #tpu.memory_space<vmem>>, vector<256x128xbf16>
    %c0_1 = arith.constant 0 : index
    %c0_2 = arith.constant 0 : index
    %1 = vector.load %arg2[%c0_1, %c0_2] : memref<128x256xbf16, #tpu.memory_space<vmem>>, vector<128x256xbf16>
    %c0_3 = arith.constant 0 : index
    %c0_4 = arith.constant 0 : index
    %2 = vector.load %arg3[%c0_3, %c0_4] : memref<256x1xf32, #tpu.memory_space<vmem>>, vector<256x1xf32>
    %c0_5 = arith.constant 0 : index
    %c0_6 = arith.constant 0 : index
    %3 = vector.load %arg4[%c0_5, %c0_6] : memref<1x256xf32, #tpu.memory_space<vmem>>, vector<1x256xf32>
    %cst = arith.constant 0.000000e+00 : f32
    %4 = vector.broadcast %cst : f32 to vector<256x1xf32>
    %5 = arith.cmpf oge, %2, %4 : vector<256x1xf32>
    %6 = arith.extui %5 : vector<256x1xi1> to vector<256x1xi32>
    %7 = arith.sitofp %6 : vector<256x1xi32> to vector<256x1xf32>
    %cst_7 = arith.constant 0.000000e+00 : f32
    %8 = vector.broadcast %cst_7 : f32 to vector<1x256xf32>
    %9 = arith.cmpf oge, %3, %8 : vector<1x256xf32>
    %10 = arith.extui %9 : vector<1x256xi1> to vector<1x256xi32>
    %11 = arith.sitofp %10 : vector<1x256xi32> to vector<1x256xf32>
    %12 = vector.broadcast %2 : vector<256x1xf32> to vector<256x256xf32>
    %13 = vector.broadcast %3 : vector<1x256xf32> to vector<256x256xf32>
    %14 = arith.cmpf oeq, %12, %13 : vector<256x256xf32>
    %cst_8 = arith.constant 0.000000e+00 : f32
    %15 = vector.broadcast %cst_8 : f32 to vector<256x1xf32>
    %16 = arith.cmpf oge, %2, %15 : vector<256x1xf32>
    %17 = vector.broadcast %16 : vector<256x1xi1> to vector<256x256xi1>
    %18 = arith.andi %14, %17 : vector<256x256xi1>
    %19 = arith.extui %18 : vector<256x256xi1> to vector<256x256xi32>
    %20 = arith.sitofp %19 : vector<256x256xi32> to vector<256x256xf32>
    %cst_9 = arith.constant dense<0.000000e+00> : vector<256x256xf32>
    %21 = tpu.matmul %0, %1, %cst_9 {dimension_numbers = #tpu.dot_dimension_numbers<[1], [0], [0], [1], [0, 0, 1, 1], [], []>} : vector<256x128xbf16>, vector<128x256xbf16>, vector<256x256xf32> -> vector<256x256xf32>
    %22 = arith.mulf %21, %21 : vector<256x256xf32>
    %cst_10 = arith.constant dense<0.000000e+00> : vector<256xf32>
    %23 = vector.multi_reduction <add>, %22, %cst_10 [1] : vector<256x256xf32> to vector<256xf32>
    %24 = vector.shape_cast %23 : vector<256xf32> to vector<256x1xf32>
    %cst_11 = arith.constant 1.000000e-24 : f32
    %25 = vector.broadcast %cst_11 : f32 to vector<256x1xf32>
    %26 = arith.maximumf %24, %25 : vector<256x1xf32>
    %27 = math.rsqrt %26 : vector<256x1xf32>
    %28 = arith.mulf %21, %20 : vector<256x256xf32>
    %cst_12 = arith.constant dense<0.000000e+00> : vector<256xf32>
    %29 = vector.multi_reduction <add>, %28, %cst_12 [1] : vector<256x256xf32> to vector<256xf32>
    %30 = vector.shape_cast %29 : vector<256xf32> to vector<256x1xf32>
    %cst_13 = arith.constant 1.000000e+00 : f32
    %31 = vector.broadcast %cst_13 : f32 to vector<256x1xf32>
    %32 = arith.minimumf %27, %31 : vector<256x1xf32>
    %33 = arith.mulf %27, %30 : vector<256x1xf32>
    %34 = arith.mulf %7, %32 : vector<256x1xf32>
    %35 = arith.subf %33, %34 : vector<256x1xf32>
    %36 = vector.shape_cast %35 : vector<256x1xf32> to vector<1x256x1xf32>
    %cst_14 = arith.constant dense<0.000000e+00> : vector<1xf32>
    %37 = vector.multi_reduction <add>, %36, %cst_14 [1, 2] : vector<1x256x1xf32> to vector<1xf32>
    %38 = vector.shape_cast %37 : vector<1xf32> to vector<1x1x1xf32>
    %39 = vector.extract %38[0, 0, 0] : f32 from vector<1x1x1xf32>
    %40 = vector.broadcast %27 : vector<256x1xf32> to vector<256x256xf32>
    %41 = arith.mulf %21, %40 : vector<256x256xf32>
    %42 = math.exp %41 : vector<256x256xf32>
    %43 = vector.broadcast %11 : vector<1x256xf32> to vector<256x256xf32>
    %44 = arith.mulf %42, %43 : vector<256x256xf32>
    %cst_15 = arith.constant dense<0.000000e+00> : vector<256xf32>
    %45 = vector.multi_reduction <add>, %44, %cst_15 [1] : vector<256x256xf32> to vector<256xf32>
    %46 = vector.shape_cast %45 : vector<256xf32> to vector<256x1xf32>
    %47 = math.exp %32 : vector<256x1xf32>
    %48 = arith.subf %46, %47 : vector<256x1xf32>
    %cst_16 = arith.constant 0.000000e+00 : f32
    %49 = vector.broadcast %cst_16 : f32 to vector<256x1xf32>
    %50 = arith.cmpf ogt, %7, %49 : vector<256x1xf32>
    %cst_17 = arith.constant 1.000000e+00 : f32
    %51 = vector.broadcast %cst_17 : f32 to vector<256x1xf32>
    %52 = arith.select %50, %48, %51 : vector<256x1xi1>, vector<256x1xf32>
    %53 = math.log %52 : vector<256x1xf32>
    %54 = arith.mulf %53, %7 : vector<256x1xf32>
    %55 = vector.shape_cast %54 : vector<256x1xf32> to vector<1x256x1xf32>
    %cst_18 = arith.constant dense<0.000000e+00> : vector<1xf32>
    %56 = vector.multi_reduction <add>, %55, %cst_18 [1, 2] : vector<1x256x1xf32> to vector<1xf32>
    %57 = vector.shape_cast %56 : vector<1xf32> to vector<1x1x1xf32>
    %58 = vector.extract %57[0, 0, 0] : f32 from vector<1x1x1xf32>
    %59 = tpu.iota {dimensions = array<i32: 0>} : vector<8x128xi32>
    %60 = tpu.iota {dimensions = array<i32: 1>} : vector<8x128xi32>
    %c0_i32 = arith.constant 0 : i32
    %61 = vector.broadcast %c0_i32 : i32 to vector<8x128xi32>
    %62 = arith.cmpi eq, %59, %61 : vector<8x128xi32>
    %c0_i32_19 = arith.constant 0 : i32
    %63 = vector.broadcast %c0_i32_19 : i32 to vector<8x128xi32>
    %64 = arith.cmpi eq, %60, %63 : vector<8x128xi32>
    %65 = arith.andi %62, %64 : vector<8x128xi1>
    %cst_20 = arith.constant 0.000000e+00 : f32
    %66 = vector.broadcast %39 : f32 to vector<8x128xf32>
    %67 = vector.broadcast %cst_20 : f32 to vector<8x128xf32>
    %68 = arith.select %65, %66, %67 : vector<8x128xi1>, vector<8x128xf32>
    %c0_i32_21 = arith.constant 0 : i32
    %69 = vector.broadcast %c0_i32_21 : i32 to vector<8x128xi32>
    %70 = arith.cmpi eq, %59, %69 : vector<8x128xi32>
    %c1_i32 = arith.constant 1 : i32
    %71 = vector.broadcast %c1_i32 : i32 to vector<8x128xi32>
    %72 = arith.cmpi eq, %60, %71 : vector<8x128xi32>
    %73 = arith.andi %70, %72 : vector<8x128xi1>
    %cst_22 = arith.constant 0.000000e+00 : f32
    %74 = vector.broadcast %58 : f32 to vector<8x128xf32>
    %75 = vector.broadcast %cst_22 : f32 to vector<8x128xf32>
    %76 = arith.select %73, %74, %75 : vector<8x128xi1>, vector<8x128xf32>
    %77 = arith.addf %68, %76 : vector<8x128xf32>
    %c0_23 = arith.constant 0 : index
    %c0_24 = arith.constant 0 : index
    %78 = vector.load %arg5[%c0_23, %c0_24] : memref<8x128xf32, #tpu.memory_space<vmem>>, vector<8x128xf32>
    tpu.vector_store %arg5[%c0_23, %c0_24], %77 {strides = array<i32>} : memref<8x128xf32, #tpu.memory_space<vmem>>, vector<8x128xf32>,
    return
  }
  func.func @transform_0(%arg0: i32) -> (i32, i32) {
    %c0_i32 = arith.constant 0 : i32
    %c0_i32_0 = arith.constant 0 : i32
    return %arg0, %c0_i32 : i32, i32
  }
  func.func @transform_1(%arg0: i32) -> (i32, i32) {
    %c0_i32 = arith.constant 0 : i32
    %c0_i32_0 = arith.constant 0 : i32
    %c0_i32_1 = arith.constant 0 : i32
    return %c0_i32, %c0_i32_0 : i32, i32
  }
  func.func @transform_2(%arg0: i32) -> (i32, i32) {
    %c0_i32 = arith.constant 0 : i32
    %c0_i32_0 = arith.constant 0 : i32
    return %arg0, %c0_i32 : i32, i32
  }
  func.func @transform_3(%arg0: i32) -> (i32, i32) {
    %c0_i32 = arith.constant 0 : i32
    %c0_i32_0 = arith.constant 0 : i32
    %c0_i32_1 = arith.constant 0 : i32
    return %c0_i32, %c0_i32_0 : i32, i32
  }
  func.func @transform_4(%arg0: i32) -> (i32, i32) {
    %c0_i32 = arith.constant 0 : i32
    %c0_i32_0 = arith.constant 0 : i32
    return %arg0, %c0_i32 : i32, i32
  }
}

</mosaic_0001>

<bundles_post_ra>
// kernel: _supcon_from_padded.1
= control target key start
LH: loop header
LB: loop body
LE: loop exit
PB: predicated region body
PF: predicated region fallthrough
CT: control target
= control target key end

     0   :  { %v3280_v0 = vmov 0   ;;  %s6443_s2 = inlined_call_operand.vmem [shape: f32[256,1], index: 2, kind: input, shape index: {}]   ;;  %s6444_s1 = inlined_call_operand.vmem [shape: bf16[128,256], index: 1, kind: input, shape index: {}]   ;;  %s6445_s0 = inlined_call_operand.vmem [shape: bf16[256,128], index: 0, kind: input, shape index: {}]   ;;  %s6446_s3 = inlined_call_operand.vmem [shape: f32[1,256], index: 3, kind: input, shape index: {}]   ;;  %s6447_s4 = inlined_call_operand.vmem [shape: f32[8,128], index: 4, kind: output, shape index: {}]  }
   0x1   :  { %2958 = vset.pattern.permute.xlu2 %v3280_v0  ;;  %2957 = vset.pattern.permute.xlu1 %v3280_v0  ;;  %v3312_v1 = vld [vmem:[%s6443_s2 + $0x20] sm:$0xff]  ;;  %v3317_v2 = vld [vmem:[%s6443_s2 + $0x10] sm:$0xff]  ;;  %v2933_v5 = vld [vmem:[%s6444_s1 + $0x74] sm:$0xf0] }
   0x2   :  { %6722 = vst [vmem:[#allocation2_spill] sm:$0xff] %v3312_v1  ;;  %v3322_v3 = vld [vmem:[%s6443_s2] sm:$0xff]  ;;  %2956 = vset.pattern.permute.xlu0 %v3280_v0  ;;  %219 = vperm.xlu2 %2958, %v3312_v1   ;;  %v2896_v4 = vld [vmem:[%s6444_s1 + $0x70] sm:$0xf]  ;;  %v2932_v7 = vld [vmem:[%s6444_s1 + $0x74] sm:$0xf] }
   0x3   :  { %6723 = vst [vmem:[#allocation3_spill] sm:$0xff] %v3317_v2  ;;  %209 = vperm.xlu1 %2957, %v3317_v2   ;;  %199 = vperm.xlu0 %2956, %v3322_v3   ;;  %v2897_v6 = vor.u32 %v2933_v5, %v2896_v4  ;;  %v2898_v8 = vld [vmem:[%s6444_s1 + $0x78] sm:$0xf0]  ;;  %v2888_v9 = vld [vmem:[%s6444_s1 + $0x60] sm:$0xf]  ;;  %v3367_v20 = vld [vmem:[%s6443_s2 + $0x28] sm:$0xff] }
   0x4   :  { %6724 = vst [vmem:[#allocation4_spill] sm:$0xff] %v3322_v3  ;;  %v2901_v10 = vor.u32 %v2932_v7, %v2898_v8  ;;  %v2931_v11 = vld [vmem:[%s6444_s1 + $0x64] sm:$0xf0]  ;;  %v2930_v12 = vld [vmem:[%s6444_s1 + $0x64] sm:$0xf]  ;;  %v3372_v21 = vld [vmem:[%s6443_s2 + $0x18] sm:$0xff] }
   0x5   :  { %v2890_v13 = vld [vmem:[%s6444_s1 + $0x68] sm:$0xf0]  ;;  %922 = vmatpush.bf16.msra.mxu0 %v2897_v6  ;;  %2934 = vmatpush.bf16.msra.mxu2 %v2897_v6  ;;  %v2889_v14 = vor.u32 %v2931_v11, %v2888_v9  ;;  %v2880_v16 = vld [vmem:[%s6444_s1 + $0x50] sm:$0xf]  ;;  %v2929_v17 = vld [vmem:[%s6444_s1 + $0x54] sm:$0xf0] }
   0x6   :  { %1011 = vmatpush.bf16.msra.mxu1 %v2901_v10  ;;  %2942 = vmatpush.bf16.msra.mxu3 %v2901_v10  ;;  %v2893_v15 = vor.u32 %v2930_v12, %v2890_v13  ;;  %v2928_v18 = vld [vmem:[%s6444_s1 + $0x54] sm:$0xf]  ;;  %v2882_v19 = vld [vmem:[%s6444_s1 + $0x58] sm:$0xf0]  ;;  %6725 = vst [vmem:[#allocation5_spill] sm:$0xff] %v3367_v20  ;;  %v3377_v22 = vld [vmem:[%s6443_s2 + $0x8] sm:$0xff]  ;;  %v2881_v23 = vor.u32 %v2929_v17, %v2880_v16 }
   0x7   :  { %6726 = vst [vmem:[#allocation6_spill] sm:$0xff] %v3372_v21  ;;  %v2885_v24 = vor.u32 %v2928_v18, %v2882_v19  ;;  %v2872_v25 = vld [vmem:[%s6444_s1 + $0x40] sm:$0xf]  ;;  %v2927_v26 = vld [vmem:[%s6444_s1 + $0x44] sm:$0xf0]  ;;  %v3414_v36 = vld [vmem:[%s6443_s2 + $0x38] sm:$0xff] }
   0x8   :  { %6727 = vst [vmem:[#allocation7_spill] sm:$0xff] %v3377_v22  ;;  %v2926_v27 = vld [vmem:[%s6444_s1 + $0x44] sm:$0xf]  ;;  %v2874_v28 = vld [vmem:[%s6444_s1 + $0x48] sm:$0xf0]  ;;  %v2873_v29 = vor.u32 %v2927_v26, %v2872_v25  ;;  %v3419_v37 = vld [vmem:[%s6443_s2 + $0x30] sm:$0xff] }
   0x9   :  { %923 = vmatpush.bf16.msra.mxu0 %v2889_v14  ;;  %2935 = vmatpush.bf16.msra.mxu2 %v2889_v14  ;;  %v2877_v30 = vor.u32 %v2926_v27, %v2874_v28  ;;  %v2864_v31 = vld [vmem:[%s6444_s1 + $0x30] sm:$0xf]  ;;  %v2925_v32 = vld [vmem:[%s6444_s1 + $0x34] sm:$0xf0]  ;;  %v2924_v33 = vld [vmem:[%s6444_s1 + $0x34] sm:$0xf] }
   0xa   :  { %1012 = vmatpush.bf16.msra.mxu1 %v2893_v15  ;;  %2943 = vmatpush.bf16.msra.mxu3 %v2893_v15  ;;  %v2866_v34 = vld [vmem:[%s6444_s1 + $0x38] sm:$0xf0]  ;;  %v3409_v35 = vld [vmem:[%s6443_s2 + $0x40] sm:$0xff]  ;;  %6729 = vst [vmem:[#allocation9_spill] sm:$0xff] %v3414_v36  ;;  %v2865_v38 = vor.u32 %v2925_v32, %v2864_v31  ;;  %v2923_v41 = vld [vmem:[%s6444_s1 + $0x24] sm:$0xf0] }
   0xb   :  { %224 = vperm.xlu2 %2958, %v3367_v20   ;;  %214 = vperm.xlu1 %2957, %v3372_v21   ;;  %6728 = vst [vmem:[#allocation8_spill] sm:$0xff] %v3409_v35  ;;  %v2869_v39 = vor.u32 %v2924_v33, %v2866_v34  ;;  %v2856_v40 = vld [vmem:[%s6444_s1 + $0x20] sm:$0xf]  ;;  %v2922_v42 = vld [vmem:[%s6444_s1 + $0x24] sm:$0xf]  ;;  %v3451_v50 = vld [vmem:[%s6443_s2 + $0x58] sm:$0xff] }
   0xc   :  { %204 = vperm.xlu0 %2956, %v3377_v22   ;;  %6730 = vst [vmem:[#allocation10_spill] sm:$0xff] %v3419_v37  ;;  %v2858_v43 = vld [vmem:[%s6444_s1 + $0x28] sm:$0xf0]  ;;  %v2857_v44 = vor.u32 %v2923_v41, %v2856_v40  ;;  %v2848_v46 = vld [vmem:[%s6444_s1 + $0x10] sm:$0xf]  ;;  %v2902_v63 = vld [vmem:[%s6445_s0] sm:$0xff] }
   0xd   :  { %924 = vmatpush.bf16.msra.mxu0 %v2881_v23  ;;  %2936 = vmatpush.bf16.msra.mxu2 %v2881_v23  ;;  %v2861_v45 = vor.u32 %v2922_v42, %v2858_v43  ;;  %v2921_v47 = vld [vmem:[%s6444_s1 + $0x14] sm:$0xf0]  ;;  %v2920_v48 = vld [vmem:[%s6444_s1 + $0x14] sm:$0xf]  ;;  %v2850_v49 = vld [vmem:[%s6444_s1 + $0x18] sm:$0xf0] }
   0xe   :  { %1013 = vmatpush.bf16.msra.mxu1 %v2885_v24  ;;  %2944 = vmatpush.bf16.msra.mxu3 %v2885_v24  ;;  %6731 = vst [vmem:[#allocation11_spill] sm:$0xff] %v3451_v50  ;;  %v3456_v51 = vld [vmem:[%s6443_s2 + $0x50] sm:$0xff]  ;;  %v3461_v52 = vld [vmem:[%s6443_s2 + $0x48] sm:$0xff]  ;;  %v2849_v53 = vor.u32 %v2921_v47, %v2848_v46  ;;  %v2853_v54 = vor.u32 %v2920_v48, %v2850_v49  ;;  %v2840_v55 = vld [vmem:[%s6444_s1] sm:$0xf]  ;;  %vm6576_vm0 = vcmp.ge.f32.partialorder %v3322_v3, 0.0 }
   0xf   :  { %6732 = vst [vmem:[#allocation12_spill] sm:$0xff] %v3456_v51  ;;  %v2919_v56 = vld [vmem:[%s6444_s1 + $0x4] sm:$0xf0]  ;;  %v2918_v57 = vld [vmem:[%s6444_s1 + $0x4] sm:$0xf]  ;;  %v3481_v61 = vld [vmem:[%s6443_s2 + $0x70] sm:$0xff] }
  0x10   :  { %6733 = vst [vmem:[#allocation13_spill] sm:$0xff] %v3461_v52  ;;  %v2842_v58 = vld [vmem:[%s6444_s1 + $0x8] sm:$0xf0]  ;;  %v2841_v59 = vor.u32 %v2919_v56, %v2840_v55  ;;  %v3494_v4 = vld [vmem:[%s6443_s2 + $0x60] sm:$0xff]  ;;  %v3515_v8 = vld [vmem:[%s6443_s2 + $0x78] sm:$0xff]  ;;  %vm6578_vm1 = vcmp.ge.f32.partialorder %v3317_v2, 0.0 }
  0x11   :  { %925 = vmatpush.bf16.msra.mxu0 %v2873_v29  ;;  %2937 = vmatpush.bf16.msra.mxu2 %v2873_v29  ;;  %v2845_v60 = vor.u32 %v2918_v57, %v2842_v58  ;;  %6734 = vst [vmem:[#allocation14_spill] sm:$0xff] %v3481_v61  ;;  %v3486_v62 = vld [vmem:[%s6443_s2 + $0x68] sm:$0xff]  ;;  %v2910_v5 = vld [vmem:[%s6445_s0 + $0x40] sm:$0xff]  ;;  %v3528_v10 = vld [vmem:[%s6443_s2 + $0x98] sm:$0xff]  ;;  %v130_v29 = vsel %vm6576_vm0, 1, %v3280_v0  ;;  %vm6573_vm2 = vcmp.ge.f32.partialorder %v3372_v21, 0.0 }
  0x12   :  { %1014 = vmatpush.bf16.msra.mxu1 %v2877_v30  ;;  %2945 = vmatpush.bf16.msra.mxu3 %v2877_v30  ;;  %6735 = vst [vmem:[#allocation15_spill] sm:$0xff] %v3486_v62  ;;  %v3505_v6 = vld [vmem:[%s6443_s2 + $0x88] sm:$0xff]  ;;  %v3510_v7 = vld [vmem:[%s6443_s2 + $0x80] sm:$0xff]  ;;  %v3536_v12 = vld [vmem:[%s6443_s2 + $0x90] sm:$0xff]  ;;  %vm6574_vm3 = vcmp.ge.f32.partialorder %v3377_v22, 0.0  ;;  %v132_v33 = vsel %vm6578_vm1, 1, %v3280_v0 }
  0x13   :  { %239 = vperm.xlu2 %2958, %v3409_v35   ;;  %234 = vperm.xlu1 %2957, %v3414_v36   ;;  %6736 = vst [vmem:[#allocation16_spill] sm:$0xff] %v3494_v4  ;;  %v3523_v9 = vld [vmem:[%s6443_s2 + $0xa0] sm:$0xff]  ;;  %v2903_v11 = vld [vmem:[%s6445_s0 + $0x8] sm:$0xff]  ;;  %v3547_v14 = vld [vmem:[%s6443_s2 + $0xb8] sm:$0xff]  ;;  %v133_v34 = vsel %vm6573_vm2, 1, %v3280_v0  ;;  %vm6567_vm4 = vcmp.ge.f32.partialorder %v3367_v20, 0.0 }
  0x14   :  { %229 = vperm.xlu0 %2956, %v3419_v37   ;;  %6737 = vst [vmem:[#allocation17_spill] sm:$0xff] %v3505_v6  ;;  %v2911_v13 = vld [vmem:[%s6445_s0 + $0x48] sm:$0xff]  ;;  %v3552_v15 = vld [vmem:[%s6443_s2 + $0xb0] sm:$0xff]  ;;  %v3578_v23 = vld [vmem:[%s6443_s2 + $0xc0] sm:$0xff]  ;;  %vm6566_vm5 = vcmp.ge.f32.partialorder %v3419_v37, 0.0  ;;  %vm6579_vm6 = vcmp.ge.f32.partialorder %v3312_v1, 0.0 }
  0x15   :  { %926 = vmatpush.bf16.msra.mxu0 %v2865_v38  ;;  %2938 = vmatpush.bf16.msra.mxu2 %v2865_v38  ;;  %6738 = vst [vmem:[#allocation18_spill] sm:$0xff] %v3510_v7  ;;  %v3557_v16 = vld [vmem:[%s6443_s2 + $0xa8] sm:$0xff]  ;;  %v3565_v17 = vld [vmem:[%s6443_s2 + $0xd0] sm:$0xff]  ;;  %v3594_v26 = vld [vmem:[%s6443_s2 + $0xe0] sm:$0xff]  ;;  %v131_v38 = vsel %vm6574_vm3, 1, %v3280_v0  ;;  %v135_v40 = vsel %vm6567_vm4, 1, %v3280_v0 }
  0x16   :  { %1015 = vmatpush.bf16.msra.mxu1 %v2869_v39  ;;  %2946 = vmatpush.bf16.msra.mxu3 %v2869_v39  ;;  %6739 = vst [vmem:[#allocation19_spill] sm:$0xff] %v3515_v8  ;;  %v3570_v18 = vld [vmem:[%s6443_s2 + $0xc8] sm:$0xff]  ;;  %v2904_v19 = vld [vmem:[%s6445_s0 + $0x10] sm:$0xff]  ;;  %v3599_v27 = vld [vmem:[%s6443_s2 + $0xd8] sm:$0xff]  ;;  %v136_v41 = vsel %vm6566_vm5, 1, %v3280_v0  ;;  %v134_v43 = vsel %vm6579_vm6, 1, %v3280_v0 }
  0x17   :  { %6740 = vst [vmem:[#allocation20_spill] sm:$0xff] %v3523_v9  ;;  %v2912_v24 = vld [vmem:[%s6445_s0 + $0x50] sm:$0xff]  ;;  %v3589_v25 = vld [vmem:[%s6443_s2 + $0xe8] sm:$0xff]  ;;  %v3608_v28 = vld [vmem:[%s6443_s2 + $0xf8] sm:$0xff]  ;;  %vm6552_vm7 = vcmp.ge.f32.partialorder %v3409_v35, 0.0  ;;  %vm6538_vm8 = vcmp.ge.f32.partialorder %v3461_v52, 0.0 }
  0x18   :  { %6741 = vst [vmem:[#allocation21_spill] sm:$0xff] %v3528_v10  ;;  %v2905_v30 = vld [vmem:[%s6445_s0 + $0x18] sm:$0xff]  ;;  %v3619_v31 = vld [vmem:[%s6443_s2 + $0xf0] sm:$0xff]  ;;  %v2906_v42 = vld [vmem:[%s6445_s0 + $0x20] sm:$0xff]  ;;  %vm6551_vm9 = vcmp.ge.f32.partialorder %v3414_v36, 0.0  ;;  %v138_v46 = vsel %vm6552_vm7, 1, %v3280_v0 }
  0x19   :  { %927 = vmatpush.bf16.msra.mxu0 %v2857_v44  ;;  %2939 = vmatpush.bf16.msra.mxu2 %v2857_v44  ;;  %6742 = vst [vmem:[#allocation22_spill] sm:$0xff] %v3536_v12  ;;  %v2913_v32 = vld [vmem:[%s6445_s0 + $0x58] sm:$0xff]  ;;  %v2914_v44 = vld [vmem:[%s6445_s0 + $0x60] sm:$0xff]  ;;  %v139_v47 = vsel %vm6538_vm8, 1, %v3280_v0  ;;  %v137_v48 = vsel %vm6551_vm9, 1, %v3280_v0  ;;  %vm6537_vm10 = vcmp.ge.f32.partialorder %v3451_v50, 0.0 }
  0x1a   :  { %1016 = vmatpush.bf16.msra.mxu1 %v2861_v45  ;;  %2947 = vmatpush.bf16.msra.mxu3 %v2861_v45  ;;  %6743 = vst [vmem:[#allocation23_spill] sm:$0xff] %v3547_v14  ;;  %vm6448_vm11 = vcmp.ge.f32.partialorder %v3494_v4, 0.0  ;;  %vm6449_vm12 = vcmp.ge.f32.partialorder %v3456_v51, 0.0  ;;  %v2907_v55 = vld [vmem:[%s6445_s0 + $0x28] sm:$0xff]  ;;  %vm6450_vm13 = vcmp.ge.f32.partialorder %v3481_v61, 0.0  ;;  %vm6454_vm14 = vcmp.ge.f32.partialorder %v3515_v8, 0.0 }
  0x1b   :  { %254 = vperm.xlu2 %2958, %v3451_v50   ;;  %249 = vperm.xlu1 %2957, %v3456_v51   ;;  %6744 = vst [vmem:[#allocation24_spill] sm:$0xff] %v3552_v15  ;;  %v140_v56 = vsel %vm6449_vm12, 1, %v3280_v0  ;;  %v2915_v57 = vld [vmem:[%s6445_s0 + $0x68] sm:$0xff]  ;;  %vm6455_vm15 = vcmp.ge.f32.partialorder %v3486_v62, 0.0  ;;  %vm6452_vm12 = vcmp.ge.f32.partialorder %v3536_v12, 0.0 }
  0x1c   :  { %244 = vperm.xlu0 %2956, %v3461_v52   ;;  %6745 = vst [vmem:[#allocation25_spill] sm:$0xff] %v3557_v16 }
  0x1d   :  { %928 = vmatpush.bf16.msra.mxu0 %v2849_v53  ;;  %2940 = vmatpush.bf16.msra.mxu2 %v2849_v53  ;;  %6746 = vst [vmem:[#allocation26_spill] sm:$0xff] %v3565_v17  ;;  %v141_v53 = vsel %vm6537_vm10, 1, %v3280_v0 }
  0x1e   :  { %1017 = vmatpush.bf16.msra.mxu1 %v2853_v54  ;;  %2948 = vmatpush.bf16.msra.mxu3 %v2853_v54  ;;  %6747 = vst [vmem:[#allocation27_spill] sm:$0xff] %v3570_v18  ;;  %v142_v54 = vsel %vm6448_vm11, 1, %v3280_v0  ;;  %vm6451_vm11 = vcmp.ge.f32.partialorder %v3505_v6, 0.0 }
  0x1f   :  { %6748 = vst [vmem:[#allocation28_spill] sm:$0xff] %v3578_v23 }
  0x20   :  { %6749 = vst [vmem:[#allocation29_spill] sm:$0xff] %v3589_v25 }
  0x21   :  { %929 = vmatpush.bf16.msra.mxu0 %v2841_v59  ;;  %2941 = vmatpush.bf16.msra.mxu2 %v2841_v59  ;;  %6750 = vst [vmem:[#allocation30_spill] sm:$0xff] %v3594_v26 }
  0x22   :  { %1018 = vmatpush.bf16.msra.mxu1 %v2845_v60  ;;  %2949 = vmatpush.bf16.msra.mxu3 %v2845_v60  ;;  %6751 = vst [vmem:[#allocation31_spill] sm:$0xff] %v3599_v27 }
  0x23   :  { %269 = vperm.xlu2 %2958, %v3481_v61   ;;  %264 = vperm.xlu1 %2957, %v3486_v62   ;;  %6752 = vst [vmem:[#allocation32_spill] sm:$0xff] %v3608_v28 }
  0x24   :  { %259 = vperm.xlu0 %2956, %v3494_v4   ;;  %930 = vmatmul.bf16.vlgmr.msra.gmra.mxu0 %v2902_v63  ;;  %6753 = vst [vmem:[#allocation33_spill] sm:$0xff] %v3619_v31 }
  0x25   :  { %970 = vmatmul.bf16.vlgmr.msra.gmra.mxu2 %v2910_v5  ;;  %1019 = vmatmul.bf16.vlgmr.msra.gmra.mxu1 %v2902_v63  ;;  %v144_v63 = vsel %vm6450_vm13, 1, %v3280_v0  ;;  %vm6453_vm13 = vcmp.ge.f32.partialorder %v3510_v7, 0.0 }
  0x26   :  { %1059 = vmatmul.bf16.vlgmr.msra.gmra.mxu3 %v2910_v5  ;;  %v145_v5 = vsel %vm6454_vm14, 1, %v3280_v0  ;;  %vm6458_vm14 = vcmp.ge.f32.partialorder %v3547_v14, 0.0 }
  0x2b   :  { %284 = vperm.xlu2 %2958, %v3505_v6   ;;  %279 = vperm.xlu1 %2957, %v3510_v7  }
  0x2c   :  { %274 = vperm.xlu0 %2956, %v3515_v8  }
  0x33   :  { %299 = vperm.xlu2 %2958, %v3523_v9   ;;  %294 = vperm.xlu1 %2957, %v3528_v10  }
  0x34   :  { %289 = vperm.xlu0 %2956, %v3536_v12   ;;  %935 = vmatmul.bf16.gmra.mxu0 %v2903_v11 }
  0x35   :  { %975 = vmatmul.bf16.gmra.mxu2 %v2911_v13  ;;  %1024 = vmatmul.bf16.gmra.mxu1 %v2903_v11  ;;  %v143_v11 = vsel %vm6455_vm15, 1, %v3280_v0  ;;  %vm6457_vm15 = vcmp.ge.f32.partialorder %v3578_v23, 0.0 }
  0x36   :  { %1064 = vmatmul.bf16.gmra.mxu3 %v2911_v13 }
  0x3b   :  { %314 = vperm.xlu2 %2958, %v3547_v14   ;;  %309 = vperm.xlu1 %2957, %v3552_v15  }
  0x3c   :  { %304 = vperm.xlu0 %2956, %v3557_v16  }
  0x43   :  { %329 = vperm.xlu2 %2958, %v3565_v17   ;;  %324 = vperm.xlu1 %2957, %v3570_v18  }
  0x44   :  { %319 = vperm.xlu0 %2956, %v3578_v23   ;;  %940 = vmatmul.bf16.gmra.mxu0 %v2904_v19 }
  0x45   :  { %980 = vmatmul.bf16.gmra.mxu2 %v2912_v24  ;;  %1029 = vmatmul.bf16.gmra.mxu1 %v2904_v19 }
  0x46   :  { %1069 = vmatmul.bf16.gmra.mxu3 %v2912_v24 }
  0x4b   :  { %344 = vperm.xlu2 %2958, %v3589_v25   ;;  %339 = vperm.xlu1 %2957, %v3594_v26  }
  0x4c   :  { %334 = vperm.xlu0 %2956, %v3599_v27  }
  0x53   :  { %354 = vperm.xlu1 %2957, %v3608_v28   ;;  %427 = vperm.xlu2 %2958, %v130_v29   ;;  %v147_v29 = vsel %vm6451_vm11, 1, %v3280_v0  ;;  %vm6456_vm11 = vcmp.ge.f32.partialorder %v3523_v9, 0.0 }
  0x54   :  { %349 = vperm.xlu0 %2956, %v3619_v31   ;;  %945 = vmatmul.bf16.gmra.mxu0 %v2905_v30 }
  0x55   :  { %985 = vmatmul.bf16.gmra.mxu2 %v2913_v32  ;;  %1034 = vmatmul.bf16.gmra.mxu1 %v2905_v30  ;;  %v148_v30 = vsel %vm6452_vm12, 1, %v3280_v0  ;;  %vm6461_vm12 = vcmp.ge.f32.partialorder %v3557_v16, 0.0 }
  0x56   :  { %1074 = vmatmul.bf16.gmra.mxu3 %v2913_v32  ;;  %v2908_v32 = vld [vmem:[%s6445_s0 + $0x30] sm:$0xff] }
  0x5b   :  { %433 = vperm.xlu1 %2957, %v132_v33   ;;  %436 = vperm.xlu2 %2958, %v133_v34   ;;  %v146_v33 = vsel %vm6453_vm13, 1, %v3280_v0  ;;  %v2916_v34 = vld [vmem:[%s6445_s0 + $0x70] sm:$0xff]  ;;  %vm6460_vm13 = vcmp.ge.f32.partialorder %v3528_v10, 0.0 }
  0x5c   :  { %v3638_v39 = vpop.permute.xlu2 %219  ;;  %430 = vperm.xlu0 %2956, %v131_v38  }
  0x5d   :  { %6754 = vst [vmem:[#allocation34_spill] sm:$0xff] %v3638_v39 }
  0x63   :  { %442 = vperm.xlu1 %2957, %v135_v40   ;;  %445 = vperm.xlu2 %2958, %v136_v41  }
  0x64   :  { %439 = vperm.xlu0 %2956, %v134_v43   ;;  %950 = vmatmul.bf16.gmra.mxu0 %v2906_v42  ;;  %v151_v43 = vsel %vm6461_vm12, 1, %v3280_v0  ;;  %vm6518_vm12 = vcmp.ge.f32.partialorder %v3619_v31, 0.0 }
  0x65   :  { %990 = vmatmul.bf16.gmra.mxu2 %v2914_v44  ;;  %1039 = vmatmul.bf16.gmra.mxu1 %v2906_v42  ;;  %v3658_v45 = vpop.permute.xlu2 %224  ;;  %v150_v42 = vsel %vm6456_vm11, 1, %v3280_v0  ;;  %vm6459_vm11 = vcmp.ge.f32.partialorder %v3552_v15, 0.0 }
  0x66   :  { %6755 = vst [vmem:[#allocation35_spill] sm:$0xff] %v3658_v45  ;;  %1079 = vmatmul.bf16.gmra.mxu3 %v2914_v44  ;;  %v149_v44 = vsel %vm6460_vm13, 1, %v3280_v0  ;;  %vm6463_vm13 = vcmp.ge.f32.partialorder %v3589_v25, 0.0 }
  0x6b   :  { %451 = vperm.xlu1 %2957, %v138_v46   ;;  %454 = vperm.xlu2 %2958, %v139_v47  }
  0x6c   :  { %448 = vperm.xlu0 %2956, %v137_v48  }
  0x6d   :  { %v3672_v49 = vpop.permute.xlu2 %239 }
  0x6e   :  { %6756 = vst [vmem:[#allocation36_spill] sm:$0xff] %v3672_v49 }
  0x73   :  { %460 = vperm.xlu1 %2957, %v141_v53   ;;  %463 = vperm.xlu2 %2958, %v142_v54   ;;  %v153_v53 = vsel %vm6458_vm14, 1, %v3280_v0  ;;  %v154_v54 = vsel %vm6457_vm15, 1, %v3280_v0  ;;  %vm6462_vm15 = vcmp.ge.f32.partialorder %v3565_v17, 0.0  ;;  %vm6522_vm14 = vcmp.ge.f32.partialorder %v3599_v27, 0.0 }
  0x74   :  { %457 = vperm.xlu0 %2956, %v140_v56   ;;  %955 = vmatmul.bf16.gmra.mxu0 %v2907_v55  ;;  %v152_v56 = vsel %vm6459_vm11, 1, %v3280_v0  ;;  %vm6525_vm11 = vcmp.ge.f32.partialorder %v3570_v18, 0.0 }
  0x75   :  { %v3692_v58 = vpop.permute.xlu1 %209  ;;  %v3694_v59 = vpop.permute.xlu0 %199  ;;  %995 = vmatmul.bf16.gmra.mxu2 %v2915_v57  ;;  %1044 = vmatmul.bf16.gmra.mxu1 %v2907_v55  ;;  %v2909_v55 = vld [vmem:[%s6445_s0 + $0x38] sm:$0xff] }
  0x76   :  { %v3696_v60 = vpop.permute.xlu2 %254  ;;  %1084 = vmatmul.bf16.gmra.mxu3 %v2915_v57  ;;  %v2917_v57 = vld [vmem:[%s6445_s0 + $0x78] sm:$0xff] }
  0x77   :  { %6757 = vst [vmem:[#allocation37_spill] sm:$0xff] %v3696_v60 }
  0x7b   :  { %469 = vperm.xlu1 %2957, %v144_v63   ;;  %472 = vperm.xlu2 %2958, %v145_v5  }
  0x7c   :  { %466 = vperm.xlu0 %2956, %v143_v11  }
  0x7d   :  { %v3712_v19 = vpop.permute.xlu1 %214 }
  0x7e   :  { %v3710_v13 = vpop.permute.xlu2 %269  ;;  %v3716_v24 = vpop.permute.xlu0 %204 }
  0x7f   :  { %6758 = vst [vmem:[#allocation38_spill] sm:$0xff] %v3710_v13 }
  0x83   :  { %478 = vperm.xlu1 %2957, %v147_v29   ;;  %481 = vperm.xlu2 %2958, %v148_v30   ;;  %v156_v29 = vsel %vm6462_vm15, 1, %v3280_v0  ;;  %v157_v30 = vsel %vm6522_vm14, 1, %v3280_v0  ;;  %vm6521_vm15 = vcmp.ge.f32.partialorder %v3594_v26, 0.0 }
  0x84   :  { %475 = vperm.xlu0 %2956, %v146_v33   ;;  %960 = vmatmul.bf16.gmra.mxu0 %v2908_v32 }
  0x85   :  { %1000 = vmatmul.bf16.gmra.mxu2 %v2916_v34  ;;  %1049 = vmatmul.bf16.gmra.mxu1 %v2908_v32  ;;  %v3736_v40 = vpop.permute.xlu1 %234  ;;  %v155_v32 = vsel %vm6525_vm11, 1, %v3280_v0 }
  0x86   :  { %v3734_v38 = vpop.permute.xlu2 %284  ;;  %6759 = vst [vmem:[#allocation39_spill] sm:$0xff] %v3736_v40  ;;  %1089 = vmatmul.bf16.gmra.mxu3 %v2916_v34  ;;  %v3740_v41 = vpop.permute.xlu0 %229 }
  0x8b   :  { %487 = vperm.xlu1 %2957, %v150_v42   ;;  %490 = vperm.xlu2 %2958, %v151_v43   ;;  %v159_v43 = vsel %vm6463_vm13, 1, %v3280_v0  ;;  %vm6517_vm13 = vcmp.ge.f32.partialorder %v3608_v28, 0.0 }
  0x8c   :  { %484 = vperm.xlu0 %2956, %v149_v44   ;;  %v160_v44 = vsel %vm6518_vm12, 1, %v3280_v0 }
  0x8d   :  { %v3754_v47 = vpop.permute.xlu1 %249 }
  0x8e   :  { %v3752_v46 = vpop.permute.xlu2 %299  ;;  %6760 = vst [vmem:[#allocation40_spill] sm:$0xff] %v3754_v47  ;;  %v3758_v48 = vpop.permute.xlu0 %244 }
  0x8f   :  { %6761 = vst [vmem:[#allocation41_spill] sm:$0xff] %v3758_v48 }
  0x93   :  { %496 = vperm.xlu1 %2957, %v153_v53   ;;  %499 = vperm.xlu2 %2958, %v154_v54   ;;  %v158_v54 = vsel %vm6521_vm15, 1, %v3280_v0 }
  0x94   :  { %493 = vperm.xlu0 %2956, %v152_v56   ;;  %965 = vmatmul.bf16.gmra.mxu0 %v2909_v55 }
  0x95   :  { %1005 = vmatmul.bf16.gmra.mxu2 %v2917_v57  ;;  %1054 = vmatmul.bf16.gmra.mxu1 %v2909_v55  ;;  %v3778_v5 = vpop.permute.xlu1 %264 }
  0x96   :  { %v3776_v63 = vpop.permute.xlu2 %314  ;;  %6762 = vst [vmem:[#allocation42_spill] sm:$0xff] %v3778_v5  ;;  %1094 = vmatmul.bf16.gmra.mxu3 %v2917_v57  ;;  %v3782_v11 = vpop.permute.xlu0 %259 }
  0x97   :  { %6763 = vst [vmem:[#allocation43_spill] sm:$0xff] %v3782_v11 }
  0x9b   :  { %505 = vperm.xlu1 %2957, %v156_v29   ;;  %508 = vperm.xlu2 %2958, %v157_v30  }
  0x9c   :  { %502 = vperm.xlu0 %2956, %v155_v32  }
  0x9d   :  { %v3796_v34 = vpop.permute.xlu1 %279 }
  0x9e   :  { %v3794_v33 = vpop.permute.xlu2 %329  ;;  %v3800_v42 = vpop.permute.xlu0 %274 }
  0xa1   :  { %v3809_v53 = vpop.f32.mrf.mxu0 }
  0xa2   :  { %v3814_v55 = vpop.f32.mrf.mxu1  ;;  %v1100_v60 = vmul.f32 %v3809_v53, %v3809_v53 }
  0xa3   :  { %514 = vperm.xlu1 %2957, %v159_v43   ;;  %517 = vperm.xlu2 %2958, %v160_v44   ;;  %v161_v43 = vsel %vm6517_vm13, 1, %v3280_v0  ;;  %v1101_v52 = vmul.f32 %v3814_v55, %v3814_v55 }
  0xa4   :  { %511 = vperm.xlu0 %2956, %v158_v54  }
  0xa5   :  { %v3818_v57 = vpop.permute.xlu1 %294  ;;  %v1164_v21 = vadd.f32 %v1101_v52, %v1100_v60 }
  0xa6   :  { %v3816_v56 = vpop.permute.xlu2 %344  ;;  %v3820_v29 = vpop.permute.xlu0 %289 }
  0xa8   :  { %v3823_v30 = vpop.f32.mrf.mxu2 }
  0xa9   :  { %6764 = vst [vmem:[#allocation44_spill] sm:$0xff] %v3823_v30  ;;  %v3825_v32 = vpop.f32.mrf.mxu3  ;;  %v3827_v31 = vpop.f32.mrf.mxu0 }
  0xaa   :  { %6765 = vst [vmem:[#allocation45_spill] sm:$0xff] %v3825_v32  ;;  %v3832_v44 = vpop.f32.mrf.mxu1  ;;  %v1102_v50 = vmul.f32 %v3827_v31, %v3827_v31 }
  0xab   :  { %6766 = vst [vmem:[#allocation46_spill] sm:$0xff] %v3827_v31  ;;  %v1103_v13 = vmul.f32 %v3832_v44, %v3832_v44 }
  0xac   :  { %6767 = vst [vmem:[#allocation47_spill] sm:$0xff] %v3832_v44  ;;  %520 = vperm.xlu0 %2956, %v161_v43  }
  0xad   :  { %v3834_v54 = vpop.permute.xlu1 %309 }
  0xae   :  { %v3836_v26 = vpop.permute.xlu2 %427  ;;  %v3838_v25 = vpop.permute.xlu0 %304 }
  0xb0   :  { %v3840_v27 = vpop.f32.mrf.mxu2 }
  0xb1   :  { %6768 = vst [vmem:[#allocation48_spill] sm:$0xff] %v3840_v27  ;;  %v3842_v18 = vpop.f32.mrf.mxu3  ;;  %v3844_v17 = vpop.f32.mrf.mxu0 }
  0xb2   :  { %6769 = vst [vmem:[#allocation49_spill] sm:$0xff] %v3842_v18  ;;  %v3846_v23 = vpop.f32.mrf.mxu1  ;;  %v1104_v60 = vmul.f32 %v3844_v17, %v3844_v17 }
  0xb3   :  { %6770 = vst [vmem:[#allocation50_spill] sm:$0xff] %v3844_v17 }
  0xb4   :  { %6771 = vst [vmem:[#allocation51_spill] sm:$0xff] %v3846_v23 }
  0xb5   :  { %v3848_v15 = vpop.permute.xlu1 %324 }
  0xb6   :  { %v3850_v0 = vpop.permute.xlu2 %436  ;;  %v3852_v28 = vpop.permute.xlu0 %319 }
  0xb8   :  { %v3854_v43 = vpop.f32.mrf.mxu2 }
  0xb9   :  { %6772 = vst [vmem:[#allocation52_spill] sm:$0xff] %v3854_v43  ;;  %v3856_v14 = vpop.f32.mrf.mxu3  ;;  %v3858_v9 = vpop.f32.mrf.mxu0 }
  0xba   :  { %6773 = vst [vmem:[#allocation53_spill] sm:$0xff] %v3856_v14  ;;  %v3860_v10 = vpop.f32.mrf.mxu1  ;;  %v1106_v1 = vmul.f32 %v3858_v9, %v3858_v9 }
  0xbb   :  { %6774 = vst [vmem:[#allocation54_spill] sm:$0xff] %v3858_v9  ;;  %v1107_v49 = vmul.f32 %v3860_v10, %v3860_v10 }
  0xbc   :  { %6775 = vst [vmem:[#allocation55_spill] sm:$0xff] %v3860_v10 }
  0xbd   :  { %v3862_v16 = vpop.permute.xlu1 %339  ;;  %v1173_v40 = vadd.f32 %v1107_v49, %v1106_v1 }
  0xbe   :  { %v3864_v6 = vpop.permute.xlu2 %445  ;;  %v3866_v12 = vpop.permute.xlu0 %334 }
  0xc0   :  { %v3868_v7 = vpop.f32.mrf.mxu2 }
  0xc1   :  { %6776 = vst [vmem:[#allocation56_spill] sm:$0xff] %v3868_v7  ;;  %v3870_v8 = vpop.f32.mrf.mxu3  ;;  %v3872_v62 = vpop.f32.mrf.mxu0 }
  0xc2   :  { %6777 = vst [vmem:[#allocation57_spill] sm:$0xff] %v3870_v8  ;;  %v3874_v61 = vpop.f32.mrf.mxu1  ;;  %v1108_v47 = vmul.f32 %v3872_v62, %v3872_v62 }
  0xc3   :  { %6778 = vst [vmem:[#allocation58_spill] sm:$0xff] %v3872_v62 }
  0xc4   :  { %6779 = vst [vmem:[#allocation59_spill] sm:$0xff] %v3874_v61 }
  0xc5   :  { %v3876_v4 = vpop.permute.xlu1 %354 }
  0xc6   :  { %v3878_v51 = vpop.permute.xlu2 %454  ;;  %v3880_v5 = vpop.permute.xlu0 %349 }
  0xc7   :  { %6780 = vst [vmem:[#allocation60_spill] sm:$0xff] %v3880_v5  ;;  %v1167_v5 = vadd.f32 %v1103_v13, %v1102_v50  ;;  %v1109_v50 = vmul.f32 %v3874_v61, %v3874_v61  ;;  %v97_v61 = vld [vmem:[%s6446_s3] sm:$0x3] }
  0xc8   :  { %v3890_v36 = vpop.f32.mrf.mxu2  ;;  %v3935_v49 = vperm.slane %v97_v61, 0 }
  0xc9   :  { %6781 = vst [vmem:[#allocation61_spill] sm:$0xff] %v3890_v36  ;;  %v3892_v35 = vpop.f32.mrf.mxu3  ;;  %v3894_v37 = vpop.f32.mrf.mxu0  ;;  %v1176_v11 = vadd.f32 %v1109_v50, %v1108_v47  ;;  %v3943_v50 = vperm.slane %v97_v61, 1 }
  0xca   :  { %6782 = vst [vmem:[#allocation62_spill] sm:$0xff] %v3892_v35  ;;  %v3896_v20 = vpop.f32.mrf.mxu1  ;;  %vm392_vm12 = vcmp.eq.f32.partialorder %v3800_v42, %v3935_v49  ;;  %vm396_vm2 = vcmp.eq.f32.partialorder %v3734_v38, %v3935_v49 }
  0xcb   :  { %6783 = vst [vmem:[#allocation63_spill] sm:$0xff] %v3894_v37  ;;  %v1111_v1 = vmul.f32 %v3896_v20, %v3896_v20  ;;  %vm393_vm15 = vcmp.eq.f32.partialorder %v3800_v42, %v3943_v50 }
  0xcc   :  { %6784 = vst [vmem:[#allocation64_spill] sm:$0xff] %v3896_v20  ;;  %1168 = vadd.xlane.f32.xlu2 %v1167_v5 }
  0xcd   :  { %v3898_v22 = vpop.permute.xlu1 %433  ;;  %1165 = vadd.xlane.f32.xlu1 %v1164_v21  ;;  %v1105_v21 = vmul.f32 %v3846_v23, %v3846_v23  ;;  %v1110_v23 = vmul.f32 %v3894_v37, %v3894_v37  ;;  %6790 = vst [vmem:[#allocation70_spill] sm:$0xff] %v3935_v49 }
  0xce   :  { %v3900_v3 = vpop.permute.xlu2 %463  ;;  %v3902_v2 = vpop.permute.xlu0 %430  ;;  %6792 = vst [vmem:[#allocation72_spill] sm:$0xff] %v3943_v50 }
  0xcf   :  { %6785 = vst [vmem:[#allocation65_spill] sm:$0xff] %v3900_v3  ;;  %v1170_v62 = vadd.f32 %v1105_v21, %v1104_v60 }
  0xd0   :  { %v3912_v52 = vpop.f32.mrf.mxu2 }
  0xd1   :  { %v3918_v13 = vpop.f32.mrf.mxu3  ;;  %v3920_v5 = vpop.f32.mrf.mxu0 }
  0xd2   :  { %6786 = vst [vmem:[#allocation66_spill] sm:$0xff] %v3920_v5  ;;  %v3922_v3 = vpop.f32.mrf.mxu1  ;;  %v1112_v47 = vmul.f32 %v3920_v5, %v3920_v5 }
  0xd3   :  { %6787 = vst [vmem:[#allocation67_spill] sm:$0xff] %v3922_v3 }
  0xd4   :  { %1174 = vadd.xlane.f32.xlu2 %v1173_v40 }
  0xd5   :  { %v3927_v44 = vpop.permute.xlu1 %442  ;;  %1177 = vadd.xlane.f32.xlu1 %v1176_v11  ;;  %v1113_v11 = vmul.f32 %v3922_v3, %v3922_v3 }
  0xd6   :  { %6788 = vst [vmem:[#allocation68_spill] sm:$0xff] %v3927_v44  ;;  %v473_v31 = vpop.permute.xlu2 %472  ;;  %v3929_v17 = vpop.permute.xlu0 %439  ;;  %1171 = vadd.xlane.f32.xlu0 %v1170_v62 }
  0xd7   :  { %6789 = vst [vmem:[#allocation69_spill] sm:$0xff] %v3929_v17  ;;  %vm537_vm13 = vcmp.eq.s32.totalorder %v473_v31, 1  ;;  %v1179_v31 = vadd.f32 %v1111_v1, %v1110_v23  ;;  %v1182_v5 = vadd.f32 %v1113_v11, %v1112_v47  ;;  %v1137_v17 = vmul.f32 %v3856_v14, %v3856_v14 }
  0xd8   :  { %v3937_v40 = vpop.f32.mrf.mxu2  ;;  %vm3957_vm14 = vmand %vm392_vm12, %vm537_vm13 }
  0xd9   :  { %6791 = vst [vmem:[#allocation71_spill] sm:$0xff] %v3937_v40  ;;  %v3945_v62 = vpop.f32.mrf.mxu3  ;;  %v3947_v60 = vpop.f32.mrf.mxu0  ;;  %vm3963_vm11 = vmand %vm393_vm15, %vm537_vm13  ;;  %vm398_vm13 = vcmp.eq.f32.partialorder %v3820_v29, %v3935_v49  ;;  %vm399_vm15 = vcmp.eq.f32.partialorder %v3820_v29, %v3943_v50 }
  0xda   :  { %6793 = vst [vmem:[#allocation73_spill] sm:$0xff] %v3945_v62  ;;  %v3951_v21 = vpop.f32.mrf.mxu1  ;;  %v1114_v20 = vmul.f32 %v3947_v60, %v3947_v60 }
  0xdb   :  { %6794 = vst [vmem:[#allocation74_spill] sm:$0xff] %v3947_v60  ;;  %v1115_v61 = vmul.f32 %v3951_v21, %v3951_v21 }
  0xdc   :  { %6795 = vst [vmem:[#allocation75_spill] sm:$0xff] %v3951_v21  ;;  %1180 = vadd.xlane.f32.xlu2 %v1179_v31  ;;  %v1136_v21 = vmul.f32 %v3854_v43, %v3854_v43  ;;  %v6946_v31 = vld [vmem:[#allocation66_spill] sm:$0xff] }
  0xdd   :  { %v3967_v23 = vpop.permute.xlu1 %451  ;;  %v1185_v60 = vadd.f32 %v1115_v61, %v1114_v20  ;;  %v1132_v20 = vmul.f32 %v3823_v30, %v3823_v30 }
  0xde   :  { %6800 = vst [vmem:[#allocation76_spill] sm:$0xff] %v3967_v23  ;;  %v482_v1 = vpop.permute.xlu2 %481  ;;  %v3969_v39 = vpop.permute.xlu0 %448  ;;  %1183 = vadd.xlane.f32.xlu0 %v1182_v5  ;;  %v1133_v5 = vmul.f32 %v3825_v32, %v3825_v32  ;;  %v1218_v23 = vadd.f32 %v1137_v17, %v1136_v21  ;;  %v1138_v17 = vmul.f32 %v3868_v7, %v3868_v7 }
  0xdf   :  { %6801 = vst [vmem:[#allocation77_spill] sm:$0xff] %v3969_v39  ;;  %1186 = vadd.xlane.f32.xlu1 %v1185_v60  ;;  %vm540_vm12 = vcmp.eq.s32.totalorder %v482_v1, 1  ;;  %v1139_v21 = vmul.f32 %v3870_v8, %v3870_v8 }
  0xe0   :  { %v3971_v42 = vpop.f32.mrf.mxu2  ;;  %vm3993_vm10 = vmand %vm398_vm13, %vm540_vm12  ;;  %v1212_v39 = vadd.f32 %v1133_v5, %v1132_v20  ;;  %v1134_v20 = vmul.f32 %v3840_v27, %v3840_v27 }
  0xe1   :  { %6802 = vst [vmem:[#allocation78_spill] sm:$0xff] %v3971_v42  ;;  %v3977_v45 = vpop.f32.mrf.mxu3  ;;  %v3979_v47 = vpop.f32.mrf.mxu0  ;;  %vm3999_vm8 = vmand %vm399_vm15, %vm540_vm12  ;;  %vm404_vm12 = vcmp.eq.f32.partialorder %v3838_v25, %v3935_v49  ;;  %vm405_vm15 = vcmp.eq.f32.partialorder %v3838_v25, %v3943_v50  ;;  %v1221_v7 = vadd.f32 %v1139_v21, %v1138_v17  ;;  %v1141_v17 = vmul.f32 %v3892_v35, %v3892_v35 }
  0xe2   :  { %6803 = vst [vmem:[#allocation79_spill] sm:$0xff] %v3977_v45  ;;  %v3987_v11 = vpop.f32.mrf.mxu1  ;;  %v1116_v60 = vmul.f32 %v3979_v47, %v3979_v47 }
  0xe3   :  { %6804 = vst [vmem:[#allocation80_spill] sm:$0xff] %v3979_v47  ;;  %v1117_v61 = vmul.f32 %v3987_v11, %v3987_v11 }
  0xe4   :  { %6805 = vst [vmem:[#allocation81_spill] sm:$0xff] %v3987_v11 }
  0xe5   :  { %v4003_v32 = vpop.permute.xlu1 %460  ;;  %v1188_v47 = vadd.f32 %v1117_v61, %v1116_v60  ;;  %v6818_v60 = vmov 0 }
  0xe6   :  { %6810 = vst [vmem:[#allocation82_spill] sm:$0xff] %v4003_v32  ;;  %v491_v30 = vpop.permute.xlu2 %490  ;;  %v4005_v44 = vpop.permute.xlu0 %457  ;;  %1219 = vadd.xlane.f32.xlu0 %v1218_v23 }
  0xe7   :  { %6811 = vst [vmem:[#allocation83_spill] sm:$0xff] %v4005_v44  ;;  %1213 = vadd.xlane.f32.xlu1 %v1212_v39  ;;  %1189 = vadd.xlane.f32.xlu2 %v1188_v47  ;;  %vm543_vm13 = vcmp.eq.s32.totalorder %v491_v30, 1  ;;  %v1135_v39 = vmul.f32 %v3842_v18, %v3842_v18  ;;  %v6816_v47 = vmov 0 }
  0xe8   :  { %v4007_v29 = vpop.f32.mrf.mxu2  ;;  %vm4029_vm9 = vmand %vm404_vm12, %vm543_vm13 }
  0xe9   :  { %6812 = vst [vmem:[#allocation84_spill] sm:$0xff] %v4007_v29  ;;  %v4009_v48 = vpop.f32.mrf.mxu3  ;;  %v4011_v11 = vpop.f32.mrf.mxu0  ;;  %v6817_v47 = vsel %vm4029_vm9, 4294967295, %v6816_v47  ;;  %vm4035_vm7 = vmand %vm405_vm15, %vm543_vm13  ;;  %v1215_v32 = vadd.f32 %v1135_v39, %v1134_v20  ;;  %vm410_vm13 = vcmp.eq.f32.partialorder %v3852_v28, %v3935_v49  ;;  %vm411_vm15 = vcmp.eq.f32.partialorder %v3852_v28, %v3943_v50 }
  0xea   :  { %6813 = vst [vmem:[#allocation85_spill] sm:$0xff] %v4009_v48  ;;  %v4023_v30 = vpop.f32.mrf.mxu1  ;;  %v1118_v23 = vmul.f32 %v4011_v11, %v4011_v11  ;;  %v6819_v60 = vsel %vm4035_vm7, 4294967295, %v6818_v60  ;;  %v6826_v20 = vmov 0 }
  0xeb   :  { %6814 = vst [vmem:[#allocation86_spill] sm:$0xff] %v4011_v11  ;;  %v1119_v5 = vmul.f32 %v4023_v30, %v4023_v30  ;;  %v1140_v11 = vmul.f32 %v3890_v36, %v3890_v36 }
  0xec   :  { %6815 = vst [vmem:[#allocation87_spill] sm:$0xff] %v4023_v30 }
  0xed   :  { %v4039_v61 = vpop.permute.xlu1 %469  ;;  %v1191_v44 = vadd.f32 %v1119_v5, %v1118_v23  ;;  %v6829_v23 = vmov 0  ;;  %v1224_v35 = vadd.f32 %v1141_v17, %v1140_v11  ;;  %v1149_v17 = vmul.f32 %v4009_v48, %v4009_v48 }
  0xee   :  { %6820 = vst [vmem:[#allocation88_spill] sm:$0xff] %v4039_v61  ;;  %v500_v8 = vpop.permute.xlu2 %499  ;;  %v4041_v18 = vpop.permute.xlu0 %466 }
  0xef   :  { %6821 = vst [vmem:[#allocation89_spill] sm:$0xff] %v4041_v18  ;;  %1222 = vadd.xlane.f32.xlu1 %v1221_v7  ;;  %1216 = vadd.xlane.f32.xlu2 %v1215_v32  ;;  %vm546_vm12 = vcmp.eq.s32.totalorder %v500_v8, 1  ;;  %v1142_v7 = vmul.f32 %v3912_v52, %v3912_v52  ;;  %v1143_v32 = vmul.f32 %v3918_v13, %v3918_v13 }
  0xf0   :  { %1192 = vadd.xlane.f32.xlu0 %v1191_v44  ;;  %v4043_v25 = vpop.f32.mrf.mxu2  ;;  %vm4066_vm5 = vmand %vm410_vm13, %vm546_vm12  ;;  %vm397_vm13 = vcmp.eq.f32.partialorder %v3734_v38, %v3943_v50  ;;  %v1148_v38 = vmul.f32 %v4007_v29, %v4007_v29 }
  0xf1   :  { %6822 = vst [vmem:[#allocation90_spill] sm:$0xff] %v4043_v25  ;;  %v4045_v27 = vpop.f32.mrf.mxu3  ;;  %v4047_v30 = vpop.f32.mrf.mxu0  ;;  %v6827_v20 = vsel %vm4066_vm5, 4294967295, %v6826_v20  ;;  %vm4073_vm4 = vmand %vm411_vm15, %vm546_vm12  ;;  %v1227_v61 = vadd.f32 %v1143_v32, %v1142_v7  ;;  %vm394_vm15 = vcmp.eq.f32.partialorder %v3796_v34, %v3935_v49  ;;  %v1145_v32 = vmul.f32 %v3945_v62, %v3945_v62 }
  0xf2   :  { %6823 = vst [vmem:[#allocation91_spill] sm:$0xff] %v4045_v27  ;;  %v4055_v21 = vpop.f32.mrf.mxu1  ;;  %v1120_v44 = vmul.f32 %v4047_v30, %v4047_v30  ;;  %v6830_v23 = vsel %vm4073_vm4, 4294967295, %v6829_v23  ;;  %v6846_v62 = vmov 0 }
  0xf3   :  { %6824 = vst [vmem:[#allocation92_spill] sm:$0xff] %v4047_v30  ;;  %v1121_v39 = vmul.f32 %v4055_v21, %v4055_v21 }
  0xf4   :  { %6825 = vst [vmem:[#allocation93_spill] sm:$0xff] %v4055_v21 }
  0xf5   :  { %6828 = vst [vmem:[#allocation94_spill] sm:$0xff] %v6827_v20  ;;  %v479_v5 = vpop.permute.xlu1 %478  ;;  %v1194_v36 = vadd.f32 %v1121_v39, %v1120_v44 }
  0xf6   :  { %v509_v18 = vpop.permute.xlu2 %508  ;;  %vm539_vm3 = vcmp.eq.s32.totalorder %v479_v5, 1  ;;  %v476_v28 = vpop.permute.xlu0 %475  ;;  %v6843_v5 = vmov 0 }
  0xf7   :  { %vm4081_vm0 = vmand %vm396_vm2, %vm539_vm3  ;;  %vm538_vm12 = vcmp.eq.s32.totalorder %v476_v28, 1  ;;  %1225 = vadd.xlane.f32.xlu2 %v1224_v35  ;;  %1195 = vadd.xlane.f32.xlu1 %v1194_v36  ;;  %vm549_vm6 = vcmp.eq.s32.totalorder %v509_v18, 1  ;;  %vm395_vm2 = vcmp.eq.f32.partialorder %v3796_v34, %v3943_v50  ;;  %v6836_v35 = vmov 0 }
  0xf8   :  { %vm4087_vm1 = vmand %vm397_vm13, %vm539_vm3  ;;  %1228 = vadd.xlane.f32.xlu0 %v1227_v61  ;;  %v4091_v11 = vpop.f32.mrf.mxu2  ;;  %v1144_v61 = vmul.f32 %v3937_v40, %v3937_v40  ;;  %vm416_vm3 = vcmp.eq.f32.partialorder %v3866_v12, %v3935_v49  ;;  %v6840_v34 = vmov 0  ;;  %v1236_v40 = vadd.f32 %v1149_v17, %v1148_v38 }
  0xf9   :  { %6835 = vst [vmem:[#allocation95_spill] sm:$0xff] %v4091_v11  ;;  %vm4100_vm4 = vmand %vm394_vm15, %vm538_vm12  ;;  %v4104_v36 = vpop.f32.mrf.mxu3  ;;  %v4106_v7 = vpop.f32.mrf.mxu0  ;;  %vm417_vm15 = vcmp.eq.f32.partialorder %v3866_v12, %v3943_v50  ;;  %v6851_v18 = vmov 0  ;;  %v1150_v17 = vmul.f32 %v4043_v25, %v4043_v25 }
  0xfa   :  { %v6837_v35 = vsel %vm4100_vm4, 4294967295, %v6836_v35  ;;  %6838 = vst [vmem:[#allocation96_spill] sm:$0xff] %v4104_v36  ;;  %vm4115_vm13 = vmand %vm395_vm2, %vm538_vm12  ;;  %v4119_v44 = vpop.f32.mrf.mxu1  ;;  %v1122_v39 = vmul.f32 %v4106_v7, %v4106_v7  ;;  %v1230_v29 = vadd.f32 %v1145_v32, %v1144_v61  ;;  %vm402_vm2 = vcmp.eq.f32.partialorder %v3752_v46, %v3935_v49 }
  0xfb   :  { %6839 = vst [vmem:[#allocation97_spill] sm:$0xff] %v4106_v7  ;;  %v6841_v34 = vsel %vm4115_vm13, 4294967295, %v6840_v34  ;;  %vm4126_vm5 = vmand %vm416_vm3, %vm549_vm6  ;;  %v1123_v28 = vmul.f32 %v4119_v44, %v4119_v44  ;;  %vm403_vm3 = vcmp.eq.f32.partialorder %v3752_v46, %v3943_v50  ;;  %v6854_v46 = vmov 0 }
  0xfc   :  { %6842 = vst [vmem:[#allocation98_spill] sm:$0xff] %v4119_v44  ;;  %v6844_v5 = vsel %vm4126_vm5, 4294967295, %v6843_v5  ;;  %vm4133_vm12 = vmand %vm417_vm15, %vm549_vm6  ;;  %vm400_vm15 = vcmp.eq.f32.partialorder %v3818_v57, %v3935_v49  ;;  %v6858_v61 = vmov 0  ;;  %vm362_vm13 = vcmp.eq.f32.partialorder %v3694_v59, %v3935_v49 }
  0xfd   :  { %6845 = vst [vmem:[#allocation99_spill] sm:$0xff] %v6844_v5  ;;  %v6847_v62 = vsel %vm4133_vm12, 4294967295, %v6846_v62  ;;  %v488_v48 = vpop.permute.xlu1 %487  ;;  %v1197_v7 = vadd.f32 %v1123_v28, %v1122_v39  ;;  %v6849_v5 = vmov 0  ;;  %vm401_vm12 = vcmp.eq.f32.partialorder %v3818_v57, %v3943_v50 }
  0xfe   :  { %6848 = vst [vmem:[#allocation100_spill] sm:$0xff] %v6847_v62  ;;  %vm542_vm7 = vcmp.eq.s32.totalorder %v488_v48, 1  ;;  %v485_v12 = vpop.permute.xlu0 %484  ;;  %v1151_v57 = vmul.f32 %v4045_v27, %v4045_v27 }
  0xff   :  { %vm4141_vm5 = vmand %vm402_vm2, %vm542_vm7  ;;  %vm541_vm6 = vcmp.eq.s32.totalorder %v485_v12, 1  ;;  %1231 = vadd.xlane.f32.xlu1 %v1230_v29  ;;  %1198 = vadd.xlane.f32.xlu2 %v1197_v7  ;;  %v1147_v7 = vmul.f32 %v3977_v45, %v3977_v45  ;;  %v6861_v45 = vmov 0 }
 0x100   :  { %v6850_v5 = vsel %vm4141_vm5, 4294967295, %v6849_v5  ;;  %vm4149_vm9 = vmand %vm403_vm3, %vm542_vm7  ;;  %1237 = vadd.xlane.f32.xlu0 %v1236_v40  ;;  %v4153_v48 = vpop.f32.mrf.mxu2  ;;  %v1146_v40 = vmul.f32 %v3971_v42, %v3971_v42  ;;  %v1239_v25 = vadd.f32 %v1151_v57, %v1150_v17  ;;  %vm408_vm3 = vcmp.eq.f32.partialorder %v3776_v63, %v3935_v49 }
 0x101   :  { %v6852_v18 = vsel %vm4149_vm9, 4294967295, %v6851_v18  ;;  %6853 = vst [vmem:[#allocation101_spill] sm:$0xff] %v4153_v48  ;;  %vm4156_vm2 = vmand %vm400_vm15, %vm541_vm6  ;;  %v4160_v29 = vpop.f32.mrf.mxu3  ;;  %v4162_v38 = vpop.f32.mrf.mxu0  ;;  %v1152_v17 = vmul.f32 %v4091_v11, %v4091_v11  ;;  %v1153_v57 = vmul.f32 %v4104_v36, %v4104_v36 }
 0x102   :  { %v6855_v46 = vsel %vm4156_vm2, 4294967295, %v6854_v46  ;;  %6856 = vst [vmem:[#allocation102_spill] sm:$0xff] %v4160_v29  ;;  %vm4173_vm7 = vmand %vm401_vm12, %vm541_vm6  ;;  %v4177_v32 = vpop.f32.mrf.mxu1  ;;  %v1124_v39 = vmul.f32 %v4162_v38, %v4162_v38  ;;  %v1233_v62 = vadd.f32 %v1147_v7, %v1146_v40  ;;  %vm409_vm12 = vcmp.eq.f32.partialorder %v3776_v63, %v3943_v50 }
 0x103   :  { %6857 = vst [vmem:[#allocation103_spill] sm:$0xff] %v4162_v38  ;;  %v6859_v61 = vsel %vm4173_vm7, 4294967295, %v6858_v61  ;;  %v1125_v28 = vmul.f32 %v4177_v32, %v4177_v32  ;;  %vm406_vm2 = vcmp.eq.f32.partialorder %v3834_v54, %v3935_v49  ;;  %v6866_v40 = vmov 0 }
 0x104   :  { %6860 = vst [vmem:[#allocation104_spill] sm:$0xff] %v4177_v32 }
 0x105   :  { %v497_v27 = vpop.permute.xlu1 %496  ;;  %v1200_v42 = vadd.f32 %v1125_v28, %v1124_v39 }
 0x106   :  { %vm545_vm15 = vcmp.eq.s32.totalorder %v497_v27, 1  ;;  %v494_v12 = vpop.permute.xlu0 %493  ;;  %v6863_v27 = vmov 0 }
 0x107   :  { %vm4187_vm6 = vmand %vm408_vm3, %vm545_vm15  ;;  %vm544_vm7 = vcmp.eq.s32.totalorder %v494_v12, 1  ;;  %1240 = vadd.xlane.f32.xlu1 %v1239_v25  ;;  %1234 = vadd.xlane.f32.xlu2 %v1233_v62  ;;  %v1154_v25 = vmul.f32 %v4153_v48, %v4153_v48  ;;  %v1155_v62 = vmul.f32 %v4160_v29, %v4160_v29  ;;  %vm407_vm3 = vcmp.eq.f32.partialorder %v3834_v54, %v3943_v50 }
 0x108   :  { %v6862_v45 = vsel %vm4187_vm6, 4294967295, %v6861_v45  ;;  %vm4197_vm9 = vmand %vm409_vm12, %vm545_vm15  ;;  %1201 = vadd.xlane.f32.xlu0 %v1200_v42  ;;  %v4201_v63 = vpop.f32.mrf.mxu2  ;;  %v6871_v42 = vmov 0  ;;  %vm6608_vm12 = vcmp.eq.s32.totalorder %v3850_v0, 1  ;;  %v1242_v54 = vadd.f32 %v1153_v57, %v1152_v17 }
 0x109   :  { %v6864_v27 = vsel %vm4197_vm9, 4294967295, %v6863_v27  ;;  %6865 = vst [vmem:[#allocation105_spill] sm:$0xff] %v4201_v63  ;;  %vm4210_vm6 = vmand %vm406_vm2, %vm544_vm7  ;;  %v4214_v7 = vpop.f32.mrf.mxu3  ;;  %v4216_v39 = vpop.f32.mrf.mxu0  ;;  %vm368_vm2 = vcmp.eq.f32.partialorder %v3712_v19, %v3935_v49  ;;  %v6877_v57 = vmov 0 }
 0x10a   :  { %v6867_v40 = vsel %vm4210_vm6, 4294967295, %v6866_v40  ;;  %6869 = vst [vmem:[#allocation107_spill] sm:$0xff] %v4214_v7  ;;  %vm4219_vm15 = vmand %vm407_vm3, %vm544_vm7  ;;  %v4223_v28 = vpop.f32.mrf.mxu1  ;;  %v1126_v36 = vmul.f32 %v4216_v39, %v4216_v39  ;;  %vm414_vm7 = vcmp.eq.f32.partialorder %v3794_v33, %v3935_v49  ;;  %vm415_vm6 = vcmp.eq.f32.partialorder %v3794_v33, %v3943_v50 }
 0x10b   :  { %6868 = vst [vmem:[#allocation106_spill] sm:$0xff] %v6867_v40  ;;  %v6872_v42 = vsel %vm4219_vm15, 4294967295, %v6871_v42  ;;  %v1127_v11 = vmul.f32 %v4223_v28, %v4223_v28  ;;  %v1245_v40 = vadd.f32 %v1155_v62, %v1154_v25  ;;  %vm4236_vm3 = vmand %vm368_vm2, %vm6608_vm12  ;;  %vm412_vm2 = vcmp.eq.f32.partialorder %v3848_v15, %v3935_v49 }
 0x10c   :  { %6870 = vst [vmem:[#allocation108_spill] sm:$0xff] %v4216_v39  ;;  %v6879_v25 = vmov 0 }
 0x10d   :  { %6873 = vst [vmem:[#allocation109_spill] sm:$0xff] %v6872_v42  ;;  %v506_v12 = vpop.permute.xlu1 %505  ;;  %v1203_v29 = vadd.f32 %v1127_v11, %v1126_v36  ;;  %v1156_v11 = vmul.f32 %v4201_v63, %v4201_v63  ;;  %v1157_v36 = vmul.f32 %v4214_v7, %v4214_v7 }
 0x10e   :  { %6874 = vst [vmem:[#allocation110_spill] sm:$0xff] %v4223_v28  ;;  %vm548_vm15 = vcmp.eq.s32.totalorder %v506_v12, 1  ;;  %v503_v17 = vpop.permute.xlu0 %502 }
 0x10f   :  { %vm4242_vm9 = vmand %vm414_vm7, %vm548_vm15  ;;  %vm547_vm5 = vcmp.eq.s32.totalorder %v503_v17, 1  ;;  %1243 = vadd.xlane.f32.xlu2 %v1242_v54  ;;  %1204 = vadd.xlane.f32.xlu1 %v1203_v29  ;;  %vm413_vm7 = vcmp.eq.f32.partialorder %v3848_v15, %v3943_v50  ;;  %v6882_v29 = vmov 0  ;;  %v1248_v7 = vadd.f32 %v1157_v36, %v1156_v11 }
 0x110   :  { %v6878_v57 = vsel %vm4242_vm9, 4294967295, %v6877_v57  ;;  %vm4252_vm12 = vmand %vm415_vm6, %vm548_vm15  ;;  %1246 = vadd.xlane.f32.xlu0 %v1245_v40  ;;  %v4256_v33 = vpop.f32.mrf.mxu2  ;;  %vm522_vm6 = vcmp.eq.s32.totalorder %v3836_v26, 1  ;;  %vm369_vm15 = vcmp.eq.f32.partialorder %v3712_v19, %v3943_v50  ;;  %v6886_v40 = vmov 0 }
 0x111   :  { %v6880_v25 = vsel %vm4252_vm12, 4294967295, %v6879_v25  ;;  %6881 = vst [vmem:[#allocation111_spill] sm:$0xff] %v4256_v33  ;;  %vm4261_vm9 = vmand %vm412_vm2, %vm547_vm5  ;;  %v4265_v62 = vpop.f32.mrf.mxu3  ;;  %v4267_v54 = vpop.f32.mrf.mxu0  ;;  %vm6889_vm2 = vcmp.eq.s32.totalorder %v3850_v0, 1  ;;  %v6615_v11 = vmov 0.0  }
 0x112   :  { %v6883_v29 = vsel %vm4261_vm9, 4294967295, %v6882_v29  ;;  %6884 = vst [vmem:[#allocation112_spill] sm:$0xff] %v4265_v62  ;;  %vm4273_vm12 = vmand %vm413_vm7, %vm547_vm5  ;;  %v4277_v15 = vpop.f32.mrf.mxu1  ;;  %v1128_v12 = vmul.f32 %v4267_v54, %v4267_v54  ;;  %vm363_vm5 = vcmp.eq.f32.partialorder %v3694_v59, %v3943_v50  ;;  %v2716_v36 = vsel %vm4236_vm3, 1.0, %v6615_v11 }
 0x113   :  { %6885 = vst [vmem:[#allocation113_spill] sm:$0xff] %v4267_v54  ;;  %v6887_v40 = vsel %vm4273_vm12, 4294967295, %v6886_v40  ;;  %vm561_vm9 = vmand %vm369_vm15, %vm6889_vm2  ;;  %v1129_v26 = vmul.f32 %v4277_v15, %v4277_v15  ;;  %vm420_vm12 = vcmp.eq.f32.partialorder %v3816_v56, %v3935_v49  ;;  %vm421_vm2 = vcmp.eq.f32.partialorder %v3816_v56, %v3943_v50 }
 0x114   :  { %6888 = vst [vmem:[#allocation114_spill] sm:$0xff] %v4277_v15  ;;  %vm4289_vm7 = vmand %vm362_vm13, %vm522_vm6  ;;  %v2717_v59 = vsel %vm561_vm9, 1.0, %v6615_v11  ;;  %v1159_v42 = vmul.f32 %v4265_v62, %v4265_v62  ;;  %vm418_vm9 = vcmp.eq.f32.partialorder %v3862_v16, %v3935_v49  ;;  %v6903_v62 = vmov 0 }
 0x115   :  { %v515_v17 = vpop.permute.xlu1 %514  ;;  %v1206_v63 = vadd.f32 %v1129_v26, %v1128_v12  ;;  %vm4295_vm15 = vmand %vm363_vm5, %vm522_vm6  ;;  %v1158_v26 = vmul.f32 %v4256_v33, %v4256_v33  ;;  %v1619_v11 = vmul.f32 %v2717_v59, %v3860_v10  ;;  %v6905_v54 = vmov 0.0  }
 0x116   :  { %vm551_vm13 = vcmp.eq.s32.totalorder %v515_v17, 1  ;;  %v512_v15 = vpop.permute.xlu0 %511  ;;  %v6896_v17 = vmov 0  ;;  %v2746_v10 = vsel %vm3993_vm10, 1.0, %v6905_v54  ;;  %v2741_v37 = vsel %vm3963_vm11, 1.0, %v6905_v54 }
 0x117   :  { %vm4305_vm4 = vmand %vm420_vm12, %vm551_vm13  ;;  %vm550_vm6 = vcmp.eq.s32.totalorder %v512_v15, 1  ;;  %1249 = vadd.xlane.f32.xlu1 %v1248_v7  ;;  %1207 = vadd.xlane.f32.xlu2 %v1206_v63  ;;  %vm419_vm12 = vcmp.eq.f32.partialorder %v3862_v16, %v3943_v50  ;;  %v6899_v63 = vmov 0  ;;  %v1618_v15 = vmul.f32 %v2716_v36, %v3858_v9 }
 0x118   :  { %vm4315_vm3 = vmand %vm421_vm2, %vm551_vm13  ;;  %v4319_v56 = vpop.f32.mrf.mxu2  ;;  %v2711_v36 = vsel %vm4295_vm15, 1.0, %v6905_v54  ;;  %v1251_v59 = vadd.f32 %v1159_v42, %v1158_v26  ;;  %vm6629_vm13 = vcmp.eq.s32.totalorder %v3898_v22, 1  ;;  %vm6916_vm15 = vcmp.eq.s32.totalorder %v3898_v22, 1 }
 0x119   :  { %v6897_v17 = vsel %vm4315_vm3, 4294967295, %v6896_v17  ;;  %6898 = vst [vmem:[#allocation115_spill] sm:$0xff] %v4319_v56  ;;  %vm4323_vm5 = vmand %vm418_vm9, %vm550_vm6  ;;  %v4327_v7 = vpop.f32.mrf.mxu3  ;;  %v1160_v16 = vmul.f32 %v4319_v56, %v4319_v56  ;;  %vm6627_vm9 = vcmp.eq.s32.totalorder %v3864_v6, 1  ;;  %v2747_v56 = vsel %vm3999_vm8, 1.0, %v6905_v54 }
 0x11a   :  { %v6900_v63 = vsel %vm4323_vm5, 4294967295, %v6899_v63  ;;  %6902 = vst [vmem:[#allocation117_spill] sm:$0xff] %v4327_v7  ;;  %vm4333_vm2 = vmand %vm419_vm12, %vm550_vm6  ;;  %v1161_v19 = vmul.f32 %v4327_v7, %v4327_v7  ;;  %v1685_v0 = vadd.f32 %v1619_v11, %v1618_v15  ;;  %v1613_v7 = vmul.f32 %v2711_v36, %v3814_v55  ;;  %v4382_v15 = vpop.f32.mrf.mxu0 }
 0x11b   :  { %6901 = vst [vmem:[#allocation116_spill] sm:$0xff] %v6900_v63  ;;  %v6904_v62 = vsel %vm4333_vm2, 4294967295, %v6903_v62  ;;  %v2710_v63 = vsel %vm4289_vm7, 1.0, %v6905_v54  ;;  %vm374_vm7 = vcmp.eq.f32.partialorder %v3740_v41, %v3935_v49  ;;  %vm424_vm12 = vcmp.eq.f32.partialorder %v3876_v4, %v3935_v49 }
 0x11c   :  { %vm4363_vm10 = vmand %vm374_vm7, %vm6627_vm9  ;;  %v1254_v1 = vadd.f32 %v1161_v19, %v1160_v16  ;;  %v1612_v42 = vmul.f32 %v2710_v63, %v3809_v53  ;;  %vm6908_vm7 = vcmp.eq.f32.partialorder %v3692_v58, %v3935_v49  ;;  %6911 = vst [vmem:[#allocation118_spill] sm:$0xff] %v4382_v15  ;;  %v4384_v16 = vpop.f32.mrf.mxu1  ;;  %v1648_v63 = vmul.f32 %v2746_v10, %v3854_v43 }
 0x11d   :  { %vm4378_vm9 = vmand %vm6908_vm7, %vm6629_vm13  ;;  %6912 = vst [vmem:[#allocation119_spill] sm:$0xff] %v4384_v16  ;;  %v1649_v36 = vmul.f32 %v2747_v56, %v3856_v14  ;;  %vm425_vm6 = vcmp.eq.f32.partialorder %v3876_v4, %v3943_v50  ;;  %v1130_v19 = vmul.f32 %v4382_v15, %v4382_v15  ;;  %v1131_v9 = vmul.f32 %v4384_v16, %v4384_v16 }
 0x11e   :  { %v521_v26 = vpop.permute.xlu0 %520  ;;  %1255 = vadd.xlane.f32.xlu0 %v1254_v1  ;;  %v2740_v10 = vsel %vm3957_vm14, 1.0, %v6905_v54  ;;  %vm375_vm11 = vcmp.eq.f32.partialorder %v3740_v41, %v3943_v50 }
 0x11f   :  { %vm553_vm8 = vcmp.eq.s32.totalorder %v521_v26, 1  ;;  %1686 = vadd.xlane.f32.xlu1 %v1685_v0  ;;  %1252 = vadd.xlane.f32.xlu2 %v1251_v59  ;;  %v4405_v0 = vadd.f32 %v1649_v36, %v1648_v63  ;;  %v1642_v3 = vmul.f32 %v2740_v10, %v4382_v15  ;;  %v6929_v10 = vld [vmem:[#allocation41_spill] sm:$0xff] }
 0x120   :  { %vm616_vm7 = vmand %vm424_vm12, %vm553_vm8  ;;  %v4395_v26 = vpop.f32.mrf.mxu2  ;;  %vm6917_vm12 = vcmp.eq.f32.partialorder %v3692_v58, %v3943_v50  ;;  %v1643_v58 = vmul.f32 %v2741_v37, %v4384_v16  ;;  %vm380_vm14 = vcmp.eq.f32.partialorder %v6929_v10, %v3935_v49  ;;  %vm381_vm3 = vcmp.eq.f32.partialorder %v6929_v10, %v3943_v50  ;;  %v6942_v37 = vld [vmem:[#allocation34_spill] sm:$0xff]  ;;  %v6955_v16 = vld [vmem:[#allocation63_spill] sm:$0xff] }
 0x121   :  { %6913 = vst [vmem:[#allocation120_spill] sm:$0xff] %v4395_v26  ;;  %vm617_vm13 = vmand %vm425_vm6, %vm553_vm8  ;;  %v2772_v56 = vsel %vm616_vm7, 1.0, %v6905_v54  ;;  %v1162_v4 = vmul.f32 %v4395_v26, %v4395_v26  ;;  %v4403_v59 = vpop.f32.mrf.mxu3  ;;  %vm6920_vm6 = vcmp.eq.s32.totalorder %v3902_v2, 1  ;;  %vm6925_vm7 = vcmp.eq.f32.partialorder %v3716_v24, %v3943_v50 }
 0x122   :  { %6914 = vst [vmem:[#allocation121_spill] sm:$0xff] %v4403_v59  ;;  %vm4412_vm2 = vmand %vm6917_vm12, %vm6916_vm15  ;;  %v2773_v14 = vsel %vm617_vm13, 1.0, %v6905_v54  ;;  %v1674_v43 = vmul.f32 %v2772_v56, %v4395_v26  ;;  %v1163_v63 = vmul.f32 %v4403_v59, %v4403_v59  ;;  %vm6921_vm15 = vcmp.eq.f32.partialorder %v3716_v24, %v3935_v49 }
 0x123   :  { %6915 = vst [vmem:[#allocation122_spill] sm:$0xff] %v4405_v0  ;;  %vm4429_vm8 = vmand %vm6921_vm15, %vm6920_vm6  ;;  %v1675_v36 = vmul.f32 %v2773_v14, %v4403_v59  ;;  %v1209_v56 = vadd.f32 %v1131_v9, %v1130_v19  ;;  %v6930_v14 = vld [vmem:[#allocation68_spill] sm:$0xff]  ;;  %v1676_v2 = vadd.f32 %v1613_v7, %v1612_v42  ;;  %v2715_v24 = vsel %vm4412_vm2, 1.0, %v6905_v54  ;;  %v6939_v19 = vld [vmem:[#allocation69_spill] sm:$0xff] }
 0x124   :  { %vm6924_vm13 = vmmov %vm6920_vm6  ;;  %v1257_v26 = vadd.f32 %v1163_v63, %v1162_v4  ;;  %vm6926_vm6 = vcmp.eq.s32.totalorder %v3864_v6, 1  ;;  %v2714_v6 = vsel %vm4378_vm9, 1.0, %v6905_v54  ;;  %v2712_v42 = vsel %vm4429_vm8, 1.0, %v6905_v54  ;;  %v6947_v0 = vld [vmem:[#allocation67_spill] sm:$0xff] }
 0x125   :  { %vm557_vm12 = vmand %vm6925_vm7, %vm6924_vm13  ;;  %v4452_v41 = vadd.f32 %v1675_v36, %v1674_v43  ;;  %vm6932_vm13 = vcmp.eq.s32.totalorder %v3878_v51, 1  ;;  %v6935_v43 = vld [vmem:[#allocation35_spill] sm:$0xff]  ;;  %vm526_vm9 = vcmp.eq.s32.totalorder %v6939_v19, 1  ;;  %v4481_v4 = vadd.f32 %v1643_v58, %v1642_v3  ;;  %v6948_v3 = vld [vmem:[#allocation50_spill] sm:$0xff] }
 0x126   :  { %vm4445_vm15 = vmand %vm375_vm11, %vm6926_vm6  ;;  %vm372_vm11 = vcmp.eq.f32.partialorder %v6935_v43, %v3935_v49  ;;  %v2713_v11 = vsel %vm557_vm12, 1.0, %v6905_v54  ;;  %v2722_v51 = vsel %vm4363_vm10, 1.0, %v6905_v54  ;;  %vm6941_vm2 = vcmp.eq.s32.totalorder %v6930_v14, 1  ;;  %1210 = vadd.xlane.f32.xlu0 %v1209_v56  ;;  %v6949_v36 = vld [vmem:[#allocation51_spill] sm:$0xff]  ;;  %v6950_v56 = vld [vmem:[#allocation46_spill] sm:$0xff] }
 0x127   :  { %6931 = vst [vmem:[#allocation41_spill] sm:$0xff] %v4452_v41  ;;  %vm4458_vm7 = vmand %vm380_vm14, %vm6932_vm13  ;;  %1258 = vadd.xlane.f32.xlu1 %v1257_v26  ;;  %1677 = vadd.xlane.f32.xlu2 %v1676_v2  ;;  %v2723_v1 = vsel %vm4445_vm15, 1.0, %v6905_v54  ;;  %vm370_vm8 = vcmp.eq.f32.partialorder %v6942_v37, %v3935_v49  ;;  %v1624_v63 = vmul.f32 %v2722_v51, %v6946_v31  ;;  %v6951_v2 = vld [vmem:[#allocation47_spill] sm:$0xff]  ;;  %v2745_v31 = vsel %vm4087_vm1, 1.0, %v6905_v54 }
 0x128   :  { %vm6936_vm6 = vmmov %vm6932_vm13  ;;  %6940 = vst [vmem:[#allocation68_spill] sm:$0xff] %v4481_v4  ;;  %v1625_v22 = vmul.f32 %v2723_v1, %v6947_v0  ;;  %v1616_v58 = vmul.f32 %v2714_v6, %v6948_v3  ;;  %v1617_v10 = vmul.f32 %v2715_v24, %v6949_v36  ;;  %vm371_vm10 = vcmp.eq.f32.partialorder %v6942_v37, %v3943_v50  ;;  %v6952_v51 = vld [vmem:[#allocation43_spill] sm:$0xff] }
 0x129   :  { %vm4472_vm5 = vmand %vm381_vm3, %vm6936_vm6  ;;  %vm373_vm3 = vcmp.eq.f32.partialorder %v6935_v43, %v3943_v50  ;;  %v1614_v14 = vmul.f32 %v2712_v42, %v6950_v56  ;;  %v1615_v43 = vmul.f32 %v2713_v11, %v6951_v2  ;;  %v2728_v6 = vsel %vm4458_vm7, 1.0, %v6905_v54  ;;  %v6953_v42 = vld [vmem:[#allocation39_spill] sm:$0xff]  ;;  %v6954_v11 = vld [vmem:[#allocation65_spill] sm:$0xff] }
 0x12a   :  { %vm564_vm14 = vmand %vm372_vm11, %vm6941_vm2  ;;  %v2729_v24 = vsel %vm4472_vm5, 1.0, %v6905_v54  ;;  %vm386_vm6 = vcmp.eq.f32.partialorder %v6952_v51, %v3935_v49  ;;  %v1694_v1 = vadd.f32 %v1625_v22, %v1624_v63  ;;  %v1682_v37 = vadd.f32 %v1617_v10, %v1616_v58  ;;  %v6958_v22 = vld [vmem:[#allocation77_spill] sm:$0xff]  ;;  %v6962_v58 = vld [vmem:[#allocation58_spill] sm:$0xff] }
 0x12b   :  { %vm6943_vm12 = vmmov %vm6941_vm2  ;;  %v2720_v41 = vsel %vm564_vm14, 1.0, %v6905_v54  ;;  %vm534_vm2 = vcmp.eq.s32.totalorder %v6954_v11, 1  ;;  %v1679_v7 = vadd.f32 %v1615_v43, %v1614_v14  ;;  %v2744_v0 = vsel %vm4081_vm0, 1.0, %v6905_v54  ;;  %v6963_v14 = vld [vmem:[#allocation59_spill] sm:$0xff]  ;;  %v6964_v43 = vld [vmem:[#allocation86_spill] sm:$0xff] }
 0x12c   :  { %vm4497_vm13 = vmand %vm373_vm3, %vm6943_vm12  ;;  %vm376_vm3 = vcmp.eq.f32.partialorder %v6953_v42, %v3935_v49  ;;  %v1622_v15 = vmul.f32 %v2720_v41, %v6955_v16  ;;  %vm6956_vm5 = vnez %v6837_v35  ;;  %vm6957_vm7 = vnez %v6841_v34  ;;  %v6961_v41 = vld [vmem:[#allocation64_spill] sm:$0xff] }
 0x12d   :  { %vm562_vm15 = vmand %vm370_vm8, %vm526_vm9  ;;  %v2721_v19 = vsel %vm4497_vm13, 1.0, %v6905_v54  ;;  %v2742_v26 = vsel %vm6956_vm5, 1.0, %v6905_v54  ;;  %v2743_v63 = vsel %vm6957_vm7, 1.0, %v6905_v54  ;;  %vm6959_vm14 = vnez %v6817_v47 }
 0x12e   :  { %vm563_vm11 = vmand %vm371_vm10, %vm526_vm9  ;;  %v2718_v9 = vsel %vm562_vm15, 1.0, %v6905_v54  ;;  %vm529_vm9 = vcmp.eq.s32.totalorder %v6958_v22, 1  ;;  %v2752_v20 = vsel %vm6959_vm14, 1.0, %v6905_v54  ;;  %vm6960_vm0 = vnez %v6819_v60  ;;  %1680 = vadd.xlane.f32.xlu0 %v1679_v7  ;;  %v6968_v60 = vld [vmem:[#allocation48_spill] sm:$0xff] }
 0x12f   :  { %v2719_v59 = vsel %vm563_vm11, 1.0, %v6905_v54  ;;  %1695 = vadd.xlane.f32.xlu1 %v1694_v1  ;;  %1683 = vadd.xlane.f32.xlu2 %v1682_v37  ;;  %v2753_v8 = vsel %vm6960_vm0, 1.0, %v6905_v54  ;;  %v1623_v35 = vmul.f32 %v2721_v19, %v6961_v41  ;;  %v1620_v10 = vmul.f32 %v2718_v9, %v6962_v58  ;;  %v6965_v37 = vld [vmem:[#allocation87_spill] sm:$0xff]  ;;  %vm4560_vm1 = vmand %vm386_vm6, %vm534_vm2  ;;  %v6969_v19 = vld [vmem:[#allocation49_spill] sm:$0xff] }
 0x130   :  { %v1621_v34 = vmul.f32 %v2719_v59, %v6963_v14  ;;  %v1630_v1 = vmul.f32 %v2728_v6, %v6964_v43  ;;  %v1631_v4 = vmul.f32 %v2729_v24, %v6965_v37  ;;  %v1646_v7 = vmul.f32 %v2744_v0, %v6968_v60  ;;  %v6970_v9 = vld [vmem:[#allocation44_spill] sm:$0xff]  ;;  %v6971_v59 = vld [vmem:[#allocation45_spill] sm:$0xff]  ;;  %vm568_vm12 = vmand %vm376_vm3, %vm529_vm9 }
 0x131   :  { %v1647_v41 = vmul.f32 %v2745_v31, %v6969_v19  ;;  %v1644_v58 = vmul.f32 %v2742_v26, %v6970_v9  ;;  %v1645_v14 = vmul.f32 %v2743_v63, %v6971_v59  ;;  %vm377_vm8 = vcmp.eq.f32.partialorder %v6953_v42, %v3943_v50 }
 0x132   :  { %v1654_v6 = vmul.f32 %v2752_v20, %v3912_v52  ;;  %v1655_v24 = vmul.f32 %v2753_v8, %v3918_v13  ;;  %vm387_vm13 = vcmp.eq.f32.partialorder %v6952_v51, %v3943_v50  ;;  %vm569_vm10 = vmand %vm377_vm8, %vm529_vm9  ;;  %v1703_v26 = vadd.f32 %v1631_v4, %v1630_v1  ;;  %v4591_v51 = vpop.permute.xlu2 %517 }
 0x133   :  { %v4581_v31 = vadd.f32 %v1647_v41, %v1646_v7  ;;  %v4583_v0 = vadd.f32 %v1645_v14, %v1644_v58  ;;  %vm579_vm15 = vmand %vm387_vm13, %vm534_vm2  ;;  %v1691_v42 = vadd.f32 %v1623_v35, %v1622_v15  ;;  %v1688_v20 = vadd.f32 %v1621_v34, %v1620_v10  ;;  %6975 = vst [vmem:[#allocation50_spill] sm:$0xff] %v4591_v51  ;;  %v6976_v41 = vld [vmem:[#allocation83_spill] sm:$0xff]  ;;  %v6977_v35 = vld [vmem:[#allocation74_spill] sm:$0xff] }
 0x134   :  { %v4587_v63 = vadd.f32 %v1655_v24, %v1654_v6  ;;  %v2724_v8 = vsel %vm568_vm12, 1.0, %v6905_v54  ;;  %v2725_v37 = vsel %vm569_vm10, 1.0, %v6905_v54  ;;  %v2734_v22 = vsel %vm4560_vm1, 1.0, %v6905_v54  ;;  %v6978_v10 = vld [vmem:[#allocation75_spill] sm:$0xff]  ;;  %v6979_v34 = vld [vmem:[#allocation40_spill] sm:$0xff] }
 0x135   :  { %6972 = vst [vmem:[#allocation35_spill] sm:$0xff] %v4581_v31  ;;  %v2735_v11 = vsel %vm579_vm15, 1.0, %v6905_v54  ;;  %v1636_v15 = vmul.f32 %v2734_v22, %v4162_v38  ;;  %vm532_vm11 = vcmp.eq.s32.totalorder %v6976_v41, 1  ;;  %v1626_v58 = vmul.f32 %v2724_v8, %v6977_v35  ;;  %v6985_v41 = vld [vmem:[#allocation3_spill] sm:$0xff] }
 0x136   :  { %6973 = vst [vmem:[#allocation69_spill] sm:$0xff] %v4583_v0  ;;  %1689 = vadd.xlane.f32.xlu0 %v1688_v20  ;;  %v1637_v4 = vmul.f32 %v2735_v11, %v4177_v32  ;;  %v1627_v14 = vmul.f32 %v2725_v37, %v6978_v10  ;;  %vm382_vm6 = vcmp.eq.f32.partialorder %v6979_v34, %v3935_v49  ;;  %v6981_v11 = vld [vmem:[#allocation36_spill] sm:$0xff]  ;;  %vm6986_vm8 = vcmp.ge.f32.partialorder %v6985_v41, 0.0 }
 0x137   :  { %6974 = vst [vmem:[#allocation34_spill] sm:$0xff] %v4587_v63  ;;  %1704 = vadd.xlane.f32.xlu1 %v1703_v26  ;;  %1692 = vadd.xlane.f32.xlu2 %v1691_v42  ;;  %vm383_vm3 = vcmp.eq.f32.partialorder %v6979_v34, %v3943_v50  ;;  %vm574_vm2 = vmand %vm382_vm6, %vm532_vm11  ;;  %v6980_v26 = vld [vmem:[#allocation76_spill] sm:$0xff]  ;;  %vm378_vm9 = vcmp.eq.f32.partialorder %v6981_v11, %v3935_v49 }
 0x138   :  { %v1712_v1 = vadd.f32 %v1637_v4, %v1636_v15  ;;  %vm575_vm5 = vmand %vm383_vm3, %vm532_vm11  ;;  %v1697_v47 = vadd.f32 %v1627_v14, %v1626_v58  ;;  %vm530_vm7 = vcmp.eq.s32.totalorder %v6980_v26, 1  ;;  %v2730_v37 = vsel %vm574_vm2, 1.0, %v6905_v54  ;;  %v6982_v15 = vld [vmem:[#allocation2_spill] sm:$0xff]  ;;  %v6988_v14 = vld [vmem:[#allocation4_spill] sm:$0xff] }
 0x139   :  { %v2731_v42 = vsel %vm575_vm5, 1.0, %v6905_v54  ;;  %v1632_v8 = vmul.f32 %v2730_v37, %v4047_v30  ;;  %vm379_vm14 = vcmp.eq.f32.partialorder %v6981_v11, %v3943_v50  ;;  %vm570_vm0 = vmand %vm378_vm9, %vm530_vm7  ;;  %vm6983_vm1 = vcmp.ge.f32.partialorder %v6982_v15, 0.0  ;;  %v6997_v37 = vld [vmem:[#allocation5_spill] sm:$0xff]  ;;  %v7000_v11 = vld [vmem:[#allocation10_spill] sm:$0xff] }
 0x13a   :  { %v1633_v22 = vmul.f32 %v2731_v42, %v4055_v21  ;;  %v4626_v4 = vsel %vm6983_vm1, 1.0, %v6905_v54  ;;  %v4631_v58 = vsel %vm6986_vm8, 1.0, %v6905_v54  ;;  %vm6989_vm12 = vcmp.ge.f32.partialorder %v6988_v14, 0.0  ;;  %vm571_vm10 = vmand %vm379_vm14, %vm530_vm7  ;;  %v7003_v14 = vld [vmem:[#allocation8_spill] sm:$0xff] }
 0x13b   :  { %6984 = vst [vmem:[#allocation51_spill] sm:$0xff] %v4626_v4  ;;  %v4636_v34 = vsel %vm6989_vm12, 1.0, %v6905_v54  ;;  %vm6998_vm11 = vcmp.ge.f32.partialorder %v6997_v37, 0.0  ;;  %vm7001_vm6 = vcmp.ge.f32.partialorder %v7000_v11, 0.0  ;;  %vm7004_vm3 = vcmp.ge.f32.partialorder %v7003_v14, 0.0  ;;  %v7009_v37 = vld [vmem:[#allocation13_spill] sm:$0xff] }
 0x13c   :  { %6987 = vst [vmem:[#allocation46_spill] sm:$0xff] %v4631_v58  ;;  %v4653_v42 = vsel %vm6998_vm11, 1.0, %v6905_v54  ;;  %v4658_v15 = vsel %vm7001_vm6, 1.0, %v6905_v54  ;;  %v1706_v41 = vadd.f32 %v1633_v22, %v1632_v8  ;;  %v4663_v26 = vsel %vm7004_vm3, 1.0, %v6905_v54  ;;  %v7012_v22 = vld [vmem:[#allocation37_spill] sm:$0xff]  ;;  %v7013_v14 = vld [vmem:[#allocation82_spill] sm:$0xff] }
 0x13d   :  { %6990 = vst [vmem:[#allocation47_spill] sm:$0xff] %v4636_v34  ;;  %vm7010_vm5 = vcmp.ge.f32.partialorder %v7009_v37, 0.0  ;;  %v2726_v11 = vsel %vm570_vm0, 1.0, %v6905_v54  ;;  %v2727_v8 = vsel %vm571_vm10, 1.0, %v6905_v54  ;;  %vm384_vm7 = vcmp.eq.f32.partialorder %v7012_v22, %v3935_v49  ;;  %v7021_v4 = vld [vmem:[#allocation81_spill] sm:$0xff]  ;;  %v7025_v58 = vld [vmem:[#allocation62_spill] sm:$0xff] }
 0x13e   :  { %1698 = vadd.xlane.f32.xlu0 %v1697_v47  ;;  %6999 = vst [vmem:[#allocation65_spill] sm:$0xff] %v4653_v42  ;;  %v4673_v51 = vsel %vm7010_vm5, 1.0, %v6905_v54  ;;  %vm385_vm9 = vcmp.eq.f32.partialorder %v7012_v22, %v3943_v50  ;;  %vm533_vm14 = vcmp.eq.s32.totalorder %v7013_v14, 1  ;;  %vm7014_vm0 = vnez %v6850_v5  ;;  %v7020_v42 = vld [vmem:[#allocation88_spill] sm:$0xff] }
 0x13f   :  { %1713 = vadd.xlane.f32.xlu1 %v1712_v1  ;;  %v1169_v7 = vpop.xlane.xlu2 %1168  ;;  %v6991_v1 = vld [vmem:[#allocation7_spill] sm:$0xff]  ;;  %7002 = vst [vmem:[#allocation63_spill] sm:$0xff] %v4658_v15  ;;  %v2750_v21 = vsel %vm7014_vm0, 1.0, %v6905_v54  ;;  %vm7015_vm1 = vnez %v6852_v18  ;;  %vm7016_vm8 = vnez %v6855_v46  ;;  %v7019_v18 = vld [vmem:[#allocation80_spill] sm:$0xff]  ;;  %vm536_vm10 = vcmp.eq.s32.totalorder %v7020_v42, 1  ;;  %vm4732_vm11 = vmand %vm385_vm9, %vm533_vm14 }
 0x140   :  { %v4606_v6 = vmax.f32 %v1169_v7, 1e-24  ;;  %v1166_v24 = vpop.xlane.xlu1 %1165  ;;  %vm6992_vm13 = vcmp.ge.f32.partialorder %v6991_v1, 0.0  ;;  %v6994_v7 = vld [vmem:[#allocation6_spill] sm:$0xff]  ;;  %7005 = vst [vmem:[#allocation77_spill] sm:$0xff] %v4663_v26  ;;  %v7006_v1 = vld [vmem:[#allocation9_spill] sm:$0xff]  ;;  %v1628_v43 = vmul.f32 %v2726_v11, %v7019_v18  ;;  %v1629_v10 = vmul.f32 %v2727_v8, %v7021_v4 }
 0x141   :  { %v4611_v20 = vmax.f32 %v1166_v24, 1e-24  ;;  %v4641_v47 = vsel %vm6992_vm13, 1.0, %v6905_v54  ;;  %vm6995_vm15 = vcmp.ge.f32.partialorder %v6994_v7, 0.0  ;;  %vm7007_vm2 = vcmp.ge.f32.partialorder %v7006_v1, 0.0  ;;  %7011 = vst [vmem:[#allocation49_spill] sm:$0xff] %v4673_v51 }
 0x142   :  { %2959 = vrsqrt.f32 %v4606_v6  ;;  %6993 = vst [vmem:[#allocation43_spill] sm:$0xff] %v4641_v47  ;;  %v4648_v24 = vsel %vm6995_vm15, 1.0, %v6905_v54  ;;  %v4668_v7 = vsel %vm7007_vm2, 1.0, %v6905_v54  ;;  %v2751_v30 = vsel %vm7015_vm1, 1.0, %v6905_v54  ;;  %vm4719_vm15 = vmand %vm384_vm7, %vm533_vm14  ;;  %v7024_v11 = vld [vmem:[#allocation61_spill] sm:$0xff]  ;;  %v7041_v47 = vld [vmem:[#allocation12_spill] sm:$0xff] }
 0x143   :  { %2961 = vrsqrt.f32 %v4611_v20  ;;  %6996 = vst [vmem:[#allocation39_spill] sm:$0xff] %v4648_v24  ;;  %v2748_v32 = vsel %vm7016_vm8, 1.0, %v6905_v54  ;;  %vm7018_vm13 = vnez %v6859_v61  ;;  %v1652_v35 = vmul.f32 %v2750_v21, %v7024_v11  ;;  %v7029_v4 = vld [vmem:[#allocation89_spill] sm:$0xff] }
 0x144   :  { %7008 = vst [vmem:[#allocation48_spill] sm:$0xff] %v4668_v7  ;;  %v7017_v7 = vld [vmem:[#allocation38_spill] sm:$0xff]  ;;  %v2749_v5 = vsel %vm7018_vm13, 1.0, %v6905_v54  ;;  %v1653_v18 = vmul.f32 %v2751_v30, %v7025_v58  ;;  %vm535_vm6 = vcmp.eq.s32.totalorder %v7029_v4, 1  ;;  %v7031_v30 = vld [vmem:[#allocation11_spill] sm:$0xff]  ;;  %vm7042_vm0 = vcmp.ge.f32.partialorder %v7041_v47, 0.0 }
 0x145   :  { %vm390_vm12 = vcmp.eq.f32.partialorder %v7017_v7, %v3935_v49  ;;  %vm7032_vm3 = vcmp.ge.f32.partialorder %v7031_v30, 0.0  ;;  %vm391_vm2 = vcmp.eq.f32.partialorder %v7017_v7, %v3943_v50  ;;  %v7039_v30 = vld [vmem:[#allocation42_spill] sm:$0xff]  ;;  %v2732_v47 = vsel %vm4719_vm15, 1.0, %v6905_v54 }
 0x146   :  { %1707 = vadd.xlane.f32.xlu0 %v1706_v41  ;;  %vm4751_vm5 = vmand %vm390_vm12, %vm536_vm10  ;;  %vm388_vm9 = vcmp.eq.f32.partialorder %v7039_v30, %v3935_v49  ;;  %vm389_vm8 = vcmp.eq.f32.partialorder %v7039_v30, %v3943_v50  ;;  %v7051_v4 = vld [vmem:[#allocation94_spill] sm:$0xff] }
 0x147   :  { %v4684_v1 = vpop.xlane.xlu2 %1174  ;;  %vm4759_vm7 = vmand %vm391_vm2, %vm536_vm10  ;;  %vm1308_vm10 = vweird.f32 %v4606_v6  ;;  %v4805_v61 = vsel %vm4751_vm5, 1.0, %v6905_v54  ;;  %vm7052_vm15 = vnez %v7051_v4  ;;  %v7055_v4 = vld [vmem:[#allocation97_spill] sm:$0xff]  ;;  %vm1298_vm5 = vweird.f32 %v4611_v20 }
 0x148   :  { %v4676_v63 = vpop.eup %2959  ;;  %v4686_v37 = vpop.xlane.xlu1 %1177  ;;  %vm4782_vm12 = vmand %vm388_vm9, %vm535_vm6  ;;  %v2758_v50 = vsel %vm7052_vm15, 1.0, %v6905_v54  ;;  %v1634_v49 = vmul.f32 %v2732_v47, %v7055_v4  ;;  %v7058_v47 = vld [vmem:[#allocation85_spill] sm:$0xff]  ;;  %vm7064_vm9 = vnez %v6862_v45  ;;  %v7068_v45 = vld [vmem:[#allocation102_spill] sm:$0xff] }
 0x149   :  { %v4688_v26 = vpop.eup %2961  ;;  %v1303_v41 = vmul.f32 %v4676_v63, %v4606_v6  ;;  %v1172_v38 = vpop.xlane.xlu0 %1171  ;;  %vm1309_vm14 = vweird.f32 %v4676_v63  ;;  %vm4791_vm13 = vmand %vm389_vm8, %vm535_vm6  ;;  %vm7053_vm6 = vnez %v6830_v23 }
 0x14a   :  { %v1293_v51 = vmul.f32 %v4688_v26, %v4611_v20  ;;  %v4711_v0 = vmax.f32 %v1172_v38, 1e-24  ;;  %v2759_v6 = vsel %vm7053_vm6, 1.0, %v6905_v54 }
 0x14b   :  { %v1304_v46 = vmul.f32 %v4676_v63, %v1303_v41  ;;  %v7026_v41 = vld [vmem:[#allocation56_spill] sm:$0xff] }
 0x14c   :  { %v1294_v31 = vmul.f32 %v4688_v26, %v1293_v51  ;;  %v1650_v38 = vmul.f32 %v2748_v32, %v7026_v41  ;;  %2963 = vrsqrt.f32 %v4711_v0  ;;  %v7030_v51 = vld [vmem:[#allocation57_spill] sm:$0xff]  ;;  %v4742_v32 = vsel %vm7032_vm3, 1.0, %v6905_v54  ;;  %vm1310_vm3 = vmor %vm1308_vm10, %vm1309_vm14 }
 0x14d   :  { %v1305_v15 = vmul.f32 0.5, %v1304_v46  ;;  %v1651_v21 = vmul.f32 %v2749_v5, %v7030_v51  ;;  %7033 = vst [vmem:[#allocation44_spill] sm:$0xff] %v4742_v32  ;;  %v4755_v46 = vadd.f32 %v1653_v18, %v1652_v35  ;;  %v7044_v35 = vld [vmem:[#allocation16_spill] sm:$0xff]  ;;  %vm7077_vm10 = vnez %v6887_v40 }
 0x14e   :  { %v1295_v14 = vmul.f32 0.5, %v1294_v31  ;;  %v4771_v31 = vsel %vm7042_vm0, 1.0, %v6905_v54  ;;  %vm7045_vm1 = vcmp.ge.f32.partialorder %v7044_v35, 0.0  ;;  %v4797_v35 = vadd.f32 %v1629_v10, %v1628_v43 }
 0x14f   :  { %7036 = vst [vmem:[#allocation45_spill] sm:$0xff] %v4755_v46  ;;  %v1306_v32 = vsub.f32 1.5, %v1305_v15  ;;  %v4766_v7 = vadd.f32 %v1651_v21, %v1650_v38  ;;  %v4776_v42 = vsel %vm7045_vm1, 1.0, %v6905_v54  ;;  %v1181_v43 = vpop.xlane.xlu2 %1180  ;;  %v4844_v15 = vmax.f32 %v4684_v1, 1e-24 }
 0x150   :  { %7043 = vst [vmem:[#allocation40_spill] sm:$0xff] %v4771_v31  ;;  %v1296_v18 = vsub.f32 1.5, %v1295_v14  ;;  %v2733_v14 = vsel %vm4732_vm11, 1.0, %v6905_v54  ;;  %vm1299_vm11 = vweird.f32 %v4688_v26  ;;  %v2756_v1 = vsel %vm7064_vm9, 1.0, %v6905_v54 }
 0x151   :  { %7040 = vst [vmem:[#allocation83_spill] sm:$0xff] %v4766_v7  ;;  %v1307_v21 = vmul.f32 %v4676_v63, %v1306_v32  ;;  %v1184_v30 = vpop.xlane.xlu0 %1183  ;;  %v4820_v32 = vsel %vm4759_vm7, 1.0, %v6905_v54  ;;  %v1635_v23 = vmul.f32 %v2733_v14, %v4119_v44  ;;  %v2736_v7 = vsel %vm4782_vm12, 1.0, %v6905_v54  ;;  %vm1300_vm14 = vmor %vm1298_vm5, %vm1299_vm11 }
 0x152   :  { %7046 = vst [vmem:[#allocation76_spill] sm:$0xff] %v4776_v42  ;;  %v1187_v10 = vpop.xlane.xlu1 %1186  ;;  %v4815_v8 = vpop.eup %2963  ;;  %v1297_v46 = vmul.f32 %v4688_v26, %v1296_v18  ;;  %v4841_v14 = vmul.f32 %v2759_v6, %v7058_v47  ;;  %v7060_v18 = vld [vmem:[#allocation99_spill] sm:$0xff]  ;;  %v4851_v42 = vmax.f32 %v4686_v37, 1e-24  ;;  %vm7065_vm0 = vnez %v6864_v27 }
 0x153   :  { %v4823_v22 = vsel %vm1310_vm3, %v4676_v63, %v1307_v21  ;;  %v1313_v5 = vmul.f32 %v4815_v8, %v4711_v0  ;;  %v2737_v63 = vsel %vm4791_vm13, 1.0, %v6905_v54  ;;  %v7056_v21 = vld [vmem:[#allocation84_spill] sm:$0xff]  ;;  %vm7061_vm2 = vnez %v7060_v18 }
 0x154   :  { %7054 = vst [vmem:[#allocation36_spill] sm:$0xff] %v4823_v22  ;;  %v4838_v31 = vmul.f32 %v2758_v50, %v7056_v21  ;;  %v2764_v44 = vsel %vm7061_vm2, 1.0, %v6905_v54  ;;  %v1975_v38 = vmul.f32 %v4823_v22, %v6950_v56  ;;  %v7062_v50 = vld [vmem:[#allocation100_spill] sm:$0xff]  ;;  %v4863_v18 = vadd.f32 %v1635_v23, %v1634_v49  ;;  %v7098_v21 = vld [vmem:[#allocation114_spill] sm:$0xff] }
 0x155   :  { %7059 = vst [vmem:[#allocation3_spill] sm:$0xff] %v4841_v14  ;;  %vm7063_vm7 = vnez %v7062_v50  ;;  %v4861_v14 = vmax.f32 %v1181_v43, 1e-24  ;;  %v2757_v20 = vsel %vm7065_vm0, 1.0, %v6905_v54  ;;  %v4869_v37 = vsel %vm1300_vm14, %v4688_v26, %v1297_v46  ;;  %v7070_v43 = vld [vmem:[#allocation78_spill] sm:$0xff] }
 0x156   :  { %7057 = vst [vmem:[#allocation2_spill] sm:$0xff] %v4838_v31  ;;  %v2765_v6 = vsel %vm7063_vm7, 1.0, %v6905_v54  ;;  %v1314_v56 = vmul.f32 %v4815_v8, %v1313_v5  ;;  %v4872_v50 = vmax.f32 %v1184_v30, 1e-24  ;;  %v4875_v31 = vmul.f32 %v2764_v44, %v4153_v48  ;;  %v7072_v5 = vld [vmem:[#allocation79_spill] sm:$0xff] }
 0x157   :  { %7066 = vst [vmem:[#allocation4_spill] sm:$0xff] %v4869_v37  ;;  %v4878_v4 = vmul.f32 %v2765_v6, %v7068_v45  ;;  %2965 = vrsqrt.f32 %v4844_v15  ;;  %v1976_v27 = vmul.f32 %v4823_v22, %v6951_v2  ;;  %v4884_v23 = vmul.f32 %v2756_v1, %v7070_v43 }
 0x158   :  { %7067 = vst [vmem:[#allocation7_spill] sm:$0xff] %v4875_v31  ;;  %2967 = vrsqrt.f32 %v4851_v42  ;;  %v2041_v44 = vmul.f32 1.442695, %v1975_v38  ;;  %v4892_v6 = vmul.f32 %v2757_v20, %v7072_v5  ;;  %vm7074_vm1 = vnez %v6878_v57 }
 0x159   :  { %7069 = vst [vmem:[#allocation6_spill] sm:$0xff] %v4878_v4  ;;  %v1220_v49 = vpop.xlane.xlu0 %1219  ;;  %v2762_v4 = vsel %vm7074_vm1, 1.0, %v6905_v54  ;;  %2969 = vrsqrt.f32 %v4861_v14  ;;  %v1973_v2 = vmul.f32 %v4869_v37, %v3809_v53  ;;  %v1315_v1 = vmul.f32 0.5, %v1314_v56 }
 0x15a   :  { %7071 = vst [vmem:[#allocation5_spill] sm:$0xff] %v4884_v23  ;;  %v4887_v26 = vmax.f32 %v1220_v49, 1e-24  ;;  %v1214_v46 = vpop.xlane.xlu1 %1213  ;;  %v4889_v30 = vpop.xlane.xlu2 %1189  ;;  %2971 = vrsqrt.f32 %v4872_v50  ;;  %v3279_v49 = vld [vmem:[%s6446_s3] sm:$0x3]  ;;  %v1974_v38 = vmul.f32 %v4869_v37, %v3814_v55  ;;  %vm7075_vm12 = vnez %v6880_v25 }
 0x15b   :  { %7073 = vst [vmem:[#allocation10_spill] sm:$0xff] %v4892_v6  ;;  %vm194_vm8 = vcmp.ge.f32.partialorder %v3279_v49, 0.0  ;;  %v2763_v57 = vsel %vm7075_vm12, 1.0, %v6905_v54  ;;  %vm7076_vm13 = vnez %v6883_v29  ;;  %v2043_v53 = vmul.f32 1.442695, %v1976_v27  ;;  %v7078_v25 = vld [vmem:[#allocation106_spill] sm:$0xff] }
 0x15c   :  { %v2760_v20 = vsel %vm7076_vm13, 1.0, %v6905_v54  ;;  %2973 = vrsqrt.f32 %v4887_v26  ;;  %v2761_v56 = vsel %vm7077_vm10, 1.0, %v6905_v54  ;;  %v1638_v49 = vmul.f32 %v2736_v7, %v4216_v39  ;;  %v7081_v29 = vld [vmem:[#allocation109_spill] sm:$0xff]  ;;  %v7084_v7 = vld [vmem:[#allocation95_spill] sm:$0xff] }
 0x15d   :  { %2975 = vpow2.f32 %v2041_v44  ;;  %v1639_v55 = vmul.f32 %v2737_v63, %v4223_v28  ;;  %v4918_v31 = vpop.eup %2965  ;;  %vm7079_vm15 = vnez %v7078_v25  ;;  %vm7082_vm6 = vnez %v7081_v29  ;;  %v7088_v29 = vld [vmem:[#allocation90_spill] sm:$0xff] }
 0x15e   :  { %v4923_v45 = vsel %vm7079_vm15, 1.0, %v6905_v54  ;;  %v4928_v27 = vsel %vm7082_vm6, 1.0, %v6905_v54  ;;  %v2709_v40 = vsel %vm194_vm8, 1.0, %v6905_v54  ;;  %v2037_v48 = vmul.f32 1.442695, %v1973_v2  ;;  %v4931_v44 = vpop.eup %2967 }
 0x15f   :  { %7080 = vst [vmem:[#allocation8_spill] sm:$0xff] %v4923_v45  ;;  %v4934_v6 = vmul.f32 %v2762_v4, %v7084_v7  ;;  %v1316_v63 = vsub.f32 1.5, %v1315_v1  ;;  %v4936_v23 = vmax.f32 %v1187_v10, 1e-24  ;;  %v2039_v28 = vmul.f32 1.442695, %v1974_v38  ;;  %v4938_v25 = vpop.eup %2969 }
 0x160   :  { %7083 = vst [vmem:[#allocation9_spill] sm:$0xff] %v4928_v27  ;;  %v7086_v45 = vld [vmem:[#allocation96_spill] sm:$0xff]  ;;  %v4944_v5 = vmul.f32 %v2760_v20, %v7088_v29  ;;  %v7090_v27 = vld [vmem:[#allocation91_spill] sm:$0xff]  ;;  %2977 = vpow2.f32 %v2043_v53  ;;  %v4949_v2 = vpop.eup %2971  ;;  %v2768_v10 = vsel %vm4305_vm4, 1.0, %v6905_v54  ;;  %v4954_v38 = vperm.slane %v2709_v40, 0 }
 0x161   :  { %7085 = vst [vmem:[#allocation13_spill] sm:$0xff] %v4934_v6  ;;  %v4941_v39 = vmul.f32 %v2763_v57, %v7086_v45  ;;  %v4947_v43 = vmul.f32 %v2761_v56, %v7090_v27  ;;  %2979 = vpow2.f32 %v2037_v48  ;;  %v4956_v57 = vadd.f32 %v1639_v55, %v1638_v49 }
 0x162   :  { %7089 = vst [vmem:[#allocation82_spill] sm:$0xff] %v4944_v5  ;;  %v1223_v4 = vpop.xlane.xlu1 %1222  ;;  %v1217_v1 = vpop.xlane.xlu2 %1216  ;;  %v1323_v20 = vmul.f32 %v4918_v31, %v4844_v15  ;;  %v1333_v53 = vmul.f32 %v4931_v44, %v4851_v42  ;;  %v4964_v56 = vmax.f32 %v1214_v46, 1e-24  ;;  %2981 = vpow2.f32 %v2039_v28  ;;  %v7094_v28 = vld [vmem:[#allocation116_spill] sm:$0xff] }
 0x163   :  { %7087 = vst [vmem:[#allocation37_spill] sm:$0xff] %v4941_v39  ;;  %v4958_v39 = vpop.eup %2973  ;;  %vm1319_vm4 = vweird.f32 %v4815_v8  ;;  %2983 = vrsqrt.f32 %v4936_v23  ;;  %v1193_v49 = vpop.xlane.xlu0 %1192  ;;  %vm7092_vm3 = vnez %v6897_v17  ;;  %v4975_v5 = vmul.f32 %v2768_v10, %v4256_v33  ;;  %v7097_v33 = vld [vmem:[#allocation113_spill] sm:$0xff] }
 0x164   :  { %7091 = vst [vmem:[#allocation38_spill] sm:$0xff] %v4947_v43  ;;  %v2976_v12 = vpop.eup %2975  ;;  %v1317_v43 = vmul.f32 %v4815_v8, %v1316_v63  ;;  %v1473_v48 = vmul.f32 %v4958_v39, %v4887_v26  ;;  %v2769_v55 = vsel %vm7092_vm3, 1.0, %v6905_v54  ;;  %vm7095_vm11 = vnez %v7094_v28 }
 0x165   :  { %7093 = vst [vmem:[#allocation88_spill] sm:$0xff] %v4975_v5  ;;  %v2766_v46 = vsel %vm7095_vm11, 1.0, %v6905_v54  ;;  %v4980_v63 = vperm.slane %v2709_v40, 1  ;;  %vm7096_vm2 = vnez %v6904_v62  ;;  %vm1318_vm5 = vweird.f32 %v4711_v0 }
 0x166   :  { %v2767_v6 = vsel %vm7096_vm2, 1.0, %v6905_v54  ;;  %v1343_v27 = vmul.f32 %v4938_v25, %v4861_v14  ;;  %v1353_v17 = vmul.f32 %v4949_v2, %v4872_v50  ;;  %v2978_v10 = vpop.eup %2977  ;;  %vm1320_vm7 = vmor %vm1318_vm5, %vm1319_vm4  ;;  %v1474_v5 = vmul.f32 %v4958_v39, %v1473_v48 }
 0x167   :  { %2985 = vrsqrt.f32 %v4964_v56  ;;  %v4993_v40 = vmax.f32 %v4889_v30, 1e-24  ;;  %v2172_v62 = vmul.f32 %v2976_v12, %v4954_v38  ;;  %v2980_v28 = vpop.eup %2979  ;;  %v1324_v0 = vmul.f32 %v4918_v31, %v1323_v20 }
 0x168   :  { %v4998_v54 = vsel %vm1320_vm7, %v4815_v8, %v1317_v43  ;;  %v1334_v29 = vmul.f32 %v4931_v44, %v1333_v53  ;;  %v1640_v45 = vmul.f32 %v4805_v61, %v7097_v33  ;;  %v2982_v7 = vpop.eup %2981  ;;  %v5003_v48 = vmax.f32 %v1223_v4, 1e-24 }
 0x169   :  { %v2173_v47 = vmul.f32 %v2978_v10, %v4980_v63  ;;  %v2170_v30 = vmul.f32 %v2980_v28, %v4954_v38  ;;  %v1641_v12 = vmul.f32 %v4820_v32, %v7098_v21  ;;  %v5009_v22 = vpop.eup %2983  ;;  %v1344_v8 = vmul.f32 %v4938_v25, %v1343_v27  ;;  %v7099_v28 = vld [vmem:[#allocation112_spill] sm:$0xff]  ;;  %v7101_v27 = vld [vmem:[#allocation105_spill] sm:$0xff] }
 0x16a   :  { %v1354_v43 = vmul.f32 %v4949_v2, %v1353_v17  ;;  %v5013_v20 = vmax.f32 %v1217_v1, 1e-24  ;;  %v2171_v61 = vmul.f32 %v2982_v7, %v4980_v63  ;;  %v1226_v53 = vpop.xlane.xlu2 %1225  ;;  %v5016_v4 = vpop.xlane.xlu1 %1195  ;;  %v1475_v33 = vmul.f32 0.5, %v1474_v5 }
 0x16b   :  { %2987 = vrsqrt.f32 %v4993_v40  ;;  %v2237_v10 = vadd.f32 %v2173_v47, %v2172_v62  ;;  %v1977_v32 = vmul.f32 %v4998_v54, %v6948_v3  ;;  %v5022_v21 = vmul.f32 %v2769_v55, %v7099_v28  ;;  %v7103_v3 = vld [vmem:[#allocation107_spill] sm:$0xff] }
 0x16c   :  { %v5025_v34 = vmul.f32 %v2766_v46, %v7101_v27  ;;  %v1325_v1 = vmul.f32 0.5, %v1324_v0  ;;  %v1335_v17 = vmul.f32 0.5, %v1334_v29  ;;  %v1363_v7 = vmul.f32 %v5009_v22, %v4936_v23  ;;  %v1229_v46 = vpop.xlane.xlu0 %1228 }
 0x16d   :  { %7100 = vst [vmem:[#allocation61_spill] sm:$0xff] %v5022_v21  ;;  %v5027_v37 = vpop.eup %2985  ;;  %2989 = vrsqrt.f32 %v5003_v48  ;;  %2238 = vadd.xlane.f32.xlu0 %v2237_v10  ;;  %v2234_v47 = vadd.f32 %v2171_v61, %v2170_v30  ;;  %v5032_v5 = vmax.f32 %v1226_v53, 1e-24  ;;  %v5035_v62 = vmul.f32 %v2767_v6, %v7103_v3 }
 0x16e   :  { %7102 = vst [vmem:[#allocation62_spill] sm:$0xff] %v5025_v34  ;;  %v1345_v55 = vmul.f32 0.5, %v1344_v8  ;;  %v1355_v21 = vmul.f32 0.5, %v1354_v43  ;;  %2991 = vrsqrt.f32 %v5013_v20  ;;  %v1476_v29 = vsub.f32 1.5, %v1475_v33 }
 0x16f   :  { %7104 = vst [vmem:[#allocation56_spill] sm:$0xff] %v5035_v62  ;;  %2235 = vadd.xlane.f32.xlu2 %v2234_v47  ;;  %v1978_v0 = vmul.f32 %v4998_v54, %v6949_v36  ;;  %v2045_v34 = vmul.f32 1.442695, %v1977_v32  ;;  %v5040_v28 = vadd.f32 %v1641_v12, %v1640_v45  ;;  %v1326_v10 = vsub.f32 1.5, %v1325_v1  ;;  %v7111_v62 = vld [vmem:[#allocation53_spill] sm:$0xff] }
 0x170   :  { %vm1328_vm9 = vweird.f32 %v4844_v15  ;;  %v1453_v6 = vmul.f32 %v5027_v37, %v4964_v56  ;;  %v5045_v30 = vmax.f32 %v1193_v49, 1e-24  ;;  %v1336_v43 = vsub.f32 1.5, %v1335_v17 }
 0x171   :  { %v5047_v8 = vpop.eup %2987  ;;  %vm1338_vm14 = vweird.f32 %v4851_v42  ;;  %v1364_v33 = vmul.f32 %v5009_v22, %v1363_v7  ;;  %2993 = vrsqrt.f32 %v5032_v5  ;;  %vm1329_vm0 = vweird.f32 %v4918_v31 }
 0x172   :  { %vm1339_vm1 = vweird.f32 %v4931_v44  ;;  %v1346_v36 = vsub.f32 1.5, %v1345_v55  ;;  %v1356_v45 = vsub.f32 1.5, %v1355_v21  ;;  %v1477_v49 = vmul.f32 %v4958_v39, %v1476_v29  ;;  %v1232_v53 = vpop.xlane.xlu1 %1231  ;;  %vm1330_vm6 = vmor %vm1328_vm9, %vm1329_vm0 }
 0x173   :  { %v5054_v12 = vpop.eup %2989  ;;  %vm1479_vm8 = vweird.f32 %v4958_v39  ;;  %2995 = vpow2.f32 %v2045_v34  ;;  %v2047_v61 = vmul.f32 1.442695, %v1978_v0  ;;  %v1327_v1 = vmul.f32 %v4918_v31, %v1326_v10  ;;  %v1199_v34 = vpop.xlane.xlu2 %1198  ;;  %vm1340_vm4 = vmor %vm1338_vm14, %vm1339_vm1 }
 0x174   :  { %v5058_v32 = vpop.eup %2991  ;;  %v1454_v17 = vmul.f32 %v5027_v37, %v1453_v6  ;;  %v1373_v7 = vmul.f32 %v5047_v8, %v4993_v40  ;;  %2997 = vrsqrt.f32 %v5045_v30  ;;  %v1337_v21 = vmul.f32 %v4931_v44, %v1336_v43 }
 0x175   :  { %v1365_v47 = vmul.f32 0.5, %v1364_v33  ;;  %vm1478_vm12 = vweird.f32 %v4887_v26  ;;  %2999 = vpow2.f32 %v2047_v61  ;;  %v1347_v55 = vmul.f32 %v4938_v25, %v1346_v36  ;;  %v1238_v33 = vpop.xlane.xlu0 %1237 }
 0x176   :  { %vm1349_vm13 = vweird.f32 %v4938_v25  ;;  %vm1359_vm10 = vweird.f32 %v4949_v2  ;;  %vm1480_vm15 = vmor %vm1478_vm12, %vm1479_vm8  ;;  %v1483_v29 = vmul.f32 %v5054_v12, %v5003_v48  ;;  %v1357_v26 = vmul.f32 %v4949_v2, %v1356_v45 }
 0x177   :  { %v5074_v0 = vpop.eup %2993  ;;  %v5082_v10 = vsel %vm1480_vm15, %v4958_v39, %v1477_v49  ;;  %v1463_v6 = vmul.f32 %v5058_v32, %v5013_v20  ;;  %v5087_v43 = vmax.f32 %v5016_v4, 1e-24  ;;  %1701 = vadd.xlane.f32.xlu2 %v4797_v35  ;;  %vm1348_vm3 = vweird.f32 %v4861_v14  ;;  %v7108_v49 = vld [vmem:[#allocation52_spill] sm:$0xff] }
 0x178   :  { %7105 = vst [vmem:[#allocation89_spill] sm:$0xff] %v5082_v10  ;;  %vm1358_vm11 = vweird.f32 %v4872_v50  ;;  %v1455_v15 = vmul.f32 0.5, %v1454_v17  ;;  %v1374_v39 = vmul.f32 %v5047_v8, %v1373_v7  ;;  %v5098_v45 = vsel %vm1330_vm6, %v4918_v31, %v1327_v1  ;;  %vm1350_vm2 = vmor %vm1348_vm3, %vm1349_vm13 }
 0x179   :  { %7106 = vst [vmem:[#allocation57_spill] sm:$0xff] %v5087_v43  ;;  %v2996_v36 = vpop.eup %2995  ;;  %v5101_v4 = vsel %vm1340_vm4, %v4931_v44, %v1337_v21  ;;  %v1366_v42 = vsub.f32 1.5, %v1365_v47  ;;  %v5105_v35 = vmax.f32 %v1229_v46, 1e-24  ;;  %vm1360_vm5 = vmor %vm1358_vm11, %vm1359_vm10  ;;  %vm1458_vm7 = vweird.f32 %v4964_v56  ;;  %v7116_v56 = vld [vmem:[#allocation55_spill] sm:$0xff] }
 0x17a   :  { %7107 = vst [vmem:[#allocation11_spill] sm:$0xff] %v5101_v4  ;;  %v5107_v14 = vpop.eup %2997  ;;  %v1484_v50 = vmul.f32 %v5054_v12, %v1483_v29  ;;  %v1493_v31 = vmul.f32 %v5074_v0, %v5032_v5  ;;  %v2174_v44 = vmul.f32 %v2996_v36, %v4954_v38  ;;  %v2009_v61 = vmul.f32 %v5082_v10, %v7108_v49 }
 0x17b   :  { %v3000_v1 = vpop.eup %2999  ;;  %v5119_v46 = vsel %vm1350_vm2, %v4938_v25, %v1347_v55  ;;  %v5122_v17 = vsel %vm1360_vm5, %v4949_v2, %v1357_v26  ;;  %vm1369_vm9 = vweird.f32 %v5009_v22  ;;  %v1464_v7 = vmul.f32 %v5058_v32, %v1463_v6  ;;  %v1241_v55 = vpop.xlane.xlu1 %1240 }
 0x17c   :  { %7109 = vst [vmem:[#allocation42_spill] sm:$0xff] %v5119_v46  ;;  %3001 = vrsqrt.f32 %v5087_v43  ;;  %v1456_v21 = vsub.f32 1.5, %v1455_v15  ;;  %v1375_v47 = vmul.f32 0.5, %v1374_v39  ;;  %v2175_v29 = vmul.f32 %v3000_v1, %v4980_v63  ;;  %v1235_v1 = vpop.xlane.xlu2 %1234 }
 0x17d   :  { %7110 = vst [vmem:[#allocation12_spill] sm:$0xff] %v5122_v17  ;;  %v5128_v36 = vmax.f32 %v1232_v53, 1e-24  ;;  %v1367_v49 = vmul.f32 %v5009_v22, %v1366_v42  ;;  %vm1368_vm14 = vweird.f32 %v4936_v23  ;;  %v1383_v25 = vmul.f32 %v5107_v14, %v5045_v30 }
 0x17e   :  { %3003 = vrsqrt.f32 %v5105_v35  ;;  %v5135_v2 = vmax.f32 %v1238_v33, 1e-24  ;;  %vm1378_vm0 = vweird.f32 %v4993_v40  ;;  %v1485_v26 = vmul.f32 0.5, %v1484_v50  ;;  %vm1370_vm6 = vmor %vm1368_vm14, %vm1369_vm9 }
 0x17f   :  { %v1494_v6 = vmul.f32 %v5074_v0, %v1493_v31  ;;  %v2240_v15 = vadd.f32 %v2175_v29, %v2174_v44  ;;  %v2109_v53 = vmul.f32 1.442695, %v2009_v61  ;;  %vm1459_vm1 = vweird.f32 %v5027_v37  ;;  %1710 = vadd.xlane.f32.xlu2 %v4863_v18  ;;  %v1202_v61 = vpop.xlane.xlu0 %1201  ;;  %v7113_v29 = vld [vmem:[#allocation54_spill] sm:$0xff] }
 0x180   :  { %v1465_v39 = vmul.f32 0.5, %v1464_v7  ;;  %v5140_v42 = vmax.f32 %v1199_v34, 1e-24  ;;  %v2010_v33 = vmul.f32 %v5082_v10, %v7111_v62  ;;  %v1457_v3 = vmul.f32 %v5027_v37, %v1456_v21  ;;  %vm1460_vm15 = vmor %vm1458_vm7, %vm1459_vm1 }
 0x181   :  { %v1376_v27 = vsub.f32 1.5, %v1375_v47  ;;  %vm1488_vm8 = vweird.f32 %v5003_v48  ;;  %2241 = vadd.xlane.f32.xlu1 %v2240_v15  ;;  %3005 = vrsqrt.f32 %v5128_v36  ;;  %v5148_v50 = vmax.f32 %v1241_v55, 1e-24 }
 0x182   :  { %v5150_v31 = vpop.eup %3001  ;;  %vm1379_vm12 = vweird.f32 %v5047_v8  ;;  %vm1489_vm13 = vweird.f32 %v5054_v12  ;;  %vm1468_vm10 = vweird.f32 %v5013_v20  ;;  %v1384_v18 = vmul.f32 %v5107_v14, %v1383_v25 }
 0x183   :  { %7112 = vst [vmem:[#allocation16_spill] sm:$0xff] %v5150_v31  ;;  %3007 = vrsqrt.f32 %v5135_v2  ;;  %v1486_v62 = vsub.f32 1.5, %v1485_v26  ;;  %v1495_v34 = vmul.f32 0.5, %v1494_v6  ;;  %v5157_v44 = vmax.f32 %v1235_v1, 1e-24  ;;  %vm1380_vm3 = vmor %vm1378_vm0, %vm1379_vm12 }
 0x184   :  { %3009 = vpow2.f32 %v2109_v53  ;;  %v5159_v7 = vpop.eup %3003  ;;  %v1466_v21 = vsub.f32 1.5, %v1465_v39  ;;  %v2111_v47 = vmul.f32 1.442695, %v2010_v33  ;;  %v1979_v25 = vmul.f32 %v5098_v45, %v7113_v29  ;;  %vm1490_vm2 = vmor %vm1488_vm8, %vm1489_vm13  ;;  %v1244_v20 = vpop.xlane.xlu2 %1243 }
 0x185   :  { %3011 = vrsqrt.f32 %v5140_v42  ;;  %v5169_v55 = vsel %vm1460_vm15, %v5027_v37, %v1457_v3  ;;  %v1377_v26 = vmul.f32 %v5047_v8, %v1376_v27  ;;  %v1393_v6 = vmul.f32 %v5150_v31, %v5087_v43 }
 0x186   :  { %7114 = vst [vmem:[#allocation94_spill] sm:$0xff] %v5169_v55  ;;  %3013 = vrsqrt.f32 %v5148_v50  ;;  %v5175_v15 = vmul.f32 0.5, %v1384_v18  ;;  %v1980_v53 = vmul.f32 %v5098_v45, %v7116_v56  ;;  %v2049_v39 = vmul.f32 1.442695, %v1979_v25  ;;  %v1205_v25 = vpop.xlane.xlu1 %1204 }
 0x187   :  { %3015 = vpow2.f32 %v2111_v47  ;;  %v5179_v1 = vpop.eup %3005  ;;  %vm1469_vm4 = vweird.f32 %v5058_v32  ;;  %v1496_v37 = vsub.f32 1.5, %v1495_v34  ;;  %v1503_v27 = vmul.f32 %v5159_v7, %v5105_v35 }
 0x188   :  { %7115 = vst [vmem:[#allocation99_spill] sm:$0xff] %v5175_v15  ;;  %3017 = vrsqrt.f32 %v5157_v44  ;;  %v1487_v33 = vmul.f32 %v5054_v12, %v1486_v62  ;;  %v1467_v23 = vmul.f32 %v5058_v32, %v1466_v21  ;;  %v2005_v18 = vmul.f32 %v5169_v55, %v6970_v9  ;;  %vm1470_vm7 = vmor %vm1468_vm10, %vm1469_vm4 }
 0x189   :  { %v5189_v3 = vpop.eup %3007  ;;  %3019 = vpow2.f32 %v2049_v39  ;;  %v5200_v47 = vsel %vm1370_vm6, %v5009_v22, %v1367_v49  ;;  %v5203_v29 = vsel %vm1380_vm3, %v5047_v8, %v1377_v26  ;;  %vm1498_vm11 = vweird.f32 %v5032_v5 }
 0x18a   :  { %v3010_v34 = vpop.eup %3009  ;;  %v1394_v40 = vmul.f32 %v5150_v31, %v1393_v6  ;;  %vm1499_vm5 = vweird.f32 %v5074_v0  ;;  %v1513_v22 = vmul.f32 %v5179_v1, %v5128_v36  ;;  %v2051_v8 = vmul.f32 1.442695, %v1980_v53 }
 0x18b   :  { %v5207_v56 = vpop.eup %3011  ;;  %v1497_v62 = vmul.f32 %v5074_v0, %v1496_v37  ;;  %v1504_v48 = vmul.f32 %v5159_v7, %v1503_v27  ;;  %v2206_v21 = vmul.f32 %v3010_v34, %v4954_v38  ;;  %v2006_v26 = vmul.f32 %v5169_v55, %v6971_v59  ;;  %v1247_v59 = vpop.xlane.xlu0 %1246  ;;  %vm1500_vm9 = vmor %vm1498_vm11, %vm1499_vm5 }
 0x18c   :  { %v5217_v49 = vpop.eup %3013  ;;  %v5229_v39 = vsel %vm1490_vm2, %v5054_v12, %v1487_v33  ;;  %v5232_v53 = vsel %vm1470_vm7, %v5058_v32, %v1467_v23  ;;  %3021 = vpow2.f32 %v2051_v8  ;;  %v2101_v9 = vmul.f32 1.442695, %v2005_v18 }
 0x18d   :  { %v3016_v6 = vpop.eup %3015  ;;  %7117 = vst [vmem:[#allocation100_spill] sm:$0xff] %v5229_v39  ;;  %v5236_v37 = vmul.f32 0.5, %v1394_v40  ;;  %v5238_v27 = vmax.f32 %v1202_v61, 1e-24  ;;  %v2103_v31 = vmul.f32 1.442695, %v2006_v26  ;;  %v1533_v12 = vmul.f32 %v5189_v3, %v5135_v2 }
 0x18e   :  { %7118 = vst [vmem:[#allocation106_spill] sm:$0xff] %v5232_v53  ;;  %v5234_v10 = vpop.eup %3017  ;;  %v2207_v34 = vmul.f32 %v3016_v6, %v4980_v63  ;;  %v1514_v32 = vmul.f32 %v5179_v1, %v1513_v22  ;;  %v1403_v33 = vmul.f32 %v5207_v56, %v5140_v42  ;;  %3023 = vpow2.f32 %v2101_v9 }
 0x18f   :  { %7119 = vst [vmem:[#allocation109_spill] sm:$0xff] %v5236_v37  ;;  %v3020_v55 = vpop.eup %3019  ;;  %v5251_v61 = vsel %vm1500_vm9, %v5074_v0, %v1497_v62  ;;  %v5253_v23 = vmul.f32 0.5, %v1504_v48  ;;  %v5255_v40 = vmax.f32 %v1244_v20, 1e-24  ;;  %v1543_v5 = vmul.f32 %v5217_v49, %v5148_v50 }
 0x190   :  { %7120 = vst [vmem:[#allocation116_spill] sm:$0xff] %v5251_v61  ;;  %v2288_v18 = vadd.f32 %v2207_v34, %v2206_v21  ;;  %v1523_v8 = vmul.f32 %v5234_v10, %v5157_v44  ;;  %3025 = vpow2.f32 %v2103_v31  ;;  %v5261_v22 = vmax.f32 %v1247_v59, 1e-24  ;;  %v1250_v59 = vpop.xlane.xlu1 %1249 }
 0x191   :  { %3027 = vrsqrt.f32 %v5238_v27  ;;  %v2176_v0 = vmul.f32 %v3020_v55, %v4954_v38  ;;  %v2007_v9 = vmul.f32 %v5232_v53, %v6968_v60  ;;  %v2008_v62 = vmul.f32 %v5232_v53, %v6969_v19 }
 0x192   :  { %2289 = vadd.xlane.f32.xlu1 %v2288_v18  ;;  %v3022_v48 = vpop.eup %3021  ;;  %v1534_v21 = vmul.f32 %v5189_v3, %v1533_v12  ;;  %v5270_v26 = vmul.f32 0.5, %v1514_v32  ;;  %v1404_v31 = vmul.f32 %v5207_v56, %v1403_v33  ;;  %v5273_v6 = vmax.f32 %v1205_v25, 1e-24  ;;  %v7121_v18 = vld [vmem:[#allocation64_spill] sm:$0xff] }
 0x193   :  { %v2177_v20 = vmul.f32 %v3022_v48, %v4980_v63  ;;  %3029 = vrsqrt.f32 %v5255_v40  ;;  %v2105_v55 = vmul.f32 1.442695, %v2007_v9  ;;  %v2107_v34 = vmul.f32 1.442695, %v2008_v62 }
 0x194   :  { %v3024_v60 = vpop.eup %3023  ;;  %vm1509_vm14 = vweird.f32 %v5159_v7  ;;  %v1544_v19 = vmul.f32 %v5217_v49, %v1543_v5  ;;  %v1524_v12 = vmul.f32 %v5234_v10, %v1523_v8  ;;  %3031 = vrsqrt.f32 %v5261_v22  ;;  %v7122_v8 = vld [vmem:[#allocation58_spill] sm:$0xff] }
 0x195   :  { %v1983_v25 = vmul.f32 %v5119_v46, %v6955_v16  ;;  %v2243_v32 = vadd.f32 %v2177_v20, %v2176_v0  ;;  %v2202_v33 = vmul.f32 %v3024_v60, %v4954_v38  ;;  %3033 = vpow2.f32 %v2105_v55  ;;  %v7124_v20 = vld [vmem:[#allocation59_spill] sm:$0xff]  ;;  %v1208_v60 = vpop.xlane.xlu2 %1207 }
 0x196   :  { %v1984_v9 = vmul.f32 %v5119_v46, %v7121_v18  ;;  %v3026_v62 = vpop.eup %3025  ;;  %vm1508_vm0 = vweird.f32 %v5105_v35  ;;  %3035 = vpow2.f32 %v2107_v34  ;;  %v5287_v48 = vmax.f32 %v1250_v59, 1e-24 }
 0x197   :  { %v2057_v5 = vmul.f32 1.442695, %v1983_v25  ;;  %v1981_v53 = vmul.f32 %v5101_v4, %v7122_v8  ;;  %v5291_v43 = vpop.eup %3027  ;;  %vm1519_vm1 = vweird.f32 %v5179_v1  ;;  %2244 = vadd.xlane.f32.xlu2 %v2243_v32  ;;  %v2203_v16 = vmul.f32 %v3026_v62, %v4980_v63  ;;  %vm1510_vm3 = vmor %vm1508_vm0, %vm1509_vm14 }
 0x198   :  { %7123 = vst [vmem:[#allocation52_spill] sm:$0xff] %v5291_v43  ;;  %3037 = vrsqrt.f32 %v5273_v6  ;;  %v2059_v0 = vmul.f32 1.442695, %v1984_v9  ;;  %v1982_v55 = vmul.f32 %v5101_v4, %v7124_v20  ;;  %v1506_v34 = vsub.f32 1.5, %v5253_v23  ;;  %v7125_v9 = vld [vmem:[#allocation68_spill] sm:$0xff] }
 0x199   :  { %3039 = vpow2.f32 %v2057_v5  ;;  %v2053_v25 = vmul.f32 1.442695, %v1981_v53  ;;  %v5300_v18 = vpop.eup %3029  ;;  %v1535_v8 = vmul.f32 0.5, %v1534_v21  ;;  %vm1518_vm8 = vweird.f32 %v5128_v36 }
 0x19a   :  { %v1405_v32 = vmul.f32 0.5, %v1404_v31  ;;  %vm1408_vm12 = vweird.f32 %v5140_v42  ;;  %v2282_v62 = vadd.f32 %v2203_v16, %v2202_v33  ;;  %1722 = vadd.xlane.f32.xlu1 %v7125_v9  ;;  %3041 = vpow2.f32 %v2059_v0  ;;  %v5305_v20 = vpop.eup %3031  ;;  %vm1520_vm2 = vmor %vm1518_vm8, %vm1519_vm1 }
 0x19b   :  { %vm1538_vm13 = vweird.f32 %v5135_v2  ;;  %vm1539_vm10 = vweird.f32 %v5189_v3  ;;  %vm1409_vm15 = vweird.f32 %v5207_v56  ;;  %v1545_v53 = vmul.f32 0.5, %v1544_v19  ;;  %v3034_v21 = vpop.eup %3033 }
 0x19c   :  { %v1413_v23 = vmul.f32 %v5291_v43, %v5238_v27  ;;  %v1516_v31 = vsub.f32 1.5, %v5270_v26  ;;  %v1525_v5 = vmul.f32 0.5, %v1524_v12  ;;  %2283 = vadd.xlane.f32.xlu0 %v2282_v62  ;;  %3043 = vrsqrt.f32 %v5287_v48  ;;  %v3036_v16 = vpop.eup %3035  ;;  %vm5358_vm5 = vmor %vm1538_vm13, %vm1539_vm10 }
 0x19d   :  { %v2055_v33 = vmul.f32 1.442695, %v1982_v55  ;;  %v1507_v0 = vmul.f32 %v5159_v7, %v1506_v34  ;;  %vm1548_vm6 = vweird.f32 %v5148_v50  ;;  %v1553_v9 = vmul.f32 %v5300_v18, %v5255_v40  ;;  %vm1410_vm9 = vmor %vm1408_vm12, %vm1409_vm15 }
 0x19e   :  { %v2204_v19 = vmul.f32 %v3034_v21, %v4954_v38  ;;  %3045 = vpow2.f32 %v2053_v25  ;;  %v5319_v59 = vpop.eup %3037  ;;  %v1536_v37 = vsub.f32 1.5, %v1535_v8  ;;  %v1406_v26 = vsub.f32 1.5, %v1405_v32 }
 0x19f   :  { %v2205_v12 = vmul.f32 %v3036_v16, %v4980_v63  ;;  %3047 = vpow2.f32 %v2055_v33  ;;  %v3040_v62 = vpop.eup %3039  ;;  %v1546_v55 = vsub.f32 1.5, %v1545_v53  ;;  %vm1528_vm4 = vweird.f32 %v5157_v44  ;;  %v1256_v16 = vpop.xlane.xlu0 %1255 }
 0x1a0   :  { %v1414_v34 = vmul.f32 %v5291_v43, %v1413_v23  ;;  %v5324_v46 = vmax.f32 %v1208_v60, 1e-24  ;;  %v3042_v15 = vpop.eup %3041  ;;  %v1517_v25 = vmul.f32 %v5179_v1, %v1516_v31  ;;  %v1526_v8 = vsub.f32 1.5, %v1525_v5  ;;  %v1687_v43 = vpop.xlane.xlu1 %1686 }
 0x1a1   :  { %v2285_v32 = vadd.f32 %v2205_v12, %v2204_v19  ;;  %v2180_v21 = vmul.f32 %v3040_v62, %v4954_v38  ;;  %v5333_v53 = vsel %vm1510_vm3, %v5159_v7, %v1507_v0  ;;  %v1554_v33 = vmul.f32 %v5300_v18, %v1553_v9  ;;  %v1253_v19 = vpop.xlane.xlu2 %1252 }
 0x1a2   :  { %7126 = vst [vmem:[#allocation53_spill] sm:$0xff] %v5333_v53  ;;  %v1563_v60 = vmul.f32 %v5305_v20, %v5261_v22  ;;  %v2181_v23 = vmul.f32 %v3042_v15, %v4980_v63  ;;  %v5339_v35 = vpop.eup %3043  ;;  %v1537_v31 = vmul.f32 %v5189_v3, %v1536_v37  ;;  %v1407_v5 = vmul.f32 %v5207_v56, %v1406_v26 }
 0x1a3   :  { %vm1549_vm11 = vweird.f32 %v5217_v49  ;;  %v1423_v7 = vmul.f32 %v5319_v59, %v5273_v6  ;;  %2286 = vadd.xlane.f32.xlu2 %v2285_v32  ;;  %v1547_v15 = vmul.f32 %v5217_v49, %v1546_v55  ;;  %v5351_v9 = vmul.f32 0.5, %v1414_v34 }
 0x1a4   :  { %v3046_v0 = vpop.eup %3045  ;;  %3049 = vrsqrt.f32 %v5324_v46  ;;  %v2249_v37 = vadd.f32 %v2181_v23, %v2180_v21  ;;  %v5363_v36 = vsel %vm1520_vm2, %v5179_v1, %v1517_v25  ;;  %v1527_v62 = vmul.f32 %v5234_v10, %v1526_v8  ;;  %1716 = vadd.xlane.f32.xlu0 %v4956_v57  ;;  %vm1550_vm14 = vmor %vm1548_vm6, %vm1549_vm11 }
 0x1a5   :  { %v3048_v26 = vpop.eup %3047  ;;  %7129 = vst [vmem:[#allocation54_spill] sm:$0xff] %v5363_v36  ;;  %vm1529_vm7 = vweird.f32 %v5234_v10  ;;  %v5368_v55 = vmax.f32 %v1256_v16, 1e-24  ;;  %v5374_v2 = vmul.f32 0.5, %v1554_v33  ;;  %v1564_v34 = vmul.f32 %v5305_v20, %v1563_v60 }
 0x1a6   :  { %v1573_v1 = vmul.f32 %v5339_v35, %v5287_v48  ;;  %2250 = vadd.xlane.f32.xlu1 %v2249_v37  ;;  %v6681_v25 = vmin.f32 %v5098_v45, 1.0  ;;  %v1424_v57 = vmul.f32 %v5319_v59, %v1423_v7  ;;  %v2178_v42 = vmul.f32 %v3046_v0, %v4954_v38  ;;  %vm1530_vm0 = vmor %vm1528_vm4, %vm1529_vm7 }
 0x1a7   :  { %v2179_v8 = vmul.f32 %v3048_v26, %v4980_v63  ;;  %v5388_v32 = vmul.f32 %v1687_v43, %v5098_v45  ;;  %v5393_v21 = vsel %vm5358_vm5, %v5189_v3, %v1537_v31  ;;  %v5396_v33 = vsel %vm1410_vm9, %v5207_v56, %v1407_v5 }
 0x1a8   :  { %7130 = vst [vmem:[#allocation55_spill] sm:$0xff] %v5393_v21  ;;  %v5399_v50 = vsel %vm1550_vm14, %v5217_v49, %v1547_v15  ;;  %v5407_v43 = vsel %vm1530_vm0, %v5234_v10, %v1527_v62  ;;  %v5412_v3 = vmul.f32 %v4648_v24, %v6681_v25  ;;  %v5414_v56 = vmax.f32 %v1253_v19, 1e-24  ;;  %v1211_v19 = vpop.xlane.xlu0 %1210  ;;  %v5435_v26 = vpop.xlane.xlu1 %1258  ;;  %v7150_v24 = vld [vmem:[#allocation74_spill] sm:$0xff] }
 0x1a9   :  { %7131 = vst [vmem:[#allocation64_spill] sm:$0xff] %v5399_v50  ;;  %v2015_v49 = vmul.f32 %v5333_v53, %v3912_v52  ;;  %v1565_v16 = vmul.f32 0.5, %v1564_v34  ;;  %v1574_v44 = vmul.f32 %v5339_v35, %v1573_v1  ;;  %3051 = vrsqrt.f32 %v5368_v55 }
 0x1aa   :  { %7132 = vst [vmem:[#allocation58_spill] sm:$0xff] %v5407_v43  ;;  %v5418_v23 = vpop.eup %3049  ;;  %v2016_v10 = vmul.f32 %v5333_v53, %v3918_v13  ;;  %v1556_v31 = vsub.f32 1.5, %v5374_v2  ;;  %v5425_v5 = vmul.f32 0.5, %v1424_v57  ;;  %v2246_v7 = vadd.f32 %v2179_v8, %v2178_v42  ;;  %v7133_v8 = vld [vmem:[#allocation4_spill] sm:$0xff] }
 0x1ab   :  { %1719 = vadd.xlane.f32.xlu2 %v5040_v28  ;;  %vm1558_vm1 = vweird.f32 %v5255_v40  ;;  %v2121_v0 = vmul.f32 1.442695, %v2015_v49  ;;  %v2013_v37 = vmul.f32 %v5251_v61, %v7024_v11  ;;  %v2014_v13 = vmul.f32 %v5251_v61, %v7025_v58  ;;  %v1678_v58 = vpop.xlane.xlu2 %1677 }
 0x1ac   :  { %v2123_v15 = vmul.f32 1.442695, %v2016_v10  ;;  %v1433_v28 = vmul.f32 %v5418_v23, %v5324_v46  ;;  %2247 = vadd.xlane.f32.xlu0 %v2246_v7  ;;  %3053 = vrsqrt.f32 %v5414_v56  ;;  %v2011_v12 = vmul.f32 %v5229_v39, %v7026_v41 }
 0x1ad   :  { %v2012_v62 = vmul.f32 %v5229_v39, %v7030_v51  ;;  %v1575_v2 = vmul.f32 0.5, %v1574_v44  ;;  %3055 = vpow2.f32 %v2121_v0  ;;  %v2117_v11 = vmul.f32 1.442695, %v2013_v37 }
 0x1ae   :  { %v2119_v34 = vmul.f32 1.442695, %v2014_v13  ;;  %vm1559_vm8 = vweird.f32 %v5300_v18  ;;  %vm1569_vm12 = vweird.f32 %v5305_v20  ;;  %3057 = vpow2.f32 %v2123_v15  ;;  %v7134_v13 = vld [vmem:[#allocation47_spill] sm:$0xff] }
 0x1af   :  { %v2113_v1 = vmul.f32 1.442695, %v2011_v12  ;;  %v5446_v57 = vpop.eup %3051  ;;  %v1566_v42 = vsub.f32 1.5, %v1565_v16  ;;  %vm1578_vm13 = vweird.f32 %v5287_v48  ;;  %vm1579_vm10 = vweird.f32 %v5339_v35  ;;  %v7135_v12 = vld [vmem:[#allocation66_spill] sm:$0xff]  ;;  %vm1560_vm3 = vmor %vm1558_vm1, %vm1559_vm8 }
 0x1b0   :  { %3059 = vpow2.f32 %v2117_v11  ;;  %v2115_v41 = vmul.f32 1.442695, %v2012_v62  ;;  %vm1568_vm15 = vweird.f32 %v5261_v22  ;;  %vm1428_vm6 = vweird.f32 %v5273_v6  ;;  %v7137_v11 = vld [vmem:[#allocation36_spill] sm:$0xff]  ;;  %v1681_v52 = vpop.xlane.xlu0 %1680  ;;  %vm1580_vm7 = vmor %vm1578_vm13, %vm1579_vm10 }
 0x1b1   :  { %vm1429_vm4 = vweird.f32 %v5319_v59  ;;  %3061 = vpow2.f32 %v2119_v34  ;;  %v5453_v51 = vmax.f32 %v1211_v19, 1e-24  ;;  %v6682_v49 = vmin.f32 %v7133_v8, 1.0  ;;  %v1696_v34 = vpop.xlane.xlu1 %1695  ;;  %vm1570_vm11 = vmor %vm1568_vm15, %vm1569_vm12  ;;  %v7146_v6 = vld [vmem:[#allocation80_spill] sm:$0xff] }
 0x1b2   :  { %v5457_v44 = vmul.f32 %v1678_v58, %v7133_v8  ;;  %v1557_v16 = vmul.f32 %v5300_v18, %v1556_v31  ;;  %v1426_v10 = vsub.f32 1.5, %v5425_v5  ;;  %v1576_v7 = vsub.f32 1.5, %v1575_v2  ;;  %v5462_v15 = vpop.eup %3053  ;;  %v7136_v2 = vld [vmem:[#allocation67_spill] sm:$0xff]  ;;  %vm5531_vm9 = vmor %vm1428_vm6, %vm1429_vm4 }
 0x1b3   :  { %v1434_v0 = vmul.f32 %v5418_v23, %v1433_v28  ;;  %v1593_v37 = vmul.f32 %v5446_v57, %v5368_v55  ;;  %3063 = vpow2.f32 %v2113_v1  ;;  %v5469_v19 = vmul.f32 %v7134_v13, %v6682_v49  ;;  %v3056_v31 = vpop.eup %3055 }
 0x1b4   :  { %v1985_v62 = vmul.f32 %v5122_v17, %v7135_v12  ;;  %v1567_v5 = vmul.f32 %v5305_v20, %v1566_v42  ;;  %3065 = vpow2.f32 %v2115_v41  ;;  %v1986_v28 = vmul.f32 %v5122_v17, %v7136_v2  ;;  %v3058_v58 = vpop.eup %3057 }
 0x1b5   :  { %v2212_v1 = vmul.f32 %v3056_v31, %v4954_v38  ;;  %3067 = vrsqrt.f32 %v5453_v51  ;;  %v1868_v12 = vsub.f32 %v5457_v44, %v5469_v19  ;;  %v5486_v25 = vsel %vm1560_vm3, %v5300_v18, %v1557_v16 }
 0x1b6   :  { %v2061_v42 = vmul.f32 1.442695, %v1985_v62  ;;  %v3060_v41 = vpop.eup %3059  ;;  %7138 = vst [vmem:[#allocation59_spill] sm:$0xff] %v5486_v25  ;;  %v1435_v2 = vmul.f32 0.5, %v1434_v0  ;;  %v2213_v49 = vmul.f32 %v3058_v58, %v4980_v63  ;;  %v2063_v60 = vmul.f32 1.442695, %v1986_v28 }
 0x1b7   :  { %v3062_v40 = vpop.eup %3061  ;;  %v1577_v61 = vmul.f32 %v5339_v35, %v1576_v7  ;;  %v1594_v31 = vmul.f32 %v5446_v57, %v1593_v37  ;;  %v2210_v39 = vmul.f32 %v3060_v41, %v4954_v38  ;;  %v1583_v44 = vmul.f32 %v5462_v15, %v5414_v56  ;;  %v7140_v62 = vld [vmem:[#allocation43_spill] sm:$0xff] }
 0x1b8   :  { %3069 = vpow2.f32 %v2061_v42  ;;  %v2297_v19 = vadd.f32 %v2213_v49, %v2212_v1  ;;  %v2211_v18 = vmul.f32 %v3062_v40, %v4980_v63  ;;  %v7139_v0 = vmin.f32 %v7137_v11, 1.0  ;;  %v1684_v42 = vpop.xlane.xlu2 %1683 }
 0x1b9   :  { %3071 = vpow2.f32 %v2063_v60  ;;  %v3064_v16 = vpop.eup %3063  ;;  %v1805_v58 = vmul.f32 %v1681_v52, %v7137_v11  ;;  %v6687_v7 = vmin.f32 %v5122_v17, 1.0  ;;  %v5501_v37 = vmul.f32 %v1696_v34, %v5122_v17 }
 0x1ba   :  { %v1837_v28 = vmul.f32 %v7140_v62, %v7139_v0  ;;  %v3066_v41 = vpop.eup %3065  ;;  %v1427_v60 = vmul.f32 %v5319_v59, %v1426_v10  ;;  %vm1438_vm2 = vweird.f32 %v5324_v46  ;;  %vm1439_vm5 = vweird.f32 %v5418_v23  ;;  %2298 = vadd.xlane.f32.xlu1 %v2297_v19  ;;  %v7157_v46 = vld [vmem:[#allocation52_spill] sm:$0xff] }
 0x1bb   :  { %v2294_v52 = vadd.f32 %v2211_v18, %v2210_v39  ;;  %v2208_v49 = vmul.f32 %v3064_v16, %v4954_v38  ;;  %v6688_v34 = vmin.f32 %v4998_v54, 1.0  ;;  %v5512_v1 = vpop.eup %3067  ;;  %v5515_v40 = vsel %vm1570_vm11, %v5305_v20, %v1567_v5  ;;  %v7142_v39 = vld [vmem:[#allocation63_spill] sm:$0xff]  ;;  %vm5586_vm8 = vmor %vm1438_vm2, %vm1439_vm5 }
 0x1bc   :  { %7141 = vst [vmem:[#allocation68_spill] sm:$0xff] %v5515_v40  ;;  %v2209_v22 = vmul.f32 %v3066_v41, %v4980_v63  ;;  %v1869_v10 = vsub.f32 %v1805_v58, %v1837_v28  ;;  %v5525_v19 = vmul.f32 %v7142_v39, %v6687_v7  ;;  %v5536_v5 = vsel %vm1580_vm7, %v5339_v35, %v1577_v61 }
 0x1bd   :  { %7145 = vst [vmem:[#allocation4_spill] sm:$0xff] %v5536_v5  ;;  %v1436_v48 = vsub.f32 1.5, %v1435_v2  ;;  %vm1900_vm14 = vcmask 7168   ;;  %2295 = vadd.xlane.f32.xlu2 %v2294_v52  ;;  %v1806_v18 = vmul.f32 %v1684_v42, %v4998_v54  ;;  %vm1389_vm0 = vweird.f32 %v5107_v14  ;;  %v7147_v42 = vld [vmem:[#allocation46_spill] sm:$0xff] }
 0x1be   :  { %v3070_v16 = vpop.eup %3069  ;;  %v1595_v0 = vmul.f32 0.5, %v1594_v31  ;;  %v1584_v28 = vmul.f32 %v5462_v15, %v1583_v44  ;;  %v2291_v58 = vadd.f32 %v2209_v22, %v2208_v49  ;;  %v1989_v41 = vmul.f32 %v5203_v29, %v7146_v6  ;;  %v7148_v44 = vld [vmem:[#allocation105_spill] sm:$0xff] }
 0x1bf   :  { %v3072_v7 = vpop.eup %3071  ;;  %v1443_v61 = vmul.f32 %v5512_v1, %v5453_v51  ;;  %v2182_v35 = vmul.f32 %v3070_v16, %v4954_v38  ;;  %v1902_v2 = vsel %vm1900_vm14, %v1869_v10, 0.0  ;;  %v1838_v52 = vmul.f32 %v7147_v42, %v6688_v34 }
 0x1c0   :  { %vm1388_vm1 = vweird.f32 %v5045_v30  ;;  %v5554_v31 = vsel %vm5531_vm9, %v5319_v59, %v1427_v60  ;;  %v5558_v49 = vmul.f32 %v5536_v5, %v7148_v44  ;;  %2292 = vadd.xlane.f32.xlu0 %v2291_v58  ;;  %v1901_v22 = vsel %vm1900_vm14, %v1868_v12, 0.0  ;;  %v7149_v59 = vld [vmem:[#allocation81_spill] sm:$0xff] }
 0x1c1   :  { %v2183_v10 = vmul.f32 %v3072_v7, %v4980_v63  ;;  %v1437_v16 = vmul.f32 %v5418_v23, %v1436_v48  ;;  %v1903_v6 = vadd.f32 %v1902_v2, %v1901_v22  ;;  %v1870_v39 = vsub.f32 %v1806_v18, %v1838_v52  ;;  %v1690_v48 = vpop.xlane.xlu0 %1689  ;;  %v1693_v22 = vpop.xlane.xlu2 %1692  ;;  %vm1390_vm10 = vmor %vm1388_vm1, %vm1389_vm0  ;;  %v7163_v30 = vld [vmem:[#allocation65_spill] sm:$0xff] }
 0x1c2   :  { %v1585_v17 = vmul.f32 0.5, %v1584_v28  ;;  %v1990_v60 = vmul.f32 %v5203_v29, %v7149_v59  ;;  %v2069_v53 = vmul.f32 1.442695, %v1989_v41  ;;  %v1596_v44 = vsub.f32 1.5, %v1595_v0  ;;  %v7152_v41 = vld [vmem:[#allocation35_spill] sm:$0xff] }
 0x1c3   :  { %v2252_v20 = vadd.f32 %v2183_v10, %v2182_v35  ;;  %v1444_v58 = vmul.f32 %v5512_v1, %v1443_v61  ;;  %v1904_v12 = vsel %vm1900_vm14, %v1870_v39, 0.0  ;;  %v1987_v7 = vmul.f32 %v5200_v47, %v7150_v24  ;;  %v7153_v61 = vld [vmem:[#allocation75_spill] sm:$0xff] }
 0x1c4   :  { %v5572_v2 = vmax.f32 %v5435_v26, 1e-24  ;;  %v1905_v18 = vadd.f32 %v1904_v12, %v1903_v6  ;;  %3073 = vpow2.f32 %v2069_v53  ;;  %v2071_v28 = vmul.f32 1.442695, %v1990_v60  ;;  %v7158_v60 = vld [vmem:[#allocation69_spill] sm:$0xff]  ;;  %v7164_v53 = vld [vmem:[#allocation84_spill] sm:$0xff] }
 0x1c5   :  { %2253 = vadd.xlane.f32.xlu1 %v2252_v20  ;;  %v7151_v35 = vsub.f32 %v5388_v32, %v5412_v3  ;;  %1728 = vadd.xlane.f32.xlu2 %v7152_v41  ;;  %v1988_v39 = vmul.f32 %v5200_v47, %v7153_v61  ;;  %v2065_v52 = vmul.f32 1.442695, %v1987_v7  ;;  %v6694_v24 = vmin.f32 %v5101_v4, 1.0  ;;  %v7156_v20 = vld [vmem:[#allocation51_spill] sm:$0xff] }
 0x1c6   :  { %v1586_v32 = vsub.f32 1.5, %v1585_v17  ;;  %3075 = vpow2.f32 %v2071_v28  ;;  %v1808_v26 = vmul.f32 %v1690_v48, %v5101_v4  ;;  %v5591_v10 = vmul.f32 0.5, %v1444_v58  ;;  %v7159_v17 = vld [vmem:[#allocation99_spill] sm:$0xff]  ;;  %v7161_v58 = vld [vmem:[#allocation42_spill] sm:$0xff] }
 0x1c7   :  { %v1906_v0 = vsel %vm1900_vm14, %v7151_v35, 0.0  ;;  %3077 = vpow2.f32 %v2065_v52  ;;  %v2067_v6 = vmul.f32 1.442695, %v1988_v39  ;;  %v1840_v59 = vmul.f32 %v7156_v20, %v6694_v24  ;;  %v1705_v52 = vpop.xlane.xlu1 %1704 }
 0x1c8   :  { %v1907_v3 = vadd.f32 %v1906_v0, %v1905_v18  ;;  %vm1418_vm12 = vweird.f32 %v5238_v27  ;;  %vm1419_vm13 = vweird.f32 %v7157_v46  ;;  %3079 = vrsqrt.f32 %v5572_v2  ;;  %1725 = vadd.xlane.f32.xlu0 %v7158_v60  ;;  %v7167_v60 = vld [vmem:[#allocation16_spill] sm:$0xff] }
 0x1c9   :  { %v7160_v12 = vsub.f32 1.5, %v7159_v17  ;;  %v6695_v48 = vmin.f32 %v7161_v58, 1.0  ;;  %v1809_v18 = vmul.f32 %v1693_v22, %v7161_v58  ;;  %v5612_v28 = vsel %vm5586_vm8, %v5418_v23, %v1437_v16  ;;  %v7168_v17 = vld [vmem:[#allocation122_spill] sm:$0xff]  ;;  %vm5673_vm4 = vmor %vm1418_vm12, %vm1419_vm13 }
 0x1ca   :  { %v5615_v35 = vmul.f32 %v5446_v57, %v1596_v44  ;;  %3081 = vpow2.f32 %v2067_v6  ;;  %v1872_v0 = vsub.f32 %v1808_v26, %v1840_v59  ;;  %v3074_v41 = vpop.eup %3073  ;;  %v5618_v61 = vmul.f32 %v5462_v15, %v1586_v32  ;;  %v7165_v6 = vld [vmem:[#allocation85_spill] sm:$0xff] }
 0x1cb   :  { %v1387_v7 = vmul.f32 %v5107_v14, %v7160_v12  ;;  %v1841_v22 = vmul.f32 %v7163_v30, %v6695_v48  ;;  %v2021_v23 = vmul.f32 %v5393_v21, %v7164_v53  ;;  %v2186_v44 = vmul.f32 %v3074_v41, %v4954_v38  ;;  %v7169_v53 = vld [vmem:[#allocation86_spill] sm:$0xff]  ;;  %v7170_v48 = vld [vmem:[#allocation87_spill] sm:$0xff] }
 0x1cc   :  { %v1908_v26 = vsel %vm1900_vm14, %v1872_v0, 0.0  ;;  %v2022_v32 = vmul.f32 %v5393_v21, %v7165_v6  ;;  %v3076_v59 = vpop.eup %3075  ;;  %vm1399_vm6 = vweird.f32 %v7167_v60  ;;  %vm1598_vm3 = vweird.f32 %v5368_v55 }
 0x1cd   :  { %v5621_v39 = vsel %vm1390_vm10, %v5107_v14, %v1387_v7  ;;  %v7166_v14 = vld [vmem:[#allocation57_spill] sm:$0xff]  ;;  %1731 = vadd.xlane.f32.xlu1 %v7168_v17  ;;  %v1909_v12 = vadd.f32 %v1908_v26, %v1907_v3  ;;  %v3078_v0 = vpop.eup %3077  ;;  %v2187_v16 = vmul.f32 %v3076_v59, %v4980_v63  ;;  %v1873_v34 = vsub.f32 %v1809_v18, %v1841_v22 }
 0x1ce   :  { %7162 = vst [vmem:[#allocation47_spill] sm:$0xff] %v5621_v39  ;;  %vm1398_vm15 = vweird.f32 %v7166_v14  ;;  %v6699_v7 = vmin.f32 %v5621_v39, 1.0  ;;  %v1991_v24 = vmul.f32 %v5621_v39, %v7169_v53  ;;  %v1992_v41 = vmul.f32 %v5621_v39, %v7170_v48  ;;  %v5645_v20 = vpop.eup %3079  ;;  %v7171_v26 = vld [vmem:[#allocation49_spill] sm:$0xff] }
 0x1cf   :  { %v5643_v6 = vmul.f32 %v1705_v52, %v5621_v39  ;;  %v2133_v21 = vmul.f32 1.442695, %v2021_v23  ;;  %v2184_v3 = vmul.f32 %v3078_v0, %v4954_v38  ;;  %v2258_v4 = vadd.f32 %v2187_v16, %v2186_v44  ;;  %v7172_v0 = vld [vmem:[#allocation78_spill] sm:$0xff]  ;;  %v7174_v16 = vld [vmem:[#allocation71_spill] sm:$0xff]  ;;  %vm5708_vm7 = vmor %vm1398_vm15, %vm1399_vm6 }
 0x1d0   :  { %v5651_v17 = vmul.f32 %v7171_v26, %v6699_v7  ;;  %v2073_v53 = vmul.f32 1.442695, %v1991_v24  ;;  %v2075_v30 = vmul.f32 1.442695, %v1992_v41  ;;  %v3082_v48 = vpop.eup %3081  ;;  %v1910_v59 = vsel %vm1900_vm14, %v1873_v34, 0.0  ;;  %v7173_v24 = vld [vmem:[#allocation79_spill] sm:$0xff] }
 0x1d1   :  { %3083 = vpow2.f32 %v2133_v21  ;;  %v2135_v52 = vmul.f32 1.442695, %v2022_v32  ;;  %v2185_v18 = vmul.f32 %v3082_v48, %v4980_v63  ;;  %v1911_v23 = vadd.f32 %v1910_v59, %v1909_v12  ;;  %2259 = vadd.xlane.f32.xlu2 %v2258_v4  ;;  %v1699_v21 = vpop.xlane.xlu0 %1698  ;;  %v7176_v12 = vld [vmem:[#allocation73_spill] sm:$0xff] }
 0x1d2   :  { %3085 = vpow2.f32 %v2073_v53  ;;  %v2019_v7 = vmul.f32 %v5407_v43, %v7172_v0  ;;  %v2020_v41 = vmul.f32 %v5407_v43, %v7173_v24  ;;  %v2017_v34 = vmul.f32 %v5363_v36, %v7174_v16 }
 0x1d3   :  { %3087 = vpow2.f32 %v2075_v30  ;;  %v7175_v44 = vsub.f32 %v5501_v37, %v5525_v19  ;;  %v2255_v53 = vadd.f32 %v2185_v18, %v2184_v3  ;;  %v2018_v4 = vmul.f32 %v5363_v36, %v7176_v12 }
 0x1d4   :  { %3089 = vpow2.f32 %v2135_v52  ;;  %v2129_v48 = vmul.f32 1.442695, %v2019_v7  ;;  %v2131_v59 = vmul.f32 1.442695, %v2020_v41  ;;  %v2125_v0 = vmul.f32 1.442695, %v2017_v34 }
 0x1d5   :  { %v1912_v32 = vsel %vm1900_vm14, %v7175_v44, 0.0  ;;  %vm1599_vm11 = vweird.f32 %v5446_v57  ;;  %2256 = vadd.xlane.f32.xlu0 %v2255_v53  ;;  %v2127_v37 = vmul.f32 1.442695, %v2018_v4  ;;  %v6700_v19 = vmin.f32 %v5200_v47, 1.0  ;;  %v7180_v41 = vld [vmem:[#allocation109_spill] sm:$0xff]  ;;  %v7183_v4 = vld [vmem:[#allocation48_spill] sm:$0xff] }
 0x1d6   :  { %v1913_v24 = vadd.f32 %v1912_v32, %v1911_v23  ;;  %v1811_v3 = vmul.f32 %v1699_v21, %v5200_v47  ;;  %v7179_v27 = vsub.f32 1.5, %v5351_v9  ;;  %vm1448_vm2 = vweird.f32 %v5453_v51  ;;  %v1714_v23 = vpop.xlane.xlu1 %1713  ;;  %v7182_v21 = vld [vmem:[#allocation97_spill] sm:$0xff]  ;;  %vm5764_vm0 = vmor %vm1598_vm3, %vm1599_vm11 }
 0x1d7   :  { %v3084_v18 = vpop.eup %3083  ;;  %vm1449_vm5 = vweird.f32 %v5512_v1  ;;  %v5688_v7 = vmul.f32 %v5645_v20, %v5572_v2  ;;  %3091 = vpow2.f32 %v2129_v48  ;;  %v7181_v34 = vsub.f32 1.5, %v7180_v41 }
 0x1d8   :  { %v1417_v52 = vmul.f32 %v7157_v46, %v7179_v27  ;;  %v1995_v9 = vmul.f32 %v5396_v33, %v7182_v21  ;;  %v3086_v32 = vpop.eup %3085  ;;  %v2218_v53 = vmul.f32 %v3084_v18, %v4954_v38  ;;  %3093 = vpow2.f32 %v2131_v59  ;;  %v7187_v18 = vld [vmem:[#allocation103_spill] sm:$0xff]  ;;  %v7188_v21 = vld [vmem:[#allocation104_spill] sm:$0xff]  ;;  %vm1450_vm1 = vmor %vm1448_vm2, %vm1449_vm5 }
 0x1d9   :  { %v1397_v44 = vmul.f32 %v7167_v60, %v7181_v34  ;;  %v1843_v27 = vmul.f32 %v7183_v4, %v6700_v19  ;;  %v3088_v22 = vpop.eup %3087  ;;  %3095 = vpow2.f32 %v2125_v0  ;;  %vm1589_vm9 = vweird.f32 %v5462_v15  ;;  %v7216_v4 = vld [vmem:[#allocation83_spill] sm:$0xff] }
 0x1da   :  { %v5702_v48 = vsel %vm5673_vm4, %v7157_v46, %v1417_v52  ;;  %v3090_v46 = vpop.eup %3089  ;;  %v7189_v52 = vsub.f32 1.5, %v5591_v10  ;;  %3097 = vpow2.f32 %v2127_v37  ;;  %v7192_v37 = vld [vmem:[#allocation98_spill] sm:$0xff]  ;;  %vm1588_vm8 = vweird.f32 %v5414_v56 }
 0x1db   :  { %7184 = vst [vmem:[#allocation66_spill] sm:$0xff] %v5702_v48  ;;  %v6706_v59 = vmin.f32 %v5702_v48, 1.0  ;;  %v1997_v34 = vmul.f32 %v5702_v48, %v7187_v18  ;;  %v1998_v30 = vmul.f32 %v5702_v48, %v7188_v21  ;;  %v1875_v19 = vsub.f32 %v1811_v3, %v1843_v27  ;;  %v7190_v18 = vld [vmem:[#allocation76_spill] sm:$0xff]  ;;  %vm1590_vm12 = vmor %vm1588_vm8, %vm1589_vm9 }
 0x1dc   :  { %v1447_v14 = vmul.f32 %v5512_v1, %v7189_v52  ;;  %v5722_v36 = vmul.f32 %v1714_v23, %v5702_v48  ;;  %v2219_v0 = vmul.f32 %v3090_v46, %v4980_v63  ;;  %v5734_v10 = vsel %vm5708_vm7, %v7167_v60, %v1397_v44  ;;  %v7215_v48 = vld [vmem:[#allocation91_spill] sm:$0xff] }
 0x1dd   :  { %v5728_v43 = vmul.f32 %v7190_v18, %v6706_v59  ;;  %v2085_v21 = vmul.f32 1.442695, %v1997_v34  ;;  %v2087_v26 = vmul.f32 1.442695, %v1998_v30  ;;  %v1914_v39 = vsel %vm1900_vm14, %v1875_v19, 0.0  ;;  %7191 = vst [vmem:[#allocation67_spill] sm:$0xff] %v5734_v10  ;;  %v3092_v27 = vpop.eup %3091  ;;  %v1708_v30 = vpop.xlane.xlu0 %1707 }
 0x1de   :  { %v1996_v3 = vmul.f32 %v5396_v33, %v7192_v37  ;;  %v2081_v23 = vmul.f32 1.442695, %v1995_v9  ;;  %v2306_v46 = vadd.f32 %v2219_v0, %v2218_v53  ;;  %v5738_v52 = vadd.f32 %v1914_v39, %v1913_v24  ;;  %v3094_v59 = vpop.eup %3093  ;;  %v7193_v24 = vld [vmem:[#allocation92_spill] sm:$0xff]  ;;  %v7194_v0 = vld [vmem:[#allocation93_spill] sm:$0xff]  ;;  %v7199_v34 = vld [vmem:[#allocation114_spill] sm:$0xff] }
 0x1df   :  { %3099 = vpow2.f32 %v2085_v21  ;;  %v2216_v19 = vmul.f32 %v3092_v27, %v4954_v38  ;;  %v2188_v60 = vmul.f32 %v3086_v32, %v4954_v38  ;;  %v6707_v44 = vmin.f32 %v5734_v10, 1.0  ;;  %v3096_v41 = vpop.eup %3095  ;;  %v7201_v18 = vld [vmem:[#allocation107_spill] sm:$0xff] }
 0x1e0   :  { %3101 = vpow2.f32 %v2087_v26  ;;  %2307 = vadd.xlane.f32.xlu1 %v2306_v46  ;;  %v2217_v9 = vmul.f32 %v3094_v59, %v4980_v63  ;;  %v2189_v39 = vmul.f32 %v3088_v22, %v4980_v63  ;;  %v1993_v53 = vmul.f32 %v5734_v10, %v7193_v24  ;;  %v3098_v37 = vpop.eup %3097  ;;  %v7195_v26 = vld [vmem:[#allocation40_spill] sm:$0xff] }
 0x1e1   :  { %v1994_v21 = vmul.f32 %v5734_v10, %v7194_v0  ;;  %v2214_v27 = vmul.f32 %v3096_v41, %v4954_v38  ;;  %v5755_v32 = vmul.f32 %v7195_v26, %v6707_v44  ;;  %v5758_v46 = vmul.f32 %v1708_v30, %v5734_v10  ;;  %v7198_v44 = vld [vmem:[#allocation113_spill] sm:$0xff] }
 0x1e2   :  { %3103 = vpow2.f32 %v2081_v23  ;;  %v2303_v59 = vadd.f32 %v2217_v9, %v2216_v19  ;;  %v2215_v41 = vmul.f32 %v3098_v37, %v4980_v63  ;;  %v2077_v24 = vmul.f32 1.442695, %v1993_v53  ;;  %v7213_v10 = vld [vmem:[#allocation45_spill] sm:$0xff] }
 0x1e3   :  { %v2079_v0 = vmul.f32 1.442695, %v1994_v21  ;;  %v2083_v30 = vmul.f32 1.442695, %v1996_v3  ;;  %v2001_v55 = vmul.f32 %v5612_v28, %v7198_v44  ;;  %v2002_v26 = vmul.f32 %v5612_v28, %v7199_v34  ;;  %v7200_v21 = vld [vmem:[#allocation108_spill] sm:$0xff]  ;;  %v7202_v44 = vld [vmem:[#allocation110_spill] sm:$0xff] }
 0x1e4   :  { %v5780_v9 = vsel %vm1450_vm1, %v5512_v1, %v1447_v14  ;;  %2304 = vadd.xlane.f32.xlu2 %v2303_v59  ;;  %v2300_v53 = vadd.f32 %v2215_v41, %v2214_v27  ;;  %3105 = vpow2.f32 %v2077_v24  ;;  %v1999_v51 = vmul.f32 %v5554_v31, %v7200_v21  ;;  %v7205_v41 = vld [vmem:[#allocation118_spill] sm:$0xff] }
 0x1e5   :  { %v3100_v19 = vpop.eup %3099  ;;  %v5786_v3 = vmul.f32 %v5536_v5, %v7201_v18  ;;  %3107 = vpow2.f32 %v2079_v0  ;;  %v2000_v34 = vmul.f32 %v5554_v31, %v7202_v44  ;;  %v5795_v1 = vsel %vm5764_vm0, %v5446_v57, %v5615_v35  ;;  %v7206_v0 = vld [vmem:[#allocation119_spill] sm:$0xff]  ;;  %v7209_v44 = vld [vmem:[#allocation117_spill] sm:$0xff] }
 0x1e6   :  { %v3102_v37 = vpop.eup %3101  ;;  %7203 = vst [vmem:[#allocation36_spill] sm:$0xff] %v5795_v1  ;;  %2301 = vadd.xlane.f32.xlu0 %v2300_v53  ;;  %v2261_v14 = vadd.f32 %v2189_v39, %v2188_v60  ;;  %3109 = vpow2.f32 %v2083_v30  ;;  %v2093_v18 = vmul.f32 1.442695, %v2001_v55  ;;  %v5801_v56 = vsel %vm1590_vm12, %v5462_v15, %v5618_v61  ;;  %v7207_v15 = vld [vmem:[#allocation115_spill] sm:$0xff] }
 0x1e7   :  { %7204 = vst [vmem:[#allocation43_spill] sm:$0xff] %v5801_v56  ;;  %v2095_v59 = vmul.f32 1.442695, %v2002_v26  ;;  %v2003_v24 = vmul.f32 %v5780_v9, %v7205_v41  ;;  %v2004_v57 = vmul.f32 %v5780_v9, %v7206_v0  ;;  %v1604_v35 = vmul.f32 %v5645_v20, %v5688_v7  ;;  %v7208_v55 = vld [vmem:[#allocation95_spill] sm:$0xff]  ;;  %v7212_v0 = vld [vmem:[#allocation112_spill] sm:$0xff] }
 0x1e8   :  { %v3104_v27 = vpop.eup %3103  ;;  %2262 = vadd.xlane.f32.xlu1 %v2261_v14  ;;  %v2194_v60 = vmul.f32 %v3100_v19, %v4954_v38  ;;  %v2195_v39 = vmul.f32 %v3102_v37, %v4980_v63  ;;  %v2089_v22 = vmul.f32 1.442695, %v1999_v51  ;;  %v5812_v30 = vmul.f32 1.442695, %v5558_v49  ;;  %v7210_v37 = vld [vmem:[#allocation96_spill] sm:$0xff]  ;;  %v7211_v14 = vld [vmem:[#allocation111_spill] sm:$0xff] }
 0x1e9   :  { %v5816_v61 = vmul.f32 %v5795_v1, %v7207_v15  ;;  %v2091_v26 = vmul.f32 1.442695, %v2000_v34  ;;  %v2025_v53 = vmul.f32 %v5486_v25, %v7208_v55  ;;  %v5822_v7 = vmul.f32 %v5795_v1, %v7209_v44 }
 0x1ea   :  { %v3106_v21 = vpop.eup %3105  ;;  %3111 = vpow2.f32 %v2093_v18  ;;  %v2097_v19 = vmul.f32 1.442695, %v2003_v24  ;;  %v2026_v51 = vmul.f32 %v5486_v25, %v7210_v37  ;;  %v2031_v41 = vmul.f32 %v5801_v56, %v7211_v14  ;;  %v7214_v18 = vld [vmem:[#allocation90_spill] sm:$0xff] }
 0x1eb   :  { %v3108_v49 = vpop.eup %3107  ;;  %v2032_v34 = vmul.f32 %v5801_v56, %v7212_v0  ;;  %3113 = vpow2.f32 %v2095_v59  ;;  %v2099_v23 = vmul.f32 1.442695, %v2004_v57  ;;  %v1605_v5 = vmul.f32 0.5, %v1604_v35  ;;  %v7217_v35 = vld [vmem:[#allocation5_spill] sm:$0xff]  ;;  %v7220_v0 = vld [vmem:[#allocation102_spill] sm:$0xff] }
 0x1ec   :  { %v3110_v55 = vpop.eup %3109  ;;  %1737 = vadd.xlane.f32.xlu2 %v7213_v10  ;;  %v2270_v1 = vadd.f32 %v2195_v39, %v2194_v60  ;;  %3115 = vpow2.f32 %v2089_v22  ;;  %v2023_v24 = vmul.f32 %v5399_v50, %v7214_v18  ;;  %v2192_v37 = vmul.f32 %v3104_v27, %v4954_v38  ;;  %v7218_v10 = vld [vmem:[#allocation10_spill] sm:$0xff]  ;;  %v5842_v39 = vpop.xlane.xlu2 %2235  ;;  %v7222_v18 = vld [vmem:[#allocation9_spill] sm:$0xff] }
 0x1ed   :  { %3117 = vpow2.f32 %v2091_v26  ;;  %v2141_v25 = vmul.f32 1.442695, %v2025_v53  ;;  %v2024_v14 = vmul.f32 %v5399_v50, %v7215_v48  ;;  %v2193_v59 = vmul.f32 %v3110_v55, %v4980_v63  ;;  %v7219_v26 = vld [vmem:[#allocation101_spill] sm:$0xff] }
 0x1ee   :  { %1734 = vadd.xlane.f32.xlu0 %v7216_v4  ;;  %3119 = vpow2.f32 %v2097_v19  ;;  %v2143_v57 = vmul.f32 1.442695, %v2026_v51  ;;  %v5840_v60 = vadd.f32 %v7218_v10, %v7217_v35  ;;  %v2190_v22 = vmul.f32 %v3106_v21, %v4954_v38  ;;  %v7221_v51 = vld [vmem:[#allocation8_spill] sm:$0xff] }
 0x1ef   :  { %v2191_v27 = vmul.f32 %v3108_v49, %v4980_v63  ;;  %3121 = vpow2.f32 %v2099_v23  ;;  %v2027_v48 = vmul.f32 %v5515_v40, %v7219_v26  ;;  %v2137_v4 = vmul.f32 1.442695, %v2023_v24 }
 0x1f0   :  { %v3112_v53 = vpop.eup %3111  ;;  %2271 = vadd.xlane.f32.xlu1 %v2270_v1  ;;  %v2028_v19 = vmul.f32 %v5515_v40, %v7220_v0  ;;  %v1656_v55 = vmul.f32 %v7221_v51, %v7174_v16  ;;  %v1657_v35 = vmul.f32 %v7222_v18, %v7176_v12  ;;  %v2153_v21 = vmul.f32 1.442695, %v2031_v41  ;;  %v7226_v18 = vld [vmem:[#allocation3_spill] sm:$0xff] }
 0x1f1   :  { %v3114_v10 = vpop.eup %3113  ;;  %v5854_v56 = vmul.f32 1.442695, %v2032_v34  ;;  %3123 = vpow2.f32 %v2141_v25  ;;  %v7223_v23 = vmin.f32 %v7137_v11, 1.0  ;;  %v2267_v1 = vadd.f32 %v2193_v59, %v2192_v37  ;;  %v7225_v11 = vld [vmem:[#allocation2_spill] sm:$0xff] }
 0x1f2   :  { %v3116_v26 = vpop.eup %3115  ;;  %3125 = vpow2.f32 %v2143_v57  ;;  %v2139_v24 = vmul.f32 1.442695, %v2024_v14  ;;  %v5858_v50 = vadd.f32 %v1657_v35, %v1656_v55  ;;  %v1606_v40 = vsub.f32 1.5, %v1605_v5  ;;  %v7227_v5 = vld [vmem:[#allocation13_spill] sm:$0xff] }
 0x1f3   :  { %v2332_v49 = vmul.f32 1.442695, %v7223_v23  ;;  %v3118_v0 = vpop.eup %3117  ;;  %v2145_v16 = vmul.f32 1.442695, %v2027_v48  ;;  %v7224_v12 = vmin.f32 %v7133_v8, 1.0  ;;  %v2264_v34 = vadd.f32 %v2191_v27, %v2190_v22  ;;  %v7228_v57 = vld [vmem:[#allocation37_spill] sm:$0xff] }
 0x1f4   :  { %v3120_v41 = vpop.eup %3119  ;;  %2268 = vadd.xlane.f32.xlu2 %v2267_v1  ;;  %v2147_v25 = vmul.f32 1.442695, %v2028_v19  ;;  %v5864_v23 = vadd.f32 %v7226_v18, %v7225_v11  ;;  %v2198_v14 = vmul.f32 %v3112_v53, %v4954_v38  ;;  %v2199_v59 = vmul.f32 %v3114_v10, %v4980_v63  ;;  %v1702_v19 = vpop.xlane.xlu2 %1701  ;;  %v7230_v1 = vld [vmem:[#allocation34_spill] sm:$0xff] }
 0x1f5   :  { %3127 = vpow2.f32 %v2332_v49  ;;  %v2330_v51 = vmul.f32 1.442695, %v7224_v12  ;;  %v3122_v37 = vpop.eup %3121  ;;  %v5870_v48 = vadd.f32 %v7228_v57, %v7227_v5  ;;  %v2196_v8 = vmul.f32 %v3116_v26, %v4954_v38  ;;  %v2239_v10 = vpop.xlane.xlu0 %2238  ;;  %v7235_v57 = vld [vmem:[#allocation7_spill] sm:$0xff] }
 0x1f6   :  { %3129 = vpow2.f32 %v2137_v4  ;;  %2265 = vadd.xlane.f32.xlu0 %v2264_v34  ;;  %v2197_v22 = vmul.f32 %v3118_v0, %v4980_v63  ;;  %v7229_v27 = vmin.f32 %v4998_v54, 1.0  ;;  %v5877_v53 = vmul.f32 %v5645_v20, %v1606_v40  ;;  %v7231_v40 = vld [vmem:[#allocation82_spill] sm:$0xff]  ;;  %v7234_v34 = vld [vmem:[#allocation77_spill] sm:$0xff] }
 0x1f7   :  { %3131 = vpow2.f32 %v2330_v51  ;;  %v3124_v55 = vpop.eup %3123  ;;  %vm1608_vm13 = vweird.f32 %v5572_v2  ;;  %vm1609_vm10 = vweird.f32 %v5645_v20  ;;  %v2200_v35 = vmul.f32 %v3120_v41, %v4954_v38  ;;  %v7232_v0 = vld [vmem:[#allocation38_spill] sm:$0xff] }
 0x1f8   :  { %3133 = vpow2.f32 %v2139_v24  ;;  %v2334_v4 = vmul.f32 1.442695, %v7229_v27  ;;  %v1780_v49 = vmin.f32 %v5203_v29, 1.0  ;;  %v3126_v26 = vpop.eup %3125  ;;  %1740 = vadd.xlane.f32.xlu1 %v7230_v1  ;;  %v2201_v54 = vmul.f32 %v3122_v37, %v4980_v63  ;;  %v7236_v27 = vld [vmem:[#allocation6_spill] sm:$0xff]  ;;  %vm1610_vm3 = vmor %vm1608_vm13, %vm1609_vm10 }
 0x1f9   :  { %3135 = vpow2.f32 %v2145_v16  ;;  %v1812_v24 = vmul.f32 %v1702_v19, %v5203_v29  ;;  %v5888_v12 = vadd.f32 %v7232_v0, %v7231_v40  ;;  %v7233_v41 = vsub.f32 %v5643_v6, %v5651_v17 }
 0x1fa   :  { %3137 = vpow2.f32 %v2147_v25  ;;  %vm2427_vm15 = vcmp.gt.f32.partialorder %v7140_v62, 0.0  ;;  %v1844_v11 = vmul.f32 %v7234_v34, %v1780_v49  ;;  %v2276_v18 = vadd.f32 %v2199_v59, %v2198_v14  ;;  %v7237_v59 = vld [vmem:[#allocation62_spill] sm:$0xff] }
 0x1fb   :  { %v3128_v51 = vpop.eup %3127  ;;  %v1918_v16 = vsel %vm1900_vm14, %v7233_v41, 0.0  ;;  %3139 = vpow2.f32 %v2334_v4  ;;  %v2273_v37 = vadd.f32 %v2197_v22, %v2196_v8  ;;  %v5900_v19 = vadd.f32 %v7236_v27, %v7235_v57  ;;  %v7238_v8 = vld [vmem:[#allocation56_spill] sm:$0xff]  ;;  %v7240_v41 = vld [vmem:[#allocation61_spill] sm:$0xff] }
 0x1fc   :  { %v3130_v25 = vpop.eup %3129  ;;  %v2395_v5 = vsub.f32 %v2239_v10, %v3128_v51  ;;  %v2222_v6 = vmul.f32 %v3124_v55, %v4954_v38  ;;  %vm2426_vm6 = vcmp.gt.f32.partialorder %v7134_v13, 0.0  ;;  %3141 = vpow2.f32 %v2153_v21  ;;  %2277 = vadd.xlane.f32.xlu2 %v2276_v18  ;;  %v2242_v55 = vpop.xlane.xlu1 %2241 }
 0x1fd   :  { %v3132_v1 = vpop.eup %3131  ;;  %v1876_v17 = vsub.f32 %v1812_v24, %v1844_v11  ;;  %v2279_v40 = vadd.f32 %v2201_v54, %v2200_v35  ;;  %v5909_v22 = vadd.f32 %v7238_v8, %v7237_v59  ;;  %v2223_v51 = vmul.f32 %v3126_v26, %v4980_v63  ;;  %v7239_v24 = vld [vmem:[#allocation88_spill] sm:$0xff]  ;;  %v1711_v26 = vpop.xlane.xlu2 %1710 }
 0x1fe   :  { %v3134_v4 = vpop.eup %3133  ;;  %v2459_v0 = vsel %vm2427_vm15, %v2395_v5, 1.0  ;;  %v2394_v14 = vsub.f32 %v5842_v39, %v3132_v1  ;;  %v5915_v11 = vadd.f32 %v7240_v41, %v7239_v24  ;;  %2274 = vadd.xlane.f32.xlu0 %v2273_v37  ;;  %v1783_v18 = vmin.f32 %v5396_v33, 1.0 }
 0x1ff   :  { %v3136_v10 = vpop.eup %3135  ;;  %3143 = vlog2.f32 %v2459_v0  ;;  %v1916_v21 = vsel %vm1900_vm14, %v1876_v17, 0.0  ;;  %v2220_v57 = vmul.f32 %v3130_v25, %v4954_v38  ;;  %vm2428_vm4 = vcmp.gt.f32.partialorder %v7147_v42, 0.0 }
 0x200   :  { %v3138_v35 = vpop.eup %3137  ;;  %v2458_v39 = vsel %vm2426_vm6, %v2394_v14, 1.0  ;;  %3145 = vpow2.f32 %v5854_v56  ;;  %v1917_v54 = vadd.f32 %v1916_v21, %v5738_v52  ;;  %v1815_v27 = vmul.f32 %v1711_v26, %v5396_v33  ;;  %2280 = vadd.xlane.f32.xlu1 %v2279_v40  ;;  %v7241_v56 = vld [vmem:[#allocation44_spill] sm:$0xff] }
 0x201   :  { %v3140_v5 = vpop.eup %3139  ;;  %3147 = vlog2.f32 %v2458_v39  ;;  %v2221_v37 = vmul.f32 %v3134_v4, %v4980_v63  ;;  %v1847_v52 = vmul.f32 %v7241_v56, %v1783_v18  ;;  %v2151_v14 = vmul.f32 1.442695, %v5786_v3 }
 0x202   :  { %v2396_v1 = vsub.f32 %v2242_v55, %v3140_v5  ;;  %v1919_v17 = vadd.f32 %v1918_v16, %v1917_v54  ;;  %v3142_v0 = vpop.eup %3141  ;;  %v7242_v25 = vsub.f32 %v5758_v46, %v5755_v32  ;;  %v2312_v8 = vadd.f32 %v2223_v51, %v2222_v6  ;;  %v7243_v54 = vld [vmem:[#allocation89_spill] sm:$0xff] }
 0x203   :  { %v2224_v21 = vmul.f32 %v3136_v10, %v4954_v38  ;;  %v2225_v16 = vmul.f32 %v3138_v35, %v4980_v63  ;;  %v1879_v40 = vsub.f32 %v1815_v27, %v1847_v52  ;;  %v2157_v3 = vmul.f32 1.442695, %v5816_v61  ;;  %v7247_v52 = vld [vmem:[#allocation121_spill] sm:$0xff] }
 0x204   :  { %v1920_v59 = vsel %vm1900_vm14, %v7242_v25, 0.0  ;;  %v2460_v4 = vsel %vm2428_vm4, %v2396_v1, 1.0  ;;  %v2159_v32 = vmul.f32 1.442695, %v5822_v7  ;;  %v5944_v46 = vsel %vm1610_vm3, %v5645_v20, %v5877_v53  ;;  %2313 = vadd.xlane.f32.xlu2 %v2312_v8  ;;  %v7244_v53 = vld [vmem:[#allocation120_spill] sm:$0xff] }
 0x205   :  { %v1921_v55 = vadd.f32 %v1920_v59, %v1919_v17  ;;  %v3144_v24 = vpop.eup %3143  ;;  %3149 = vlog2.f32 %v2460_v4  ;;  %v2309_v10 = vadd.f32 %v2221_v37, %v2220_v57  ;;  %v1922_v51 = vsel %vm1900_vm14, %v1879_v40, 0.0 }
 0x206   :  { %v3146_v6 = vpop.eup %3145  ;;  %v2493_v2 = vmul.f32 0.6931472, %v3144_v24  ;;  %3151 = vpow2.f32 %v5812_v30  ;;  %v2315_v61 = vadd.f32 %v2225_v16, %v2224_v21  ;;  %v1790_v20 = vmin.f32 %v7243_v54, 1.0  ;;  %v7246_v30 = vld [vmem:[#allocation94_spill] sm:$0xff]  ;;  %v2290_v16 = vpop.xlane.xlu1 %2289 }
 0x207   :  { %v3148_v41 = vpop.eup %3147  ;;  %3153 = vpow2.f32 %v2151_v14  ;;  %v1923_v35 = vadd.f32 %v1922_v51, %v1921_v55  ;;  %2310 = vadd.xlane.f32.xlu0 %v2309_v10  ;;  %v2035_v26 = vmul.f32 %v5944_v46, %v7244_v53  ;;  %v7245_v5 = vmin.f32 %v5098_v45, 1.0  ;;  %v7249_v55 = vld [vmem:[#allocation14_spill] sm:$0xff] }
 0x208   :  { %v2555_v7 = vmul.f32 %v7140_v62, %v2493_v2  ;;  %v2491_v39 = vmul.f32 0.6931472, %v3148_v41  ;;  %3155 = vpow2.f32 %v2157_v3  ;;  %v1788_v27 = vmin.f32 %v7246_v30, 1.0  ;;  %2316 = vadd.xlane.f32.xlu1 %v2315_v61  ;;  %v7255_v2 = vld [vmem:[#allocation18_spill] sm:$0xff] }
 0x209   :  { %v2336_v57 = vmul.f32 1.442695, %v7245_v5  ;;  %3157 = vpow2.f32 %v2159_v32  ;;  %v2366_v62 = vmul.f32 1.442695, %v1790_v20  ;;  %v2036_v14 = vmul.f32 %v5944_v46, %v7247_v52  ;;  %v7253_v32 = vld [vmem:[#allocation19_spill] sm:$0xff]  ;;  %v7257_v41 = vld [vmem:[#allocation22_spill] sm:$0xff] }
 0x20a   :  { %v2587_v37 = vsel %vm1900_vm14, %v2555_v7, 0.0  ;;  %v2554_v1 = vmul.f32 %v7134_v13, %v2491_v39  ;;  %v2228_v25 = vmul.f32 %v3142_v0, %v4954_v38  ;;  %v2229_v45 = vmul.f32 %v3146_v6, %v4980_v63  ;;  %v7251_v0 = vld [vmem:[#allocation15_spill] sm:$0xff] }
 0x20b   :  { %v3150_v17 = vpop.eup %3149  ;;  %3159 = vpow2.f32 %v2336_v57  ;;  %v2362_v13 = vmul.f32 1.442695, %v1788_v27  ;;  %v7248_v40 = vmov 0.0   ;;  %vm7250_vm11 = vcmp.ge.f32.partialorder %v7249_v55, 0.0 }
 0x20c   :  { %v3152_v59 = vpop.eup %3151  ;;  %v2586_v8 = vsel %vm1900_vm14, %v2554_v1, 0.0  ;;  %v2495_v21 = vmul.f32 0.6931472, %v3150_v17  ;;  %3161 = vpow2.f32 %v2366_v62  ;;  %v5969_v24 = vsel %vm7250_vm11, 1.0, %v7248_v40  ;;  %1746 = vadd.xlane.f32.xlu2 %v5840_v60 }
 0x20d   :  { %v3154_v4 = vpop.eup %3153  ;;  %vm7252_vm2 = vcmp.ge.f32.partialorder %v7251_v0, 0.0  ;;  %vm7254_vm5 = vcmp.ge.f32.partialorder %v7253_v32, 0.0  ;;  %v2588_v10 = vadd.f32 %v2587_v37, %v2586_v8  ;;  %vm7256_vm7 = vcmp.ge.f32.partialorder %v7255_v2, 0.0 }
 0x20e   :  { %v5974_v3 = vsel %vm7252_vm2, 1.0, %v7248_v40  ;;  %v5979_v6 = vsel %vm7254_vm5, 1.0, %v7248_v40  ;;  %v5984_v51 = vsel %vm7256_vm7, 1.0, %v7248_v40  ;;  %vm7258_vm9 = vcmp.ge.f32.partialorder %v7257_v41, 0.0  ;;  %v3156_v53 = vpop.eup %3155 }
 0x20f   :  { %v5989_v61 = vsel %vm7258_vm9, 1.0, %v7248_v40  ;;  %v2161_v7 = vmul.f32 1.442695, %v2035_v26  ;;  %v2556_v39 = vmul.f32 %v7147_v42, %v2495_v21  ;;  %v2163_v5 = vmul.f32 1.442695, %v2036_v14  ;;  %v3158_v17 = vpop.eup %3157  ;;  %1743 = vadd.xlane.f32.xlu0 %v5858_v50  ;;  %v7260_v26 = vld [vmem:[#allocation106_spill] sm:$0xff] }
 0x210   :  { %v7259_v57 = vsub.f32 %v5722_v36, %v5728_v43  ;;  %v2321_v1 = vadd.f32 %v2229_v45, %v2228_v25  ;;  %v2226_v62 = vmul.f32 %v3152_v59, %v4954_v38  ;;  %3163 = vpow2.f32 %v2362_v13  ;;  %1749 = vadd.xlane.f32.xlu1 %v5864_v23  ;;  %v7261_v50 = vld [vmem:[#allocation39_spill] sm:$0xff]  ;;  %v2245_v45 = vpop.xlane.xlu2 %2244 }
 0x211   :  { %v2589_v52 = vsel %vm1900_vm14, %v2556_v39, 0.0  ;;  %v1787_v60 = vmin.f32 %v5780_v9, 1.0  ;;  %v1789_v42 = vmin.f32 %v7260_v26, 1.0  ;;  %v3160_v8 = vpop.eup %3159  ;;  %v2227_v14 = vmul.f32 %v3154_v4, %v4980_v63 }
 0x212   :  { %v1924_v37 = vsel %vm1900_vm14, %v7259_v57, 0.0  ;;  %v6003_v21 = vadd.f32 %v2589_v52, %v2588_v10  ;;  %v1785_v36 = vmin.f32 %v5554_v31, 1.0  ;;  %v3162_v25 = vpop.eup %3161  ;;  %vm2444_vm0 = vcmp.gt.f32.partialorder %v5989_v61, 0.0  ;;  %v1723_v10 = vpop.xlane.xlu1 %1722 }
 0x213   :  { %v6006_v43 = vadd.f32 %v1924_v37, %v1923_v35  ;;  %vm2429_vm1 = vcmp.gt.f32.partialorder %v7261_v50, 0.0  ;;  %v6014_v59 = vmul.f32 %v5979_v6, %v1787_v60  ;;  %v2364_v13 = vmul.f32 1.442695, %v1789_v42 }
 0x214   :  { %v2412_v4 = vsub.f32 %v2290_v16, %v3162_v25  ;;  %v2397_v55 = vsub.f32 %v2245_v45, %v3160_v8  ;;  %v6021_v35 = vmul.f32 %v5974_v3, %v1785_v36  ;;  %v1786_v23 = vmin.f32 %v5612_v28, 1.0  ;;  %2322 = vadd.xlane.f32.xlu2 %v2321_v1  ;;  %v7264_v45 = vld [vmem:[#allocation17_spill] sm:$0xff] }
 0x215   :  { %v2230_v0 = vmul.f32 %v3156_v53, %v4954_v38  ;;  %v2231_v32 = vmul.f32 %v3158_v17, %v4980_v63  ;;  %3165 = vpow2.f32 %v2161_v7  ;;  %v7262_v2 = vmin.f32 %v7161_v58, 1.0  ;;  %v2284_v53 = vpop.xlane.xlu0 %2283 }
 0x216   :  { %v2476_v39 = vsel %vm2444_vm0, %v2412_v4, 1.0  ;;  %v2461_v57 = vsel %vm2429_vm1, %v2397_v55, 1.0  ;;  %v6029_v16 = vmul.f32 %v1723_v10, %v5780_v9  ;;  %3167 = vpow2.f32 %v2364_v13  ;;  %v3164_v37 = vpop.eup %3163  ;;  %v7266_v4 = vld [vmem:[#allocation11_spill] sm:$0xff] }
 0x217   :  { %v2340_v41 = vmul.f32 1.442695, %v7262_v2  ;;  %v2318_v52 = vadd.f32 %v2227_v14, %v2226_v62  ;;  %3169 = vlog2.f32 %v2476_v39  ;;  %vm2442_vm8 = vcmp.gt.f32.partialorder %v5984_v51, 0.0  ;;  %v7263_v62 = vld [vmem:[#allocation50_spill] sm:$0xff] }
 0x218   :  { %v6035_v7 = vmul.f32 %v5969_v24, %v1786_v23  ;;  %3171 = vlog2.f32 %v2461_v57  ;;  %v2410_v58 = vsub.f32 %v2284_v53, %v3164_v37  ;;  %v1883_v17 = vsub.f32 %v6029_v16, %v6014_v59  ;;  %v7268_v39 = vld [vmem:[#allocation70_spill] sm:$0xff]  ;;  %v7282_v59 = vld [vmem:[#allocation12_spill] sm:$0xff] }
 0x219   :  { %2319 = vadd.xlane.f32.xlu0 %v2318_v52  ;;  %v2324_v8 = vadd.f32 %v2231_v32, %v2230_v0  ;;  %3173 = vpow2.f32 %v2163_v5  ;;  %vm552_vm12 = vcmp.eq.s32.totalorder %v7263_v62, 1  ;;  %vm7265_vm13 = vcmp.ge.f32.partialorder %v7264_v45, 0.0  ;;  %v7269_v0 = vld [vmem:[#allocation60_spill] sm:$0xff]  ;;  %v2287_v5 = vpop.xlane.xlu2 %2286  ;;  %v7275_v45 = vld [vmem:[#allocation65_spill] sm:$0xff] }
 0x21a   :  { %v2474_v25 = vsel %vm2442_vm8, %v2410_v58, 1.0  ;;  %3175 = vpow2.f32 %v2340_v41  ;;  %v6043_v13 = vsel %vm7265_vm13, 1.0, %v7248_v40  ;;  %v7267_v55 = vmin.f32 %v7266_v4, 1.0  ;;  %v7270_v41 = vld [vmem:[#allocation72_spill] sm:$0xff] }
 0x21b   :  { %v3166_v1 = vpop.eup %3165  ;;  %2325 = vadd.xlane.f32.xlu1 %v2324_v8  ;;  %3177 = vlog2.f32 %v2474_v25  ;;  %vm422_vm10 = vcmp.eq.f32.partialorder %v7269_v0, %v7268_v39  ;;  %vm2443_vm15 = vcmp.gt.f32.partialorder %v6043_v13, 0.0  ;;  %vm423_vm6 = vcmp.eq.f32.partialorder %v7269_v0, %v7270_v41 }
 0x21c   :  { %v3168_v14 = vpop.eup %3167  ;;  %v2338_v10 = vmul.f32 1.442695, %v7267_v55  ;;  %vm6054_vm4 = vmand %vm422_vm10, %vm552_vm12  ;;  %1755 = vadd.xlane.f32.xlu2 %v5870_v48  ;;  %vm2431_vm11 = vcmp.gt.f32.partialorder %v7275_v45, 0.0  ;;  %v7283_v16 = vmin.f32 %v7282_v59, 1.0  ;;  %v2346_v59 = vmul.f32 1.442695, %v1780_v49 }
 0x21d   :  { %v3170_v2 = vpop.eup %3169  ;;  %v2411_v52 = vsub.f32 %v2287_v5, %v3168_v14  ;;  %vm6060_vm3 = vmand %vm423_vm6, %vm552_vm12  ;;  %v1717_v25 = vpop.xlane.xlu0 %1716  ;;  %v2770_v5 = vsel %vm6054_vm4, 1.0, %v7248_v40  ;;  %vm2434_vm8 = vcmp.gt.f32.partialorder %v7234_v34, 0.0  ;;  %vm2437_vm4 = vcmp.gt.f32.partialorder %v7241_v56, 0.0 }
 0x21e   :  { %v3172_v32 = vpop.eup %3171  ;;  %v2527_v37 = vmul.f32 0.6931472, %v3170_v2  ;;  %v1817_v14 = vmul.f32 %v1717_v25, %v5554_v31  ;;  %v2251_v2 = vpop.xlane.xlu1 %2250  ;;  %3179 = vpow2.f32 %v2338_v10  ;;  %v2232_v10 = vmul.f32 %v3166_v1, %v4954_v38  ;;  %v7276_v25 = vld [vmem:[#allocation53_spill] sm:$0xff] }
 0x21f   :  { %v3174_v53 = vpop.eup %3173  ;;  %v2497_v8 = vmul.f32 0.6931472, %v3172_v32  ;;  %v2475_v39 = vsel %vm2443_vm15, %v2411_v52, 1.0  ;;  %v2771_v32 = vsel %vm6060_vm3, 1.0, %v7248_v40 }
 0x220   :  { %v3176_v4 = vpop.eup %3175  ;;  %v6067_v55 = vmul.f32 %v5989_v61, %v2527_v37  ;;  %3181 = vlog2.f32 %v2475_v39  ;;  %v1881_v37 = vsub.f32 %v1817_v14, %v6021_v35  ;;  %v1672_v35 = vmul.f32 %v2770_v5, %v7207_v15  ;;  %v7277_v14 = vld [vmem:[#allocation51_spill] sm:$0xff] }
 0x221   :  { %v3178_v62 = vpop.eup %3177  ;;  %1752 = vadd.xlane.f32.xlu0 %v5888_v12  ;;  %v2557_v0 = vmul.f32 %v7261_v50, %v2497_v8  ;;  %v2399_v48 = vsub.f32 %v2251_v2, %v3176_v4  ;;  %v2233_v12 = vmul.f32 %v3174_v53, %v4980_v63  ;;  %v1720_v63 = vpop.xlane.xlu2 %1719  ;;  %v1793_v4 = vmin.f32 %v7276_v25, 1.0 }
 0x222   :  { %v2523_v41 = vmul.f32 0.6931472, %v3178_v62  ;;  %v1926_v58 = vsel %vm1900_vm14, %v1881_v37, 0.0  ;;  %v1818_v53 = vmul.f32 %v1720_v63, %v5612_v28  ;;  %vm2430_vm2 = vcmp.gt.f32.partialorder %v7277_v14, 0.0  ;;  %v7280_v63 = vld [vmem:[#allocation25_spill] sm:$0xff] }
 0x223   :  { %1758 = vadd.xlane.f32.xlu1 %v5900_v19  ;;  %v2591_v50 = vsel %vm1900_vm14, %v2557_v0, 0.0  ;;  %v2463_v52 = vsel %vm2431_vm11, %v2399_v48, 1.0  ;;  %v1673_v19 = vmul.f32 %v2771_v32, %v7209_v44  ;;  %v1927_v38 = vadd.f32 %v1926_v58, %v6006_v43  ;;  %v7279_v58 = vld [vmem:[#allocation41_spill] sm:$0xff] }
 0x224   :  { %v2592_v57 = vadd.f32 %v2591_v50, %v6003_v21  ;;  %v6087_v8 = vmul.f32 %v5984_v51, %v2523_v41  ;;  %3183 = vlog2.f32 %v2463_v52  ;;  %v3180_v1 = vpop.eup %3179  ;;  %1761 = vadd.xlane.f32.xlu2 %v5909_v22  ;;  %v2327_v21 = vadd.f32 %v2233_v12, %v2232_v10  ;;  %v7278_v10 = vld [vmem:[#allocation100_spill] sm:$0xff] }
 0x225   :  { %v2248_v2 = vpop.xlane.xlu0 %2247  ;;  %v1882_v15 = vsub.f32 %v1818_v53, %v6035_v7  ;;  %v1766_v44 = vadd.f32 %v1673_v19, %v1672_v35  ;;  %v2372_v22 = vmul.f32 1.442695, %v1793_v4  ;;  %v1791_v12 = vmin.f32 %v7278_v10, 1.0 }
 0x226   :  { %v3182_v39 = vpop.eup %3181  ;;  %v2398_v0 = vsub.f32 %v2248_v2, %v3180_v1  ;;  %v1930_v7 = vsel %vm1900_vm14, %v1883_v17, 0.0  ;;  %vm7281_vm5 = vcmp.ge.f32.partialorder %v7280_v63, 0.0  ;;  %v2342_v17 = vmul.f32 1.442695, %v7283_v16 }
 0x227   :  { %v2525_v62 = vmul.f32 0.6931472, %v3182_v39  ;;  %v1928_v5 = vsel %vm1900_vm14, %v1882_v15, 0.0  ;;  %v2368_v35 = vmul.f32 1.442695, %v1791_v12  ;;  %v6117_v1 = vsel %vm7281_vm5, 1.0, %v7248_v40 }
 0x228   :  { %v2462_v32 = vsel %vm2430_vm2, %v2398_v0, 1.0  ;;  %v1929_v37 = vadd.f32 %v1928_v5, %v1927_v38  ;;  %vm2447_vm7 = vcmp.gt.f32.partialorder %v6117_v1, 0.0  ;;  %v7284_v0 = vld [vmem:[#allocation21_spill] sm:$0xff] }
 0x229   :  { %2328 = vadd.xlane.f32.xlu0 %v2327_v21  ;;  %v6099_v48 = vmul.f32 %v6043_v13, %v2525_v62  ;;  %3185 = vlog2.f32 %v2462_v32  ;;  %vm7285_vm9 = vcmp.ge.f32.partialorder %v7284_v0, 0.0 }
 0x22a   :  { %v3184_v43 = vpop.eup %3183  ;;  %v1931_v52 = vadd.f32 %v1930_v7, %v1929_v37  ;;  %3187 = vpow2.f32 %v2372_v22 }
 0x22b   :  { %1767 = vadd.xlane.f32.xlu1 %v1766_v44  ;;  %v2501_v41 = vmul.f32 0.6931472, %v3184_v43  ;;  %3189 = vpow2.f32 %v2368_v35  ;;  %v6129_v44 = vsel %vm7285_vm9, 1.0, %v7248_v40  ;;  %vm2440_vm9 = vcmp.gt.f32.partialorder %v5969_v24, 0.0 }
 0x22c   :  { %1770 = vadd.xlane.f32.xlu2 %v7279_v58  ;;  %3191 = vpow2.f32 %v2342_v17  ;;  %vm2445_vm0 = vcmp.gt.f32.partialorder %v6129_v44, 0.0 }
 0x22d   :  { %v2559_v50 = vmul.f32 %v7275_v45, %v2501_v41  ;;  %v2299_v39 = vpop.xlane.xlu1 %2298 }
 0x22f   :  { %v3186_v19 = vpop.eup %3185  ;;  %v2595_v43 = vsel %vm1900_vm14, %v2559_v50, 0.0 }
 0x230   :  { %v2499_v38 = vmul.f32 0.6931472, %v3186_v19  ;;  %v3188_v45 = vpop.eup %3187 }
 0x231   :  { %1764 = vadd.xlane.f32.xlu0 %v5915_v11  ;;  %v2415_v21 = vsub.f32 %v2299_v39, %v3188_v45  ;;  %v6124_v11 = vpop.xlane.xlu2 %2295  ;;  %v1853_v45 = vmul.f32 %v6043_v13, %v1789_v42 }
 0x232   :  { %v2558_v53 = vmul.f32 %v7277_v14, %v2499_v38  ;;  %v3190_v14 = vpop.eup %3189 }
 0x233   :  { %v2479_v15 = vsel %vm2447_vm7, %v2415_v21, 1.0  ;;  %v2293_v5 = vpop.xlane.xlu0 %2292  ;;  %v3192_v37 = vpop.eup %3191 }
 0x234   :  { %v2593_v2 = vsel %vm1900_vm14, %v2558_v53, 0.0  ;;  %3193 = vlog2.f32 %v2479_v15  ;;  %v2413_v22 = vsub.f32 %v2293_v5, %v3190_v14  ;;  %v1852_v53 = vmul.f32 %v5984_v51, %v1788_v27 }
 0x235   :  { %v2594_v62 = vadd.f32 %v2593_v2, %v2592_v57  ;;  %v7286_v57 = vld [vmem:[#allocation63_spill] sm:$0xff]  ;;  %v7287_v2 = vmin.f32 %v5200_v47, 1.0  ;;  %v1854_v27 = vmul.f32 %v5989_v61, %v1790_v20 }
 0x236   :  { %v2477_v41 = vsel %vm2445_vm0, %v2413_v22, 1.0  ;;  %vm2432_vm1 = vcmp.gt.f32.partialorder %v7286_v57, 0.0 }
 0x237   :  { %v2596_v32 = vadd.f32 %v2595_v43, %v2594_v62  ;;  %3195 = vlog2.f32 %v2477_v41  ;;  %v2344_v29 = vmul.f32 1.442695, %v7287_v2 }
 0x238   :  { %v2254_v7 = vpop.xlane.xlu1 %2253 }
 0x239   :  { %v2400_v35 = vsub.f32 %v2254_v7, %v3192_v37  ;;  %v1729_v19 = vpop.xlane.xlu2 %1728 }
 0x23a   :  { %v3194_v58 = vpop.eup %3193  ;;  %v1821_v50 = vmul.f32 %v1729_v19, %v7260_v26  ;;  %v7288_v19 = vld [vmem:[#allocation48_spill] sm:$0xff] }
 0x23b   :  { %v2533_v38 = vmul.f32 0.6931472, %v3194_v58  ;;  %v2464_v63 = vsel %vm2432_vm1, %v2400_v35, 1.0  ;;  %v1726_v17 = vpop.xlane.xlu0 %1725  ;;  %vm2433_vm12 = vcmp.gt.f32.partialorder %v7288_v19, 0.0  ;;  %vm2439_vm1 = vcmp.gt.f32.partialorder %v5974_v3, 0.0 }
 0x23c   :  { %3197 = vlog2.f32 %v2464_v63  ;;  %v1820_v39 = vmul.f32 %v1726_v17, %v7246_v30  ;;  %v1885_v62 = vsub.f32 %v1821_v50, %v1853_v45 }
 0x23d   :  { %v6138_v16 = vmul.f32 %v6117_v1, %v2533_v38  ;;  %v3196_v21 = vpop.eup %3195  ;;  %3199 = vpow2.f32 %v2346_v59  ;;  %v7289_v59 = vld [vmem:[#allocation47_spill] sm:$0xff] }
 0x23e   :  { %v2529_v49 = vmul.f32 0.6931472, %v3196_v21  ;;  %v1884_v15 = vsub.f32 %v1820_v39, %v1852_v53  ;;  %3201 = vpow2.f32 %v2344_v29  ;;  %v1934_v13 = vsel %vm1900_vm14, %v1885_v62, 0.0  ;;  %v7291_v29 = vld [vmem:[#allocation116_spill] sm:$0xff] }
 0x23f   :  { %v7290_v17 = vmin.f32 %v7289_v59, 1.0 }
 0x240   :  { %v1732_v0 = vpop.xlane.xlu1 %1731  ;;  %v6150_v43 = vmul.f32 %v6129_v44, %v2529_v49  ;;  %v1932_v26 = vsel %vm1900_vm14, %v1884_v15, 0.0 }
 0x241   :  { %v1822_v30 = vmul.f32 %v1732_v0, %v7243_v54  ;;  %v1933_v42 = vadd.f32 %v1932_v26, %v1931_v52  ;;  %v2348_v45 = vmul.f32 1.442695, %v7290_v17 }
 0x242   :  { %v3198_v51 = vpop.eup %3197 }
 0x243   :  { %v2503_v47 = vmul.f32 0.6931472, %v3198_v51  ;;  %v1886_v14 = vsub.f32 %v1822_v30, %v1854_v27  ;;  %v1935_v5 = vadd.f32 %v1934_v13, %v1933_v42  ;;  %v3200_v22 = vpop.eup %3199  ;;  %v7292_v51 = vld [vmem:[#allocation66_spill] sm:$0xff] }
 0x244   :  { %v2260_v7 = vpop.xlane.xlu2 %2259  ;;  %v3202_v61 = vpop.eup %3201  ;;  %v7293_v42 = vmin.f32 %v7292_v51, 1.0 }
 0x245   :  { %v2560_v41 = vmul.f32 %v7286_v57, %v2503_v47  ;;  %v1936_v37 = vsel %vm1900_vm14, %v1886_v14, 0.0  ;;  %v2402_v20 = vsub.f32 %v2260_v7, %v3200_v22  ;;  %v7294_v14 = vld [vmem:[#allocation49_spill] sm:$0xff]  ;;  %v7295_v22 = vld [vmem:[#allocation55_spill] sm:$0xff] }
 0x246   :  { %v6161_v58 = vadd.f32 %v1936_v37, %v1935_v5  ;;  %v2354_v47 = vmul.f32 1.442695, %v7293_v42  ;;  %vm2435_vm13 = vcmp.gt.f32.partialorder %v7294_v14, 0.0  ;;  %v7302_v42 = vld [vmem:[#allocation76_spill] sm:$0xff] }
 0x247   :  { %v2597_v54 = vsel %vm1900_vm14, %v2560_v41, 0.0  ;;  %v2466_v35 = vsel %vm2434_vm8, %v2402_v20, 1.0  ;;  %v1796_v41 = vmin.f32 %v7295_v22, 1.0  ;;  %v7296_v20 = vld [vmem:[#allocation58_spill] sm:$0xff]  ;;  %vm2438_vm6 = vcmp.gt.f32.partialorder %v7302_v42, 0.0 }
 0x248   :  { %v2598_v52 = vadd.f32 %v2597_v54, %v2596_v32  ;;  %v2257_v38 = vpop.xlane.xlu0 %2256  ;;  %3203 = vlog2.f32 %v2466_v35  ;;  %v1792_v32 = vmin.f32 %v7291_v29, 1.0  ;;  %v1795_v54 = vmin.f32 %v7296_v20, 1.0 }
 0x249   :  { %v2401_v63 = vsub.f32 %v2257_v38, %v3202_v61  ;;  %v2352_v61 = vmul.f32 1.442695, %v1783_v18  ;;  %v7298_v38 = vld [vmem:[#allocation20_spill] sm:$0xff]  ;;  %vm2441_vm8 = vcmp.gt.f32.partialorder %v5979_v6, 0.0 }
 0x24a   :  { %v2370_v0 = vmul.f32 1.442695, %v1792_v32  ;;  %vm7299_vm10 = vcmp.ge.f32.partialorder %v7298_v38, 0.0  ;;  %v2376_v18 = vmul.f32 1.442695, %v1795_v54 }
 0x24b   :  { %v2465_v50 = vsel %vm2433_vm12, %v2401_v63, 1.0  ;;  %v6189_v63 = vsel %vm7299_vm10, 1.0, %v7248_v40 }
 0x24c   :  { %3205 = vlog2.f32 %v2465_v50  ;;  %vm2446_vm15 = vcmp.gt.f32.partialorder %v6189_v63, 0.0 }
 0x24d   :  { %3207 = vpow2.f32 %v2348_v45  ;;  %v2378_v45 = vmul.f32 1.442695, %v1796_v41 }
 0x24e   :  { %v3204_v57 = vpop.eup %3203  ;;  %3209 = vpow2.f32 %v2370_v0 }
 0x24f   :  { %v2507_v53 = vmul.f32 0.6931472, %v3204_v57  ;;  %3211 = vpow2.f32 %v2354_v47  ;;  %v7300_v57 = vld [vmem:[#allocation67_spill] sm:$0xff] }
 0x250   :  { %v7301_v59 = vmin.f32 %v7300_v57, 1.0  ;;  %v7303_v57 = vld [vmem:[#allocation40_spill] sm:$0xff] }
 0x251   :  { %v2562_v2 = vmul.f32 %v7234_v34, %v2507_v53  ;;  %vm2436_vm3 = vcmp.gt.f32.partialorder %v7303_v57, 0.0 }
 0x252   :  { %v3206_v21 = vpop.eup %3205  ;;  %v2350_v17 = vmul.f32 1.442695, %v7301_v59 }
 0x253   :  { %v6167_v39 = vpop.xlane.xlu1 %2307  ;;  %v2505_v49 = vmul.f32 0.6931472, %v3206_v21  ;;  %v3208_v13 = vpop.eup %3207  ;;  %v2601_v34 = vsel %vm1900_vm14, %v2562_v2, 0.0  ;;  %v1856_v2 = vmul.f32 %v6189_v63, %v1792_v32 }
 0x254   :  { %v3210_v0 = vpop.eup %3209 }
 0x255   :  { %v2561_v62 = vmul.f32 %v7288_v19, %v2505_v49  ;;  %v1855_v49 = vmul.f32 %v6129_v44, %v1791_v12  ;;  %v2414_v32 = vsub.f32 %v6124_v11, %v3210_v0  ;;  %v2358_v12 = vmul.f32 1.442695, %v1786_v23  ;;  %v7306_v0 = vld [vmem:[#allocation24_spill] sm:$0xff] }
 0x256   :  { %v2360_v11 = vmul.f32 1.442695, %v1787_v60  ;;  %vm7307_vm2 = vcmp.ge.f32.partialorder %v7306_v0, 0.0 }
 0x257   :  { %v6172_v15 = vpop.xlane.xlu2 %2304  ;;  %v2599_v26 = vsel %vm1900_vm14, %v2561_v62, 0.0  ;;  %v2478_v60 = vsel %vm2446_vm15, %v2414_v32, 1.0 }
 0x258   :  { %v2600_v30 = vadd.f32 %v2599_v26, %v2598_v52  ;;  %v7297_v52 = vld [vmem:[#allocation54_spill] sm:$0xff]  ;;  %v3212_v26 = vpop.eup %3211 }
 0x259   :  { %v6175_v27 = vpop.xlane.xlu0 %2301  ;;  %v1794_v35 = vmin.f32 %v7297_v52, 1.0 }
 0x25a   :  { %v2602_v7 = vadd.f32 %v2601_v34, %v2600_v30  ;;  %v2356_v34 = vmul.f32 1.442695, %v1785_v36 }
 0x25b   :  { %v2263_v5 = vpop.xlane.xlu1 %2262  ;;  %v2374_v21 = vmul.f32 1.442695, %v1794_v35 }
 0x25c   :  { %v2403_v37 = vsub.f32 %v2263_v5, %v3208_v13 }
 0x25e   :  { %v2467_v19 = vsel %vm2435_vm13, %v2403_v37, 1.0 }
 0x25f   :  { %3213 = vlog2.f32 %v2467_v19  ;;  %v1738_v50 = vpop.xlane.xlu2 %1737 }
 0x260   :  { %v1824_v33 = vmul.f32 %v1738_v50, %v7291_v29  ;;  %3215 = vpow2.f32 %v2352_v61 }
 0x261   :  { %v1735_v53 = vpop.xlane.xlu0 %1734  ;;  %3217 = vpow2.f32 %v2350_v17 }
 0x262   :  { %v1823_v62 = vmul.f32 %v1735_v53, %v7278_v10  ;;  %3219 = vpow2.f32 %v2378_v45  ;;  %v1888_v30 = vsub.f32 %v1824_v33, %v1856_v2 }
 0x263   :  { %v2272_v29 = vpop.xlane.xlu1 %2271  ;;  %3221 = vpow2.f32 %v2376_v18 }
 0x264   :  { %v1887_v51 = vsub.f32 %v1823_v62, %v1855_v49  ;;  %v2406_v13 = vsub.f32 %v2272_v29, %v3212_v26  ;;  %3223 = vpow2.f32 %v2374_v21  ;;  %v1940_v23 = vsel %vm1900_vm14, %v1888_v30, 0.0  ;;  %v7304_v49 = vld [vmem:[#allocation23_spill] sm:$0xff]  ;;  %v7308_v26 = vld [vmem:[#allocation28_spill] sm:$0xff] }
 0x265   :  { %v3214_v47 = vpop.eup %3213  ;;  %v1857_v21 = vmul.f32 %v6117_v1, %v1793_v4  ;;  %vm7305_vm11 = vcmp.ge.f32.partialorder %v7304_v49, 0.0  ;;  %vm7309_vm5 = vcmp.ge.f32.partialorder %v7308_v26, 0.0  ;;  %v7310_v4 = vld [vmem:[#allocation59_spill] sm:$0xff] }
 0x266   :  { %v2509_v10 = vmul.f32 0.6931472, %v3214_v47  ;;  %v1938_v44 = vsel %vm1900_vm14, %v1887_v51, 0.0  ;;  %v3216_v5 = vpop.eup %3215  ;;  %v2470_v61 = vsel %vm2438_vm6, %v2406_v13, 1.0  ;;  %v6232_v62 = vsel %vm7305_vm11, 1.0, %v7248_v40  ;;  %v7311_v13 = vld [vmem:[#allocation64_spill] sm:$0xff] }
 0x267   :  { %v1939_v37 = vadd.f32 %v1938_v44, %v6161_v58  ;;  %v2269_v19 = vpop.xlane.xlu2 %2268  ;;  %3225 = vlog2.f32 %v2470_v61  ;;  %v3218_v50 = vpop.eup %3217  ;;  %v6242_v30 = vsel %vm7309_vm5, 1.0, %v7248_v40  ;;  %v1798_v1 = vmin.f32 %v7310_v4, 1.0  ;;  %v7316_v49 = vld [vmem:[#allocation31_spill] sm:$0xff] }
 0x268   :  { %v2563_v28 = vmul.f32 %v7294_v14, %v2509_v10  ;;  %v2405_v38 = vsub.f32 %v2269_v19, %v3216_v5  ;;  %3227 = vpow2.f32 %v2358_v12  ;;  %v3220_v58 = vpop.eup %3219  ;;  %vm2450_vm7 = vcmp.gt.f32.partialorder %v6242_v30, 0.0 }
 0x269   :  { %v2266_v31 = vpop.xlane.xlu0 %2265  ;;  %v1941_v36 = vadd.f32 %v1940_v23, %v1939_v37  ;;  %3229 = vpow2.f32 %v2356_v34  ;;  %v3222_v9 = vpop.eup %3221  ;;  %v1797_v12 = vmin.f32 %v7311_v13, 1.0  ;;  %v2418_v44 = vsub.f32 %v6167_v39, %v3220_v58 }
 0x26a   :  { %v2603_v59 = vsel %vm1900_vm14, %v2563_v28, 0.0  ;;  %v2469_v17 = vsel %vm2437_vm4, %v2405_v38, 1.0  ;;  %v2404_v45 = vsub.f32 %v2266_v31, %v3218_v50  ;;  %v3224_v18 = vpop.eup %3223  ;;  %vm2449_vm0 = vcmp.gt.f32.partialorder %v6232_v62, 0.0 }
 0x26b   :  { %v6223_v14 = vadd.f32 %v2603_v59, %v2602_v7  ;;  %3231 = vlog2.f32 %v2469_v17  ;;  %v1741_v33 = vpop.xlane.xlu1 %1740  ;;  %v6237_v7 = vsel %vm7307_vm2, 1.0, %v7248_v40  ;;  %v2417_v61 = vsub.f32 %v6172_v15, %v3222_v9 }
 0x26c   :  { %v2468_v53 = vsel %vm2436_vm3, %v2404_v45, 1.0  ;;  %v1825_v2 = vmul.f32 %v1741_v33, %v7276_v25  ;;  %3233 = vpow2.f32 %v2360_v11  ;;  %v2382_v31 = vmul.f32 1.442695, %v1798_v1  ;;  %v7312_v33 = vld [vmem:[#allocation26_spill] sm:$0xff] }
 0x26d   :  { %3235 = vlog2.f32 %v2468_v53  ;;  %v3226_v29 = vpop.eup %3225  ;;  %v2416_v59 = vsub.f32 %v6175_v27, %v3224_v18  ;;  %vm7313_vm12 = vcmp.ge.f32.partialorder %v7312_v33, 0.0  ;;  %v7314_v18 = vld [vmem:[#allocation27_spill] sm:$0xff]  ;;  %vm2448_vm10 = vcmp.gt.f32.partialorder %v6237_v7, 0.0 }
 0x26e   :  { %3237 = vlog2.f32 %v2478_v60  ;;  %v1889_v25 = vsub.f32 %v1825_v2, %v1857_v21  ;;  %v3228_v51 = vpop.eup %3227  ;;  %v2515_v47 = vmul.f32 0.6931472, %v3226_v29  ;;  %v6272_v27 = vsel %vm7313_vm12, 1.0, %v7248_v40 }
 0x26f   :  { %v2278_v32 = vpop.xlane.xlu2 %2277  ;;  %v3230_v10 = vpop.eup %3229  ;;  %vm7315_vm13 = vcmp.ge.f32.partialorder %v7314_v18, 0.0  ;;  %vm7317_vm15 = vcmp.ge.f32.partialorder %v7316_v49, 0.0  ;;  %v2481_v29 = vsel %vm2449_vm0, %v2417_v61, 1.0  ;;  %vm2452_vm11 = vcmp.gt.f32.partialorder %v6272_v27, 0.0 }
 0x270   :  { %v1942_v34 = vsel %vm1900_vm14, %v1889_v25, 0.0  ;;  %v2408_v5 = vsub.f32 %v2278_v32, %v3228_v51  ;;  %v2566_v19 = vmul.f32 %v7302_v42, %v2515_v47  ;;  %v2380_v42 = vmul.f32 1.442695, %v1797_v12  ;;  %v7318_v25 = vld [vmem:[#allocation68_spill] sm:$0xff]  ;;  %v7319_v47 = vld [vmem:[#allocation29_spill] sm:$0xff] }
 0x271   :  { %v3232_v37 = vpop.eup %3231  ;;  %v6253_v11 = vadd.f32 %v1942_v34, %v1941_v36  ;;  %v2275_v28 = vpop.xlane.xlu0 %2274  ;;  %v6277_v53 = vsel %vm7315_vm13, 1.0, %v7248_v40  ;;  %v6286_v0 = vsel %vm7317_vm15, 1.0, %v7248_v40  ;;  %v1799_v51 = vmin.f32 %v7318_v25, 1.0  ;;  %v7321_v34 = vld [vmem:[#allocation30_spill] sm:$0xff] }
 0x272   :  { %v3234_v23 = vpop.eup %3233  ;;  %v2513_v38 = vmul.f32 0.6931472, %v3232_v37  ;;  %v2472_v39 = vsel %vm2440_vm9, %v2408_v5, 1.0  ;;  %v2407_v50 = vsub.f32 %v2275_v28, %v3230_v10  ;;  %vm7320_vm6 = vcmp.ge.f32.partialorder %v7319_v47, 0.0 }
 0x273   :  { %v3236_v58 = vpop.eup %3235  ;;  %3239 = vlog2.f32 %v2472_v39  ;;  %v2281_v15 = vpop.xlane.xlu1 %2280  ;;  %v6294_v32 = vsel %vm7320_vm6, 1.0, %v7248_v40  ;;  %vm7322_vm4 = vcmp.ge.f32.partialorder %v7321_v34, 0.0  ;;  %v2384_v28 = vmul.f32 1.442695, %v1799_v51 }
 0x274   :  { %v6264_v36 = vpop.eup %3237  ;;  %v2565_v17 = vmul.f32 %v7241_v56, %v2513_v38  ;;  %v2511_v45 = vmul.f32 0.6931472, %v3236_v58  ;;  %v2471_v9 = vsel %vm2439_vm1, %v2407_v50, 1.0  ;;  %v2409_v60 = vsub.f32 %v2281_v15, %v3234_v23  ;;  %v7323_v23 = vld [vmem:[#allocation33_spill] sm:$0xff] }
 0x275   :  { %3241 = vlog2.f32 %v2471_v9  ;;  %v2482_v56 = vsel %vm2450_vm7, %v2418_v44, 1.0  ;;  %v6300_v5 = vsel %vm7322_vm4, 1.0, %v7248_v40  ;;  %vm7324_vm3 = vcmp.ge.f32.partialorder %v7323_v23, 0.0 }
 0x276   :  { %v2564_v21 = vmul.f32 %v7303_v57, %v2511_v45  ;;  %v2473_v2 = vsel %vm2441_vm8, %v2409_v60, 1.0  ;;  %3243 = vpow2.f32 %v2382_v31  ;;  %v2480_v57 = vsel %vm2448_vm10, %v2416_v59, 1.0 }
 0x277   :  { %3245 = vlog2.f32 %v2473_v2  ;;  %v2314_v26 = vpop.xlane.xlu2 %2313  ;;  %v6308_v38 = vsel %vm7324_vm3, 1.0, %v7248_v40  ;;  %v2607_v39 = vsel %vm1900_vm14, %v2565_v17, 0.0  ;;  %v6313_v58 = vsel %vm1900_vm14, %v6067_v55, 0.0 }
 0x278   :  { %v2605_v10 = vsel %vm1900_vm14, %v2564_v21, 0.0  ;;  %3247 = vpow2.f32 %v2380_v42  ;;  %v2609_v45 = vsel %vm1900_vm14, %v2566_v19, 0.0  ;;  %v1858_v17 = vmul.f32 %v6237_v7, %v1794_v35  ;;  %v7326_v19 = vld [vmem:[#allocation4_spill] sm:$0xff] }
 0x279   :  { %v3240_v44 = vpop.eup %3239  ;;  %3249 = vlog2.f32 %v2482_v56  ;;  %v2606_v37 = vadd.f32 %v2605_v10, %v6223_v14  ;;  %v2617_v14 = vsel %vm1900_vm14, %v6087_v8, 0.0  ;;  %v7325_v56 = vld [vmem:[#allocation43_spill] sm:$0xff]  ;;  %vm2451_vm2 = vcmp.gt.f32.partialorder %v6277_v53, 0.0 }
 0x27a   :  { %v2311_v61 = vpop.xlane.xlu0 %2310  ;;  %3251 = vlog2.f32 %v2481_v29  ;;  %v2519_v50 = vmul.f32 0.6931472, %v3240_v44  ;;  %v1801_v21 = vmin.f32 %v7325_v56, 1.0  ;;  %v1800_v29 = vmin.f32 %v7326_v19, 1.0 }
 0x27b   :  { %v3242_v31 = vpop.eup %3241  ;;  %3253 = vlog2.f32 %v2480_v57  ;;  %v2608_v59 = vadd.f32 %v2607_v39, %v2606_v37  ;;  %v2317_v15 = vpop.xlane.xlu1 %2316  ;;  %v7327_v57 = vld [vmem:[#allocation36_spill] sm:$0xff]  ;;  %vm2453_vm5 = vcmp.gt.f32.partialorder %v6286_v0, 0.0  ;;  %vm2455_vm7 = vcmp.gt.f32.partialorder %v6294_v32, 0.0 }
 0x27c   :  { %v3244_v42 = vpop.eup %3243  ;;  %v2568_v9 = vmul.f32 %v5969_v24, %v2519_v50  ;;  %v2517_v60 = vmul.f32 0.6931472, %v3242_v31  ;;  %3255 = vpow2.f32 %v2384_v28  ;;  %v1802_v10 = vmin.f32 %v7327_v57, 1.0 }
 0x27d   :  { %v3246_v33 = vpop.eup %3245  ;;  %v2610_v18 = vadd.f32 %v2609_v45, %v2608_v59  ;;  %v2420_v55 = vsub.f32 %v2314_v26, %v3244_v42  ;;  %v2388_v26 = vmul.f32 1.442695, %v1801_v21  ;;  %v2386_v28 = vmul.f32 1.442695, %v1800_v29 }
 0x27e   :  { %v3248_v8 = vpop.eup %3247  ;;  %v2567_v2 = vmul.f32 %v5974_v3, %v2517_v60  ;;  %v2521_v49 = vmul.f32 0.6931472, %v3246_v33  ;;  %v2390_v31 = vmul.f32 1.442695, %v1802_v10  ;;  %v2613_v59 = vsel %vm1900_vm14, %v2568_v9, 0.0 }
 0x27f   :  { %v6326_v24 = vpop.eup %3249  ;;  %v2419_v47 = vsub.f32 %v2311_v61, %v3248_v8  ;;  %v1747_v35 = vpop.xlane.xlu2 %1746  ;;  %v2484_v50 = vsel %vm2452_vm11, %v2420_v55, 1.0  ;;  %3257 = vpow2.f32 %v2388_v26  ;;  %v1860_v55 = vmul.f32 %v6242_v30, %v1796_v41 }
 0x280   :  { %v3252_v44 = vpop.eup %3251  ;;  %v2611_v34 = vsel %vm1900_vm14, %v2567_v2, 0.0  ;;  %v2569_v3 = vmul.f32 %v5979_v6, %v2521_v49  ;;  %v1827_v37 = vmul.f32 %v1747_v35, %v7296_v20  ;;  %v1859_v6 = vmul.f32 %v6232_v62, %v1795_v54 }
 0x281   :  { %v3254_v23 = vpop.eup %3253  ;;  %v2612_v39 = vadd.f32 %v2611_v34, %v2610_v18  ;;  %v2483_v18 = vsel %vm2451_vm2, %v2419_v47, 1.0  ;;  %3259 = vpow2.f32 %v2386_v28  ;;  %v2531_v47 = vmul.f32 0.6931472, %v6264_v36 }
 0x282   :  { %v1744_v61 = vpop.xlane.xlu0 %1743  ;;  %v2615_v42 = vsel %vm1900_vm14, %v2569_v3, 0.0  ;;  %v3256_v60 = vpop.eup %3255  ;;  %3261 = vlog2.f32 %v2484_v50  ;;  %v1891_v2 = vsub.f32 %v1827_v37, %v1859_v6  ;;  %v2535_v26 = vmul.f32 0.6931472, %v3254_v23 }
 0x283   :  { %v1826_v45 = vmul.f32 %v1744_v61, %v7297_v52  ;;  %v2614_v33 = vadd.f32 %v2613_v59, %v2612_v39  ;;  %v1750_v8 = vpop.xlane.xlu1 %1749  ;;  %v2421_v9 = vsub.f32 %v2317_v15, %v3256_v60  ;;  %3263 = vpow2.f32 %v2390_v31 }
 0x284   :  { %v1828_v54 = vmul.f32 %v1750_v8, %v7295_v22  ;;  %v2619_v52 = vsel %vm1900_vm14, %v6099_v48, 0.0  ;;  %3265 = vlog2.f32 %v2483_v18  ;;  %v1946_v28 = vsel %vm1900_vm14, %v1891_v2, 0.0 }
 0x285   :  { %v1890_v49 = vsub.f32 %v1826_v45, %v1858_v17  ;;  %v2616_v20 = vadd.f32 %v2615_v42, %v2614_v33  ;;  %v3258_v35 = vpop.eup %3257  ;;  %v2485_v37 = vsel %vm2453_vm5, %v2421_v9, 1.0  ;;  %vm2454_vm9 = vcmp.gt.f32.partialorder %v6300_v5, 0.0 }
 0x286   :  { %v1892_v17 = vsub.f32 %v1828_v54, %v1860_v55  ;;  %vm2456_vm0 = vcmp.gt.f32.partialorder %v6308_v38, 0.0  ;;  %3267 = vlog2.f32 %v2485_v37  ;;  %v1803_v60 = vmin.f32 %v5944_v46, 1.0 }
 0x287   :  { %v1944_v41 = vsel %vm1900_vm14, %v1890_v49, 0.0  ;;  %v2618_v34 = vadd.f32 %v2617_v14, %v2616_v20  ;;  %v2323_v3 = vpop.xlane.xlu2 %2322  ;;  %v3260_v39 = vpop.eup %3259  ;;  %v2574_v14 = vmul.f32 %v6189_v63, %v2531_v47  ;;  %v2537_v18 = vmul.f32 0.6931472, %v3252_v44 }
 0x288   :  { %v1945_v15 = vadd.f32 %v1944_v41, %v6253_v11  ;;  %v2423_v22 = vsub.f32 %v2323_v3, %v3258_v35  ;;  %v1948_v36 = vsel %vm1900_vm14, %v1892_v17, 0.0  ;;  %v3262_v23 = vpop.eup %3261  ;;  %v2623_v11 = vsel %vm1900_vm14, %v6150_v43, 0.0 }
 0x289   :  { %v2620_v48 = vadd.f32 %v2619_v52, %v2618_v34  ;;  %v3264_v59 = vpop.eup %3263  ;;  %v2539_v8 = vmul.f32 0.6931472, %v6326_v24  ;;  %v2576_v9 = vmul.f32 %v6237_v7, %v2535_v26  ;;  %v2543_v49 = vmul.f32 0.6931472, %v3262_v23 }
 0x28a   :  { %v1947_v50 = vadd.f32 %v1946_v28, %v1945_v15  ;;  %v3266_v33 = vpop.eup %3265  ;;  %v2487_v55 = vsel %vm2455_vm7, %v2423_v22, 1.0  ;;  %v2392_v47 = vmul.f32 1.442695, %v1803_v60  ;;  %v2627_v24 = vsel %vm1900_vm14, %v6138_v16, 0.0 }
 0x28b   :  { %v2622_v42 = vadd.f32 %v6313_v58, %v2620_v48  ;;  %v2625_v58 = vsel %vm1900_vm14, %v2574_v14, 0.0  ;;  %v2541_v54 = vmul.f32 0.6931472, %v3266_v33  ;;  %v2577_v7 = vmul.f32 %v6232_v62, %v2537_v18 }
 0x28c   :  { %v2320_v61 = vpop.xlane.xlu0 %2319  ;;  %v1949_v6 = vadd.f32 %v1948_v36, %v1947_v50  ;;  %v3268_v35 = vpop.eup %3267  ;;  %v2578_v26 = vmul.f32 %v6242_v30, %v2539_v8  ;;  %v2629_v34 = vsel %vm1900_vm14, %v2576_v9, 0.0  ;;  %v2580_v3 = vmul.f32 %v6272_v27, %v2543_v49  ;;  %v7328_v30 = vld [vmem:[#allocation32_spill] sm:$0xff] }
 0x28d   :  { %v2422_v31 = vsub.f32 %v2320_v61, %v3260_v39  ;;  %v2624_v2 = vadd.f32 %v2623_v11, %v2622_v42  ;;  %v1862_v37 = vmul.f32 %v6272_v27, %v1798_v1  ;;  %v1861_v16 = vmul.f32 %v6277_v53, %v1797_v12 }
 0x28e   :  { %v2326_v45 = vpop.xlane.xlu1 %2325  ;;  %vm7329_vm1 = vcmp.ge.f32.partialorder %v7328_v30, 0.0  ;;  %v2579_v48 = vmul.f32 %v6277_v53, %v2541_v54  ;;  %v2545_v1 = vmul.f32 0.6931472, %v3268_v35  ;;  %v2633_v12 = vsel %vm1900_vm14, %v2578_v26, 0.0 }
 0x28f   :  { %v2486_v63 = vsel %vm2454_vm9, %v2422_v31, 1.0  ;;  %v2424_v43 = vsub.f32 %v2326_v45, %v3264_v59  ;;  %v2626_v44 = vadd.f32 %v2625_v58, %v2624_v2  ;;  %v1756_v52 = vpop.xlane.xlu2 %1755  ;;  %v6395_v22 = vsel %vm7329_vm1, 1.0, %v7248_v40 }
 0x290   :  { %3269 = vlog2.f32 %v2486_v63  ;;  %v1830_v41 = vmul.f32 %v1756_v52, %v7310_v4  ;;  %v2631_v4 = vsel %vm1900_vm14, %v2577_v7, 0.0  ;;  %v1863_v23 = vmul.f32 %v6286_v0, %v1799_v51 }
 0x291   :  { %v2488_v20 = vsel %vm2456_vm0, %v2424_v43, 1.0  ;;  %3271 = vlog2.f32 %v2487_v55  ;;  %v2628_v15 = vadd.f32 %v2627_v24, %v2626_v44  ;;  %v2637_v14 = vsel %vm1900_vm14, %v2580_v3, 0.0 }
 0x292   :  { %3273 = vlog2.f32 %v2488_v20  ;;  %v1894_v27 = vsub.f32 %v1830_v41, %v1862_v37  ;;  %v1864_v31 = vmul.f32 %v6300_v5, %v1800_v29  ;;  %v2635_v45 = vsel %vm1900_vm14, %v2579_v48, 0.0 }
 0x293   :  { %v2630_v39 = vadd.f32 %v2629_v34, %v2628_v15  ;;  %3275 = vpow2.f32 %v2392_v47  ;;  %v2581_v51 = vmul.f32 %v6286_v0, %v2545_v1  ;;  %vm2457_vm8 = vcmp.gt.f32.partialorder %v6395_v22, 0.0 }
 0x294   :  { %v1753_v17 = vpop.xlane.xlu0 %1752  ;;  %v1866_v37 = vmul.f32 %v6308_v38, %v1802_v10  ;;  %v1865_v30 = vmul.f32 %v6294_v32, %v1801_v21 }
 0x295   :  { %v1829_v62 = vmul.f32 %v1753_v17, %v7311_v13  ;;  %v2632_v13 = vadd.f32 %v2631_v4, %v2630_v39  ;;  %v2639_v52 = vsel %vm1900_vm14, %v2581_v51, 0.0 }
 0x296   :  { %v3270_v28 = vpop.eup %3269  ;;  %v1759_v50 = vpop.xlane.xlu1 %1758 }
 0x297   :  { %v1893_v36 = vsub.f32 %v1829_v62, %v1861_v16  ;;  %v3272_v61 = vpop.eup %3271  ;;  %v1831_v40 = vmul.f32 %v1759_v50, %v7318_v25  ;;  %v2547_v53 = vmul.f32 0.6931472, %v3270_v28  ;;  %v2634_v42 = vadd.f32 %v2633_v12, %v2632_v13  ;;  %v1762_v55 = vpop.xlane.xlu2 %1761 }
 0x298   :  { %v3274_v59 = vpop.eup %3273  ;;  %v2549_v63 = vmul.f32 0.6931472, %v3272_v61  ;;  %v1952_v25 = vsel %vm1900_vm14, %v1894_v27, 0.0  ;;  %v1832_v43 = vmul.f32 %v1762_v55, %v7326_v19 }
 0x299   :  { %v1950_v11 = vsel %vm1900_vm14, %v1893_v36, 0.0  ;;  %v1895_v18 = vsub.f32 %v1831_v40, %v1863_v23  ;;  %v3276_v8 = vpop.eup %3275  ;;  %v2636_v9 = vadd.f32 %v2635_v45, %v2634_v42  ;;  %v2582_v49 = vmul.f32 %v6300_v5, %v2547_v53 }
 0x29a   :  { %v1951_v33 = vadd.f32 %v1950_v11, %v1949_v6  ;;  %v2551_v6 = vmul.f32 0.6931472, %v3274_v59  ;;  %v1896_v20 = vsub.f32 %v1832_v43, %v1864_v31  ;;  %v2583_v47 = vmul.f32 %v6294_v32, %v2549_v63 }
 0x29b   :  { %v1954_v58 = vsel %vm1900_vm14, %v1895_v18, 0.0  ;;  %v2638_v54 = vadd.f32 %v2637_v14, %v2636_v9  ;;  %v2641_v26 = vsel %vm1900_vm14, %v2582_v49, 0.0  ;;  %v2658_v63 = vlaneseq }
 0x29c   :  { %v1953_v2 = vadd.f32 %v1952_v25, %v1951_v33  ;;  %v2329_v29 = vpop.xlane.xlu0 %2328  ;;  %v1956_v19 = vsel %vm1900_vm14, %v1896_v20, 0.0  ;;  %v2584_v5 = vmul.f32 %v6308_v38, %v2551_v6  ;;  %v2643_v17 = vsel %vm1900_vm14, %v2583_v47, 0.0 }
 0x29d   :  { %v2425_v44 = vsub.f32 %v2329_v29, %v3276_v8  ;;  %v2640_v7 = vadd.f32 %v2639_v52, %v2638_v54  ;;  %v1867_v38 = vmul.f32 %v6395_v22, %v1803_v60  ;;  %v2659_v25 = vshrl.u32 %v2658_v63, 7 }
 0x29e   :  { %v1955_v0 = vadd.f32 %v1954_v58, %v1953_v2  ;;  %v1768_v35 = vpop.xlane.xlu1 %1767  ;;  %v2645_v48 = vsel %vm1900_vm14, %v2584_v5, 0.0  ;;  %v2661_v43 = vand.u32 127, %v2658_v63 }
 0x29f   :  { %v2489_v24 = vsel %vm2457_vm8, %v2425_v44, 1.0  ;;  %v2642_v34 = vadd.f32 %v2641_v26, %v2640_v7  ;;  %v1771_v15 = vpop.xlane.xlu2 %1770  ;;  %v1834_v3 = vmul.f32 %v1768_v35, %v7327_v57 }
 0x2a0   :  { %v1957_v41 = vadd.f32 %v1956_v19, %v1955_v0  ;;  %3277 = vlog2.f32 %v2489_v24  ;;  %v1835_v28 = vmul.f32 %v1771_v15, %v5944_v46  ;;  %vm2663_vm12 = vcmp.eq.s32.totalorder %v2661_v43, 0 }
 0x2a1   :  { %v2644_v62 = vadd.f32 %v2643_v17, %v2642_v34  ;;  %v1898_v27 = vsub.f32 %v1834_v3, %v1866_v37  ;;  %vm2667_vm13 = vcmp.eq.s32.totalorder %v2661_v43, 1 }
 0x2a2   :  { %v1899_v36 = vsub.f32 %v1835_v28, %v1867_v38 }
 0x2a3   :  { %v2646_v4 = vadd.f32 %v2645_v48, %v2644_v62  ;;  %v1960_v32 = vsel %vm1900_vm14, %v1898_v27, 0.0 }
 0x2a4   :  { %v1765_v16 = vpop.xlane.xlu0 %1764  ;;  %v1962_v23 = vsel %vm1900_vm14, %v1899_v36, 0.0 }
 0x2a5   :  { %v1833_v39 = vmul.f32 %v1765_v16, %v7325_v56 }
 0x2a6   :  { %v3278_v50 = vpop.eup %3277 }
 0x2a7   :  { %v2553_v1 = vmul.f32 0.6931472, %v3278_v50  ;;  %v1897_v57 = vsub.f32 %v1833_v39, %v1865_v30 }
 0x2a9   :  { %v2585_v10 = vmul.f32 %v6395_v22, %v2553_v1  ;;  %v1958_v61 = vsel %vm1900_vm14, %v1897_v57, 0.0 }
 0x2aa   :  { %v1959_v12 = vadd.f32 %v1958_v61, %v1957_v41 }
 0x2ab   :  { %v2647_v56 = vsel %vm1900_vm14, %v2585_v10, 0.0  ;;  %vm2662_vm14 = vcmp.eq.s32.totalorder %v2659_v25, 0 }
 0x2ac   :  { %v2648_v21 = vadd.f32 %v2647_v56, %v2646_v4  ;;  %v1961_v13 = vadd.f32 %v1960_v32, %v1959_v12  ;;  %vm2664_vm10 = vmand %vm2662_vm14, %vm2663_vm12 }
 0x2ad   :  { %vm2668_vm15 = vmand %vm2662_vm14, %vm2667_vm13 }
 0x2ae   :  { %2649 = vadd.xlane.f32.xlu1 %v2648_v21  ;;  %v1963_v40 = vadd.f32 %v1962_v23, %v1961_v13 }
 0x2b0   :  { %1964 = vadd.xlane.f32.xlu0 %v1963_v40 }
 0x321   :  { %v2650_v46 = vpop.xlane.xlu1 %2649 }
 0x322   :  { %v2651_v60 = vrot.slane %v2650_v46, 4 }
 0x323   :  { %v1965_v14 = vpop.xlane.xlu0 %1964 }
 0x324   :  { %v2652_v53 = vadd.f32 %v2651_v60, %v2650_v46  ;;  %v1966_v22 = vrot.slane %v1965_v14, 4 }
 0x326   :  { %v2653_v11 = vrot.slane %v2652_v53, 2  ;;  %v1967_v31 = vadd.f32 %v1966_v22, %v1965_v14 }
 0x328   :  { %v2654_v59 = vadd.f32 %v2653_v11, %v2652_v53  ;;  %v1968_v42 = vrot.slane %v1967_v31, 2 }
 0x32a   :  { %v1969_v45 = vadd.f32 %v1968_v42, %v1967_v31  ;;  %v2655_v33 = vrot.slane %v2654_v59, 1 }
 0x32c   :  { %v1970_v18 = vrot.slane %v1969_v45, 1  ;;  %v2656_v51 = vadd.f32 %v2655_v33, %v2654_v59 }
 0x32e   :  { %v1971_v55 = vadd.f32 %v1970_v18, %v1969_v45 }
 0x330   :  { %2950 = vpush %v1971_v55 }
 0x331   :  { %2952 = vpush %v2656_v51 }
 0x361   :  { %s2951_s3 = spop %2950 }
 0x362   :  { %v2665_v8 = vstv %s2951_s3  ;;  %s2953_s18 = spop %2952 }
 0x363   :  { %v2666_v9 = vsel %vm2664_vm10, %v2665_v8, 0.0  ;;  %v2669_v2 = vstv %s2953_s18 }
 0x364   :  { %v2670_v58 = vsel %vm2668_vm15, %v2669_v2, 0.0 }
 0x365   :  { %v2671_v29 = vadd.f32 %v2670_v58, %v2666_v9 }
 0x367   :  { %2672 = vst [vmem:[%s6447_s4] sm:$0xff] %v2671_v29 }

</bundles_post_ra>
